<compile_context>
chip_gen: v7x
topology: tpu7x:2x2x1
jax: 0.10.0
libtpu: 0.0.40
codegen_flags: <defaults>
</compile_context>

<pallas_src>
import numpy as np

import jax
import jax.numpy as jnp
from jax.experimental import pallas as pl
from jax.experimental.pallas import tpu as pltpu


INPUT_DIM = 42
NUM_MODELS = 5
HEAD_PAD = 8            # lane-padded width of the stacked head slab
NEG_INF = -1e30

_H_LSTM = 64
_N_LSTM_LAYERS = 4
_D_MODEL = 64
_D_FF = 128
_N_TR_LAYERS = 4
# TCN static config: kernel_size=3, per block (dilation, C_in, C_out)
_TCN_CFG = [(1, INPUT_DIM, 64), (2, 64, 64), (4, 64, 32)]


# ----------------------------------------------------------------------------
# In-kernel helpers
# ----------------------------------------------------------------------------

def _layer_norm(x, gamma, beta, eps=1e-5):
    mean = jnp.mean(x, axis=-1, keepdims=True)
    var = jnp.mean(jnp.square(x - mean), axis=-1, keepdims=True)
    return (x - mean) * jax.lax.rsqrt(var + eps) * gamma + beta


def _conv_block(xs, w, b, dilation, c_out):
    """Dilated Conv1d(K=3, stride=1, padding=2*dilation) + ReLU, in-kernel.

    xs: list (length L_in) of (TB, C_in) per-position activations (real seq).
    w : (C_in, 3*C_out); tap k lives in columns [k*C_out : (k+1)*C_out].
    b : (1, C_out).
    Returns a list (length L_in + 2*dilation) of (TB, C_out) activations.
    Matches the reference TemporalBlock (no Chomp1d, no residual).
    """
    K = 3
    pad = (K - 1) * dilation
    L_in = len(xs)
    L_out = L_in + 2 * pad - dilation * (K - 1)
    rows = xs[0].shape[0]

    acc = [None] * L_out
    for r in range(L_in):                       # real (unpadded) input position
        z = jnp.dot(xs[r], w, preferred_element_type=jnp.float32)   # (TB, 3*C_out)
        for k in range(K):
            t = r + pad - k * dilation          # output position fed by this tap
            if 0 <= t < L_out:
                zk = z[:, k * c_out:(k + 1) * c_out]
                acc[t] = zk if acc[t] is None else acc[t] + zk
    out = []
    for t in range(L_out):
        if acc[t] is None:                      # receptive field entirely padding
            y = jnp.broadcast_to(b, (rows, c_out))
        else:
            y = acc[t] + b
        out.append(jnp.maximum(y, 0.0))
    return out


# ----------------------------------------------------------------------------
# The fused ensemble kernel
# ----------------------------------------------------------------------------

def _ensemble_kernel(
    x_ref,
    w_in_ref, b_in_ref,                  # fused first layer (42, 320)
    mlp_w2_ref, mlp_b2_ref,              # MLP fc2
    tcn_w1_ref, tcn_b1_ref,              # TCN blocks (tap-major conv weights)
    tcn_w2_ref, tcn_b2_ref,
    tcn_w3_ref, tcn_b3_ref,
    lstm_w_ref, lstm_b_ref,              # (4, 64, 192), (4, 1, 192)  [i|g|o]
    tr_wsa_ref, tr_bsa_ref,              # folded attention (4, 64, 64)
    tr_ln1g_ref, tr_ln1b_ref,
    tr_w1_ref, tr_b1_ref, tr_w2_ref, tr_b2_ref,
    tr_ln2g_ref, tr_ln2b_ref,
    ae_w2_ref, ae_b2_ref,                # AE encoder second layer
    head_w_ref, head_b_ref,              # stacked heads (256, 8), (1, 8)
    ens_w_ref,                           # ensemble logits (1, 8), pads = -inf
    out_ref,                             # (TB, 1)
):
    x = x_ref[...]                                              # (TB, 42)

    # ---- fused first layer: [MLP.fc1 | LSTM.emb | TR.emb | AE.enc1] --------
    fused = jnp.dot(x, w_in_ref[...], preferred_element_type=jnp.float32)
    fused = fused + b_in_ref[...]                               # (TB, 320)
    mlp_h1 = jnp.maximum(fused[:, 0:128], 0.0)
    lstm_h = fused[:, 128:192]
    tr_h = fused[:, 192:256]
    ae_h1 = jnp.maximum(fused[:, 256:320], 0.0)

    # ---- MLP: relu(fc2) -----------------------------------------------------
    mlp_h2 = jnp.dot(mlp_h1, mlp_w2_ref[...], preferred_element_type=jnp.float32)
    mlp_h2 = jnp.maximum(mlp_h2 + mlp_b2_ref[...], 0.0)         # (TB, 64)

    # ---- TCN: 42 channels, length 1 -> 3 -> 7 -> 15, then mean over length --
    seq = [x]
    seq = _conv_block(seq, tcn_w1_ref[...], tcn_b1_ref[...], 1, 64)
    seq = _conv_block(seq, tcn_w2_ref[...], tcn_b2_ref[...], 2, 64)
    seq = _conv_block(seq, tcn_w3_ref[...], tcn_b3_ref[...], 4, 32)
    tcn_feat = seq[0]
    for t in range(1, len(seq)):
        tcn_feat = tcn_feat + seq[t]
    tcn_feat = tcn_feat * (1.0 / float(len(seq)))               # (TB, 32)

    # ---- LSTM: 4 single-step cells, h0 = c0 = 0 (dead f-gate dropped) -------
    H = _H_LSTM
    h = lstm_h
    for l in range(_N_LSTM_LAYERS):
        gates = jnp.dot(h, lstm_w_ref[l], preferred_element_type=jnp.float32)
        gates = gates + lstm_b_ref[l]                           # (TB, 3H): [i|g|o]
        i_g = jax.nn.sigmoid(gates[:, 0:H])
        g_g = jnp.tanh(gates[:, H:2 * H])
        o_g = jax.nn.sigmoid(gates[:, 2 * H:3 * H])
        h = o_g * jnp.tanh(i_g * g_g)                           # c_prev == 0
    lstm_out = h                                                # (TB, 64)

    # ---- Transformer encoder (post-norm); seq_len == 1 so attention is the
    #      pre-folded single (64,64) matmul out_proj(v_proj(.)) per layer -----
    h = tr_h
    for l in range(_N_TR_LAYERS):
        sa = jnp.dot(h, tr_wsa_ref[l], preferred_element_type=jnp.float32)
        sa = sa + tr_bsa_ref[l]
        h = _layer_norm(h + sa, tr_ln1g_ref[l], tr_ln1b_ref[l])
        ff = jnp.dot(h, tr_w1_ref[l], preferred_element_type=jnp.float32)
        ff = jnp.maximum(ff + tr_b1_ref[l], 0.0)
        ff = jnp.dot(ff, tr_w2_ref[l], preferred_element_type=jnp.float32)
        ff = ff + tr_b2_ref[l]
        h = _layer_norm(h + ff, tr_ln2g_ref[l], tr_ln2b_ref[l])
    tr_out = h                                                  # (TB, 64)

    # ---- Autoencoder: latent only (decoder output is discarded upstream) ----
    ae_latent = jnp.dot(ae_h1, ae_w2_ref[...], preferred_element_type=jnp.float32)
    ae_latent = ae_latent + ae_b2_ref[...]                      # (TB, 32)

    # ---- Five sigmoid heads into one lane-padded (TB, 8) slab, then
    #      softmax-weighted ensemble combine ---------------------------------
    hw = head_w_ref[...]                                        # (256, 8)
    heads = (
        jnp.dot(mlp_h2,    hw[0:64, :],    preferred_element_type=jnp.float32)
        + jnp.dot(tcn_feat, hw[64:96, :],   preferred_element_type=jnp.float32)
        + jnp.dot(lstm_out, hw[96:160, :],  preferred_element_type=jnp.float32)
        + jnp.dot(tr_out,   hw[160:224, :], preferred_element_type=jnp.float32)
        + jnp.dot(ae_latent, hw[224:256, :], preferred_element_type=jnp.float32)
        + head_b_ref[...])
    heads = jax.nn.sigmoid(heads)                               # (TB, 8)

    w_soft = jax.nn.softmax(ens_w_ref[...], axis=-1)            # (1, 8); pads -> 0
    out_ref[...] = jnp.sum(heads * w_soft, axis=1, keepdims=True)


# ----------------------------------------------------------------------------
# Wrapper: batch-tiled pallas_call
# ----------------------------------------------------------------------------

def _round_up(n, m):
    return ((n + m - 1) // m) * m


def _full_block_spec(shape):
    zeros = (0,) * len(shape)

    def index_map(i):
        return zeros

    return pl.BlockSpec(tuple(shape), index_map)


def ensemble_forward(prepared, x, tile=256):
    """prepared: tuple of kernel-ready weight arrays (see prepare_params).
    x: (B, 42) float. Returns (B,) float32."""
    B = x.shape[0]
    assert x.shape[1] == INPUT_DIM
    TB = min(tile, _round_up(max(B, 1), 8))
    B_pad = _round_up(B, TB)

    x = x.astype(jnp.float32)
    if B_pad != B:
        x = jnp.pad(x, ((0, B_pad - B), (0, 0)))

    in_specs = [pl.BlockSpec((TB, INPUT_DIM), lambda i: (i, 0))]
    in_specs += [_full_block_spec(w.shape) for w in prepared]

    out = pl.pallas_call(
        _ensemble_kernel,
        out_shape=jax.ShapeDtypeStruct((B_pad, 1), jnp.float32),
        grid=(B_pad // TB,),
        in_specs=in_specs,
        out_specs=pl.BlockSpec((TB, 1), lambda i: (i, 0)),
        compiler_params=pltpu.CompilerParams(
            dimension_semantics=("parallel",),
            vmem_limit_bytes=32 * 1024 * 1024,
        ),
    )(x, *prepared)
    return out[:B, 0]


# ----------------------------------------------------------------------------
# Deterministic raw parameters (PyTorch-default-style uniform init)
# ----------------------------------------------------------------------------

def _uniform(key, shape, bound):
    return jax.random.uniform(key, shape, jnp.float32, -bound, bound)


def _init_linear(key, fan_in, fan_out):
    kw, kb = jax.random.split(key)
    bound = 1.0 / np.sqrt(fan_in)
    return _uniform(kw, (fan_in, fan_out), bound), _uniform(kb, (fan_out,), bound)


def make_raw_params(key, mothernet_output, input_dim=INPUT_DIM, output_dim=1):
    keys = iter(jax.random.split(key, 64))
    p = {}

    # MLP: 42 -> 128 -> 64 -> 1
    w1, b1 = _init_linear(next(keys), input_dim, 128)
    w2, b2 = _init_linear(next(keys), 128, 64)
    w3, b3 = _init_linear(next(keys), 64, output_dim)
    p["mlp"] = {"w1": w1, "b1": b1, "w2": w2, "b2": b2, "w3": w3, "b3": b3}

    # TCN: channels [64, 64, 32], kernel_size=3 (weight_norm == effective weight)
    blocks = []
    for (_, cin, cout) in _TCN_CFG:
        kw, kb = jax.random.split(next(keys))
        bound = 1.0 / np.sqrt(cin * 3)
        blocks.append({"w": _uniform(kw, (cout, cin, 3), bound),
                       "b": _uniform(kb, (cout,), bound)})
    fcw, fcb = _init_linear(next(keys), 32, output_dim)
    p["tcn"] = {"blocks": blocks, "fcw": fcw, "fcb": fcb}

    # LSTM: embed 42->64, 4 layers hidden 64.  Weight stored as W_ih^T with
    # PyTorch gate order [i | f | g | o] along the output axis; bias = b_ih+b_hh.
    H = _H_LSTM
    embw, embb = _init_linear(next(keys), input_dim, H)
    layers_w, layers_b = [], []
    for _ in range(_N_LSTM_LAYERS):
        kw, kb1, kb2 = jax.random.split(next(keys), 3)
        bound = 1.0 / np.sqrt(H)
        layers_w.append(_uniform(kw, (H, 4 * H), bound))
        layers_b.append(_uniform(kb1, (4 * H,), bound) + _uniform(kb2, (4 * H,), bound))
    fcw, fcb = _init_linear(next(keys), H, output_dim)
    p["lstm"] = {"embw": embw, "embb": embb,
                 "layers_w": layers_w, "layers_b": layers_b,
                 "fcw": fcw, "fcb": fcb}

    # Transformer: embed 42->64, 4 post-norm encoder layers, d_ff=128
    d_model, d_ff = _D_MODEL, _D_FF
    embw, embb = _init_linear(next(keys), input_dim, d_model)
    layers = []
    for _ in range(_N_TR_LAYERS):
        wv, bv = _init_linear(next(keys), d_model, d_model)
        wo, bo = _init_linear(next(keys), d_model, d_model)
        w1f, b1f = _init_linear(next(keys), d_model, d_ff)
        w2f, b2f = _init_linear(next(keys), d_ff, d_model)
        layers.append({"wv": wv, "bv": bv, "wo": wo, "bo": bo,
                       "ln1_g": jnp.ones((d_model,), jnp.float32),
                       "ln1_b": jnp.zeros((d_model,), jnp.float32),
                       "w1": w1f, "b1": b1f, "w2": w2f, "b2": b2f,
                       "ln2_g": jnp.ones((d_model,), jnp.float32),
                       "ln2_b": jnp.zeros((d_model,), jnp.float32)})
    fcw, fcb = _init_linear(next(keys), d_model, output_dim)
    p["transformer"] = {"embw": embw, "embb": embb, "layers": layers,
                        "fcw": fcw, "fcb": fcb}

    # Autoencoder: enc 42->64->32, dec 32->64->42 (decoder output discarded by
    # the reference forward; kept in "raw" to mirror the checkpoint), fc 32->1
    e1w, e1b = _init_linear(next(keys), input_dim, 64)
    e2w, e2b = _init_linear(next(keys), 64, 32)
    d1w, d1b = _init_linear(next(keys), 32, 64)
    d2w, d2b = _init_linear(next(keys), 64, input_dim)
    fcw, fcb = _init_linear(next(keys), 32, output_dim)
    p["autoencoder"] = {"e1w": e1w, "e1b": e1b, "e2w": e2w, "e2b": e2b,
                        "d1w": d1w, "d1b": d1b, "d2w": d2w, "d2b": d2b,
                        "fcw": fcw, "fcb": fcb}

    # Ensemble weights = MotherNet_output.mean(dim=0) -> (5,)
    p["weights"] = jnp.mean(mothernet_output.astype(jnp.float32), axis=0)
    return p


# ----------------------------------------------------------------------------
# One-time weight fusion / folding / re-layout (all casts & reshapes hoisted)
# ----------------------------------------------------------------------------

def prepare_params(p):
    f32 = lambda a: jnp.asarray(a, jnp.float32)
    row = lambda a: jnp.asarray(a, jnp.float32).reshape(1, -1)

    mlp, tcn, lstm = p["mlp"], p["tcn"], p["lstm"]
    tr, ae = p["transformer"], p["autoencoder"]

    # Fused first layer: x @ [MLP.fc1 (128) | LSTM.emb (64) | TR.emb (64) | AE.enc1 (64)]
    w_in = jnp.concatenate(
        [f32(mlp["w1"]), f32(lstm["embw"]), f32(tr["embw"]), f32(ae["e1w"])], axis=1)
    b_in = jnp.concatenate(
        [row(mlp["b1"]), row(lstm["embb"]), row(tr["embb"]), row(ae["e1b"])], axis=1)

    # TCN conv weights: (C_out, C_in, K) -> tap-major (C_in, K*C_out)
    def conv_wide(w):
        w = f32(w)
        return jnp.concatenate([w[:, :, k].T for k in range(w.shape[2])], axis=1)

    tcn_args = []
    for blk in tcn["blocks"]:
        tcn_args += [conv_wide(blk["w"]), row(blk["b"])]

    # LSTM: drop the dead f gate -> (64, 3H) weights and (1, 3H) bias per layer
    H = _H_LSTM
    lw, lb = [], []
    for w, b in zip(lstm["layers_w"], lstm["layers_b"]):
        w, b = f32(w), f32(b)
        lw.append(jnp.concatenate([w[:, 0:H], w[:, 2 * H:3 * H], w[:, 3 * H:4 * H]], axis=1))
        lb.append(jnp.concatenate([b[0:H], b[2 * H:3 * H], b[3 * H:4 * H]]).reshape(1, 3 * H))
    lstm_w = jnp.stack(lw)                   # (4, 64, 192)
    lstm_b = jnp.stack(lb)                   # (4, 1, 192)

    # Transformer: fold out_proj(v_proj(.)) (exact for seq_len == 1 / eval)
    wsa, bsa, ln1g, ln1b, w1, b1, w2, b2, ln2g, ln2b = ([] for _ in range(10))
    for lyr in tr["layers"]:
        wv, wo = f32(lyr["wv"]), f32(lyr["wo"])
        wsa.append(wv @ wo)
        bsa.append(row(lyr["bv"]) @ wo + row(lyr["bo"]))
        ln1g.append(row(lyr["ln1_g"])); ln1b.append(row(lyr["ln1_b"]))
        w1.append(f32(lyr["w1"])); b1.append(row(lyr["b1"]))
        w2.append(f32(lyr["w2"])); b2.append(row(lyr["b2"]))
        ln2g.append(row(lyr["ln2_g"])); ln2b.append(row(lyr["ln2_b"]))
    tr_args = [jnp.stack(a) for a in (wsa, bsa, ln1g, ln1b, w1, b1, w2, b2, ln2g, ln2b)]

    # Five (hidden -> 1) heads stacked into one lane-padded (256, 8) matrix.
    # Row layout matches the in-kernel head inputs:
    #   [MLP 0:64 | TCN 64:96 | LSTM 96:160 | TR 160:224 | AE 224:256]
    head_w = jnp.zeros((256, HEAD_PAD), jnp.float32)
    head_b = jnp.zeros((1, HEAD_PAD), jnp.float32)
    segs = [(0, f32(mlp["w3"]), f32(mlp["b3"])),
            (64, f32(tcn["fcw"]), f32(tcn["fcb"])),
            (96, f32(lstm["fcw"]), f32(lstm["fcb"])),
            (160, f32(tr["fcw"]), f32(tr["fcb"])),
            (224, f32(ae["fcw"]), f32(ae["fcb"]))]
    for col, (off, w, b) in enumerate(segs):
        head_w = head_w.at[off:off + w.shape[0], col].set(w[:, 0])
        head_b = head_b.at[0, col].set(b[0])

    # Ensemble logits, lane-padded with -inf so the in-kernel softmax ignores pads
    ens_w = jnp.full((1, HEAD_PAD), NEG_INF, jnp.float32)
    ens_w = ens_w.at[0, :NUM_MODELS].set(f32(p["weights"]))

    return (w_in, b_in,
            f32(mlp["w2"]), row(mlp["b2"]),
            *tcn_args,
            lstm_w, lstm_b,
            *tr_args,
            f32(ae["e2w"]), row(ae["e2b"]),
            head_w, head_b,
            ens_w)


# ----------------------------------------------------------------------------

if __name__ == "__main__":
    key = jax.random.PRNGKey(0)
    kx, km, kp = jax.random.split(key, 3)

    batch = 2
    x = jax.random.normal(kx, (batch, INPUT_DIM), jnp.float32)
    mothernet_output = jax.random.normal(km, (4, NUM_MODELS), jnp.float32)

    raw = make_raw_params(kp, mothernet_output, input_dim=INPUT_DIM, output_dim=1)
    prepared = prepare_params(raw)

    fwd = jax.jit(ensemble_forward)
    out = jax.block_until_ready(fwd(prepared, x))

    assert out.shape == (batch,), out.shape
    assert bool(jnp.all(jnp.isfinite(out)))
    # convex combination of sigmoids -> strictly inside (0, 1)
    assert bool(jnp.all((out > 0.0) & (out < 1.0)))
    print("KERNEL_OK")
</pallas_src>

<mosaic_0001>
module attributes {stable_mosaic.version = 11 : i64} {
  func.func @_ensemble_kernel(%arg0: i32, %arg1: memref<8x42xf32, #tpu.memory_space<vmem>>, %arg2: memref<42x320xf32, #tpu.memory_space<vmem>>, %arg3: memref<1x320xf32, #tpu.memory_space<vmem>>, %arg4: memref<128x64xf32, #tpu.memory_space<vmem>>, %arg5: memref<1x64xf32, #tpu.memory_space<vmem>>, %arg6: memref<42x192xf32, #tpu.memory_space<vmem>>, %arg7: memref<1x64xf32, #tpu.memory_space<vmem>>, %arg8: memref<64x192xf32, #tpu.memory_space<vmem>>, %arg9: memref<1x64xf32, #tpu.memory_space<vmem>>, %arg10: memref<64x96xf32, #tpu.memory_space<vmem>>, %arg11: memref<1x32xf32, #tpu.memory_space<vmem>>, %arg12: memref<4x64x192xf32, #tpu.memory_space<vmem>>, %arg13: memref<4x1x192xf32, #tpu.memory_space<vmem>>, %arg14: memref<4x64x64xf32, #tpu.memory_space<vmem>>, %arg15: memref<4x1x64xf32, #tpu.memory_space<vmem>>, %arg16: memref<4x1x64xf32, #tpu.memory_space<vmem>>, %arg17: memref<4x1x64xf32, #tpu.memory_space<vmem>>, %arg18: memref<4x64x128xf32, #tpu.memory_space<vmem>>, %arg19: memref<4x1x128xf32, #tpu.memory_space<vmem>>, %arg20: memref<4x128x64xf32, #tpu.memory_space<vmem>>, %arg21: memref<4x1x64xf32, #tpu.memory_space<vmem>>, %arg22: memref<4x1x64xf32, #tpu.memory_space<vmem>>, %arg23: memref<4x1x64xf32, #tpu.memory_space<vmem>>, %arg24: memref<64x32xf32, #tpu.memory_space<vmem>>, %arg25: memref<1x32xf32, #tpu.memory_space<vmem>>, %arg26: memref<256x8xf32, #tpu.memory_space<vmem>>, %arg27: memref<1x8xf32, #tpu.memory_space<vmem>>, %arg28: memref<1x8xf32, #tpu.memory_space<vmem>>, %arg29: memref<8x1xf32, #tpu.memory_space<vmem>>) attributes {dimension_semantics = [#tpu.dimension_semantics<parallel>], iteration_bounds = array<i64: 1>, scalar_prefetch = 0 : i64, scratch_operands = 0 : i64, tpu.core_type = #tpu.core_type<tc>, window_params = [{transform_indices = @transform_0, window_bounds = array<i64: 8, 42>}, {pipeline_mode = #tpu.pipeline_mode<synchronous>, transform_indices = @transform_1, window_bounds = array<i64: 42, 320>}, {pipeline_mode = #tpu.pipeline_mode<synchronous>, transform_indices = @transform_2, window_bounds = array<i64: 1, 320>}, {pipeline_mode = #tpu.pipeline_mode<synchronous>, transform_indices = @transform_3, window_bounds = array<i64: 128, 64>}, {pipeline_mode = #tpu.pipeline_mode<synchronous>, transform_indices = @transform_4, window_bounds = array<i64: 1, 64>}, {pipeline_mode = #tpu.pipeline_mode<synchronous>, transform_indices = @transform_5, window_bounds = array<i64: 42, 192>}, {pipeline_mode = #tpu.pipeline_mode<synchronous>, transform_indices = @transform_6, window_bounds = array<i64: 1, 64>}, {pipeline_mode = #tpu.pipeline_mode<synchronous>, transform_indices = @transform_7, window_bounds = array<i64: 64, 192>}, {pipeline_mode = #tpu.pipeline_mode<synchronous>, transform_indices = @transform_8, window_bounds = array<i64: 1, 64>}, {pipeline_mode = #tpu.pipeline_mode<synchronous>, transform_indices = @transform_9, window_bounds = array<i64: 64, 96>}, {pipeline_mode = #tpu.pipeline_mode<synchronous>, transform_indices = @transform_10, window_bounds = array<i64: 1, 32>}, {pipeline_mode = #tpu.pipeline_mode<synchronous>, transform_indices = @transform_11, window_bounds = array<i64: 4, 64, 192>}, {pipeline_mode = #tpu.pipeline_mode<synchronous>, transform_indices = @transform_12, window_bounds = array<i64: 4, 1, 192>}, {pipeline_mode = #tpu.pipeline_mode<synchronous>, transform_indices = @transform_13, window_bounds = array<i64: 4, 64, 64>}, {pipeline_mode = #tpu.pipeline_mode<synchronous>, transform_indices = @transform_14, window_bounds = array<i64: 4, 1, 64>}, {pipeline_mode = #tpu.pipeline_mode<synchronous>, transform_indices = @transform_15, window_bounds = array<i64: 4, 1, 64>}, {pipeline_mode = #tpu.pipeline_mode<synchronous>, transform_indices = @transform_16, window_bounds = array<i64: 4, 1, 64>}, {pipeline_mode = #tpu.pipeline_mode<synchronous>, transform_indices = @transform_17, window_bounds = array<i64: 4, 64, 128>}, {pipeline_mode = #tpu.pipeline_mode<synchronous>, transform_indices = @transform_18, window_bounds = array<i64: 4, 1, 128>}, {pipeline_mode = #tpu.pipeline_mode<synchronous>, transform_indices = @transform_19, window_bounds = array<i64: 4, 128, 64>}, {pipeline_mode = #tpu.pipeline_mode<synchronous>, transform_indices = @transform_20, window_bounds = array<i64: 4, 1, 64>}, {pipeline_mode = #tpu.pipeline_mode<synchronous>, transform_indices = @transform_21, window_bounds = array<i64: 4, 1, 64>}, {pipeline_mode = #tpu.pipeline_mode<synchronous>, transform_indices = @transform_22, window_bounds = array<i64: 4, 1, 64>}, {pipeline_mode = #tpu.pipeline_mode<synchronous>, transform_indices = @transform_23, window_bounds = array<i64: 64, 32>}, {pipeline_mode = #tpu.pipeline_mode<synchronous>, transform_indices = @transform_24, window_bounds = array<i64: 1, 32>}, {pipeline_mode = #tpu.pipeline_mode<synchronous>, transform_indices = @transform_25, window_bounds = array<i64: 256, 8>}, {pipeline_mode = #tpu.pipeline_mode<synchronous>, transform_indices = @transform_26, window_bounds = array<i64: 1, 8>}, {pipeline_mode = #tpu.pipeline_mode<synchronous>, transform_indices = @transform_27, window_bounds = array<i64: 1, 8>}, {transform_indices = @transform_28, window_bounds = array<i64: 8, 1>}]} {
    %c0 = arith.constant 0 : index
    %c0_0 = arith.constant 0 : index
    %0 = vector.load %arg1[%c0, %c0_0] : memref<8x42xf32, #tpu.memory_space<vmem>>, vector<8x42xf32>
    %c0_1 = arith.constant 0 : index
    %c0_2 = arith.constant 0 : index
    %1 = vector.load %arg2[%c0_1, %c0_2] : memref<42x320xf32, #tpu.memory_space<vmem>>, vector<42x320xf32>
    %cst = arith.constant dense<0.000000e+00> : vector<8x320xf32>
    %2 = tpu.matmul %0, %1, %cst {dimension_numbers = #tpu.dot_dimension_numbers<[1], [0], [0], [1], [0, 0, 1, 1], [], []>} : vector<8x42xf32>, vector<42x320xf32>, vector<8x320xf32> -> vector<8x320xf32>
    %c0_3 = arith.constant 0 : index
    %c0_4 = arith.constant 0 : index
    %3 = vector.load %arg3[%c0_3, %c0_4] : memref<1x320xf32, #tpu.memory_space<vmem>>, vector<1x320xf32>
    %4 = vector.broadcast %3 : vector<1x320xf32> to vector<8x320xf32>
    %5 = arith.addf %2, %4 : vector<8x320xf32>
    %6 = vector.extract_strided_slice %5 {offsets = [0, 0], sizes = [8, 128], strides = [1, 1]} : vector<8x320xf32> to vector<8x128xf32>
    %cst_5 = arith.constant 0.000000e+00 : f32
    %7 = vector.broadcast %cst_5 : f32 to vector<8x128xf32>
    %8 = arith.maximumf %6, %7 : vector<8x128xf32>
    %9 = vector.extract_strided_slice %5 {offsets = [0, 128], sizes = [8, 64], strides = [1, 1]} : vector<8x320xf32> to vector<8x64xf32>
    %10 = vector.extract_strided_slice %5 {offsets = [0, 192], sizes = [8, 64], strides = [1, 1]} : vector<8x320xf32> to vector<8x64xf32>
    %11 = vector.extract_strided_slice %5 {offsets = [0, 256], sizes = [8, 64], strides = [1, 1]} : vector<8x320xf32> to vector<8x64xf32>
    %cst_6 = arith.constant 0.000000e+00 : f32
    %12 = vector.broadcast %cst_6 : f32 to vector<8x64xf32>
    %13 = arith.maximumf %11, %12 : vector<8x64xf32>
    %c0_7 = arith.constant 0 : index
    %c0_8 = arith.constant 0 : index
    %14 = vector.load %arg4[%c0_7, %c0_8] : memref<128x64xf32, #tpu.memory_space<vmem>>, vector<128x64xf32>
    %cst_9 = arith.constant dense<0.000000e+00> : vector<8x64xf32>
    %15 = tpu.matmul %8, %14, %cst_9 {dimension_numbers = #tpu.dot_dimension_numbers<[1], [0], [0], [1], [0, 0, 1, 1], [], []>} : vector<8x128xf32>, vector<128x64xf32>, vector<8x64xf32> -> vector<8x64xf32>
    %c0_10 = arith.constant 0 : index
    %c0_11 = arith.constant 0 : index
    %16 = vector.load %arg5[%c0_10, %c0_11] : memref<1x64xf32, #tpu.memory_space<vmem>>, vector<1x64xf32>
    %17 = vector.broadcast %16 : vector<1x64xf32> to vector<8x64xf32>
    %18 = arith.addf %15, %17 : vector<8x64xf32>
    %cst_12 = arith.constant 0.000000e+00 : f32
    %19 = vector.broadcast %cst_12 : f32 to vector<8x64xf32>
    %20 = arith.maximumf %18, %19 : vector<8x64xf32>
    %c0_13 = arith.constant 0 : index
    %c0_14 = arith.constant 0 : index
    %21 = vector.load %arg6[%c0_13, %c0_14] : memref<42x192xf32, #tpu.memory_space<vmem>>, vector<42x192xf32>
    %c0_15 = arith.constant 0 : index
    %c0_16 = arith.constant 0 : index
    %22 = vector.load %arg7[%c0_15, %c0_16] : memref<1x64xf32, #tpu.memory_space<vmem>>, vector<1x64xf32>
    %cst_17 = arith.constant dense<0.000000e+00> : vector<8x192xf32>
    %23 = tpu.matmul %0, %21, %cst_17 {dimension_numbers = #tpu.dot_dimension_numbers<[1], [0], [0], [1], [0, 0, 1, 1], [], []>} : vector<8x42xf32>, vector<42x192xf32>, vector<8x192xf32> -> vector<8x192xf32>
    %24 = vector.extract_strided_slice %23 {offsets = [0, 0], sizes = [8, 64], strides = [1, 1]} : vector<8x192xf32> to vector<8x64xf32>
    %25 = vector.extract_strided_slice %23 {offsets = [0, 64], sizes = [8, 64], strides = [1, 1]} : vector<8x192xf32> to vector<8x64xf32>
    %26 = vector.extract_strided_slice %23 {offsets = [0, 128], sizes = [8, 64], strides = [1, 1]} : vector<8x192xf32> to vector<8x64xf32>
    %27 = vector.broadcast %22 : vector<1x64xf32> to vector<8x64xf32>
    %28 = arith.addf %26, %27 : vector<8x64xf32>
    %cst_18 = arith.constant 0.000000e+00 : f32
    %29 = vector.broadcast %cst_18 : f32 to vector<8x64xf32>
    %30 = arith.maximumf %28, %29 : vector<8x64xf32>
    %31 = vector.broadcast %22 : vector<1x64xf32> to vector<8x64xf32>
    %32 = arith.addf %25, %31 : vector<8x64xf32>
    %cst_19 = arith.constant 0.000000e+00 : f32
    %33 = vector.broadcast %cst_19 : f32 to vector<8x64xf32>
    %34 = arith.maximumf %32, %33 : vector<8x64xf32>
    %35 = vector.broadcast %22 : vector<1x64xf32> to vector<8x64xf32>
    %36 = arith.addf %24, %35 : vector<8x64xf32>
    %cst_20 = arith.constant 0.000000e+00 : f32
    %37 = vector.broadcast %cst_20 : f32 to vector<8x64xf32>
    %38 = arith.maximumf %36, %37 : vector<8x64xf32>
    %c0_21 = arith.constant 0 : index
    %c0_22 = arith.constant 0 : index
    %39 = vector.load %arg8[%c0_21, %c0_22] : memref<64x192xf32, #tpu.memory_space<vmem>>, vector<64x192xf32>
    %c0_23 = arith.constant 0 : index
    %c0_24 = arith.constant 0 : index
    %40 = vector.load %arg9[%c0_23, %c0_24] : memref<1x64xf32, #tpu.memory_space<vmem>>, vector<1x64xf32>
    %cst_25 = arith.constant dense<0.000000e+00> : vector<8x192xf32>
    %41 = tpu.matmul %30, %39, %cst_25 {dimension_numbers = #tpu.dot_dimension_numbers<[1], [0], [0], [1], [0, 0, 1, 1], [], []>} : vector<8x64xf32>, vector<64x192xf32>, vector<8x192xf32> -> vector<8x192xf32>
    %42 = vector.extract_strided_slice %41 {offsets = [0, 0], sizes = [8, 64], strides = [1, 1]} : vector<8x192xf32> to vector<8x64xf32>
    %43 = vector.extract_strided_slice %41 {offsets = [0, 64], sizes = [8, 64], strides = [1, 1]} : vector<8x192xf32> to vector<8x64xf32>
    %44 = vector.extract_strided_slice %41 {offsets = [0, 128], sizes = [8, 64], strides = [1, 1]} : vector<8x192xf32> to vector<8x64xf32>
    %cst_26 = arith.constant dense<0.000000e+00> : vector<8x192xf32>
    %45 = tpu.matmul %34, %39, %cst_26 {dimension_numbers = #tpu.dot_dimension_numbers<[1], [0], [0], [1], [0, 0, 1, 1], [], []>} : vector<8x64xf32>, vector<64x192xf32>, vector<8x192xf32> -> vector<8x192xf32>
    %46 = vector.extract_strided_slice %45 {offsets = [0, 0], sizes = [8, 64], strides = [1, 1]} : vector<8x192xf32> to vector<8x64xf32>
    %47 = vector.extract_strided_slice %45 {offsets = [0, 64], sizes = [8, 64], strides = [1, 1]} : vector<8x192xf32> to vector<8x64xf32>
    %48 = vector.extract_strided_slice %45 {offsets = [0, 128], sizes = [8, 64], strides = [1, 1]} : vector<8x192xf32> to vector<8x64xf32>
    %cst_27 = arith.constant dense<0.000000e+00> : vector<8x192xf32>
    %49 = tpu.matmul %38, %39, %cst_27 {dimension_numbers = #tpu.dot_dimension_numbers<[1], [0], [0], [1], [0, 0, 1, 1], [], []>} : vector<8x64xf32>, vector<64x192xf32>, vector<8x192xf32> -> vector<8x192xf32>
    %50 = vector.extract_strided_slice %49 {offsets = [0, 0], sizes = [8, 64], strides = [1, 1]} : vector<8x192xf32> to vector<8x64xf32>
    %51 = vector.extract_strided_slice %49 {offsets = [0, 64], sizes = [8, 64], strides = [1, 1]} : vector<8x192xf32> to vector<8x64xf32>
    %52 = arith.addf %42, %51 : vector<8x64xf32>
    %53 = vector.extract_strided_slice %49 {offsets = [0, 128], sizes = [8, 64], strides = [1, 1]} : vector<8x192xf32> to vector<8x64xf32>
    %54 = arith.addf %43, %53 : vector<8x64xf32>
    %55 = vector.broadcast %40 : vector<1x64xf32> to vector<8x64xf32>
    %56 = arith.addf %44, %55 : vector<8x64xf32>
    %cst_28 = arith.constant 0.000000e+00 : f32
    %57 = vector.broadcast %cst_28 : f32 to vector<8x64xf32>
    %58 = arith.maximumf %56, %57 : vector<8x64xf32>
    %59 = vector.broadcast %40 : vector<1x64xf32> to vector<8x64xf32>
    %60 = arith.addf %48, %59 : vector<8x64xf32>
    %cst_29 = arith.constant 0.000000e+00 : f32
    %61 = vector.broadcast %cst_29 : f32 to vector<8x64xf32>
    %62 = arith.maximumf %60, %61 : vector<8x64xf32>
    %63 = vector.broadcast %40 : vector<1x64xf32> to vector<8x64xf32>
    %64 = arith.addf %54, %63 : vector<8x64xf32>
    %cst_30 = arith.constant 0.000000e+00 : f32
    %65 = vector.broadcast %cst_30 : f32 to vector<8x64xf32>
    %66 = arith.maximumf %64, %65 : vector<8x64xf32>
    %67 = vector.broadcast %40 : vector<1x64xf32> to vector<8x64xf32>
    %68 = arith.addf %47, %67 : vector<8x64xf32>
    %cst_31 = arith.constant 0.000000e+00 : f32
    %69 = vector.broadcast %cst_31 : f32 to vector<8x64xf32>
    %70 = arith.maximumf %68, %69 : vector<8x64xf32>
    %71 = vector.broadcast %40 : vector<1x64xf32> to vector<8x64xf32>
    %72 = arith.addf %52, %71 : vector<8x64xf32>
    %cst_32 = arith.constant 0.000000e+00 : f32
    %73 = vector.broadcast %cst_32 : f32 to vector<8x64xf32>
    %74 = arith.maximumf %72, %73 : vector<8x64xf32>
    %75 = vector.broadcast %40 : vector<1x64xf32> to vector<8x64xf32>
    %76 = arith.addf %46, %75 : vector<8x64xf32>
    %cst_33 = arith.constant 0.000000e+00 : f32
    %77 = vector.broadcast %cst_33 : f32 to vector<8x64xf32>
    %78 = arith.maximumf %76, %77 : vector<8x64xf32>
    %79 = vector.broadcast %40 : vector<1x64xf32> to vector<8x64xf32>
    %80 = arith.addf %50, %79 : vector<8x64xf32>
    %cst_34 = arith.constant 0.000000e+00 : f32
    %81 = vector.broadcast %cst_34 : f32 to vector<8x64xf32>
    %82 = arith.maximumf %80, %81 : vector<8x64xf32>
    %c0_35 = arith.constant 0 : index
    %c0_36 = arith.constant 0 : index
    %83 = vector.load %arg10[%c0_35, %c0_36] : memref<64x96xf32, #tpu.memory_space<vmem>>, vector<64x96xf32>
    %c0_37 = arith.constant 0 : index
    %c0_38 = arith.constant 0 : index
    %84 = vector.load %arg11[%c0_37, %c0_38] : memref<1x32xf32, #tpu.memory_space<vmem>>, vector<1x32xf32>
    %cst_39 = arith.constant dense<0.000000e+00> : vector<8x96xf32>
    %85 = tpu.matmul %58, %83, %cst_39 {dimension_numbers = #tpu.dot_dimension_numbers<[1], [0], [0], [1], [0, 0, 1, 1], [], []>} : vector<8x64xf32>, vector<64x96xf32>, vector<8x96xf32> -> vector<8x96xf32>
    %86 = vector.extract_strided_slice %85 {offsets = [0, 0], sizes = [8, 32], strides = [1, 1]} : vector<8x96xf32> to vector<8x32xf32>
    %87 = vector.extract_strided_slice %85 {offsets = [0, 32], sizes = [8, 32], strides = [1, 1]} : vector<8x96xf32> to vector<8x32xf32>
    %88 = vector.extract_strided_slice %85 {offsets = [0, 64], sizes = [8, 32], strides = [1, 1]} : vector<8x96xf32> to vector<8x32xf32>
    %cst_40 = arith.constant dense<0.000000e+00> : vector<8x96xf32>
    %89 = tpu.matmul %62, %83, %cst_40 {dimension_numbers = #tpu.dot_dimension_numbers<[1], [0], [0], [1], [0, 0, 1, 1], [], []>} : vector<8x64xf32>, vector<64x96xf32>, vector<8x96xf32> -> vector<8x96xf32>
    %90 = vector.extract_strided_slice %89 {offsets = [0, 0], sizes = [8, 32], strides = [1, 1]} : vector<8x96xf32> to vector<8x32xf32>
    %91 = vector.extract_strided_slice %89 {offsets = [0, 32], sizes = [8, 32], strides = [1, 1]} : vector<8x96xf32> to vector<8x32xf32>
    %92 = vector.extract_strided_slice %89 {offsets = [0, 64], sizes = [8, 32], strides = [1, 1]} : vector<8x96xf32> to vector<8x32xf32>
    %cst_41 = arith.constant dense<0.000000e+00> : vector<8x96xf32>
    %93 = tpu.matmul %66, %83, %cst_41 {dimension_numbers = #tpu.dot_dimension_numbers<[1], [0], [0], [1], [0, 0, 1, 1], [], []>} : vector<8x64xf32>, vector<64x96xf32>, vector<8x96xf32> -> vector<8x96xf32>
    %94 = vector.extract_strided_slice %93 {offsets = [0, 0], sizes = [8, 32], strides = [1, 1]} : vector<8x96xf32> to vector<8x32xf32>
    %95 = vector.extract_strided_slice %93 {offsets = [0, 32], sizes = [8, 32], strides = [1, 1]} : vector<8x96xf32> to vector<8x32xf32>
    %96 = vector.extract_strided_slice %93 {offsets = [0, 64], sizes = [8, 32], strides = [1, 1]} : vector<8x96xf32> to vector<8x32xf32>
    %cst_42 = arith.constant dense<0.000000e+00> : vector<8x96xf32>
    %97 = tpu.matmul %70, %83, %cst_42 {dimension_numbers = #tpu.dot_dimension_numbers<[1], [0], [0], [1], [0, 0, 1, 1], [], []>} : vector<8x64xf32>, vector<64x96xf32>, vector<8x96xf32> -> vector<8x96xf32>
    %98 = vector.extract_strided_slice %97 {offsets = [0, 0], sizes = [8, 32], strides = [1, 1]} : vector<8x96xf32> to vector<8x32xf32>
    %99 = vector.extract_strided_slice %97 {offsets = [0, 32], sizes = [8, 32], strides = [1, 1]} : vector<8x96xf32> to vector<8x32xf32>
    %100 = vector.extract_strided_slice %97 {offsets = [0, 64], sizes = [8, 32], strides = [1, 1]} : vector<8x96xf32> to vector<8x32xf32>
    %cst_43 = arith.constant dense<0.000000e+00> : vector<8x96xf32>
    %101 = tpu.matmul %74, %83, %cst_43 {dimension_numbers = #tpu.dot_dimension_numbers<[1], [0], [0], [1], [0, 0, 1, 1], [], []>} : vector<8x64xf32>, vector<64x96xf32>, vector<8x96xf32> -> vector<8x96xf32>
    %102 = vector.extract_strided_slice %101 {offsets = [0, 0], sizes = [8, 32], strides = [1, 1]} : vector<8x96xf32> to vector<8x32xf32>
    %103 = vector.extract_strided_slice %101 {offsets = [0, 32], sizes = [8, 32], strides = [1, 1]} : vector<8x96xf32> to vector<8x32xf32>
    %104 = arith.addf %86, %103 : vector<8x32xf32>
    %105 = vector.extract_strided_slice %101 {offsets = [0, 64], sizes = [8, 32], strides = [1, 1]} : vector<8x96xf32> to vector<8x32xf32>
    %106 = arith.addf %87, %105 : vector<8x32xf32>
    %cst_44 = arith.constant dense<0.000000e+00> : vector<8x96xf32>
    %107 = tpu.matmul %78, %83, %cst_44 {dimension_numbers = #tpu.dot_dimension_numbers<[1], [0], [0], [1], [0, 0, 1, 1], [], []>} : vector<8x64xf32>, vector<64x96xf32>, vector<8x96xf32> -> vector<8x96xf32>
    %108 = vector.extract_strided_slice %107 {offsets = [0, 0], sizes = [8, 32], strides = [1, 1]} : vector<8x96xf32> to vector<8x32xf32>
    %109 = vector.extract_strided_slice %107 {offsets = [0, 32], sizes = [8, 32], strides = [1, 1]} : vector<8x96xf32> to vector<8x32xf32>
    %110 = arith.addf %90, %109 : vector<8x32xf32>
    %111 = vector.extract_strided_slice %107 {offsets = [0, 64], sizes = [8, 32], strides = [1, 1]} : vector<8x96xf32> to vector<8x32xf32>
    %112 = arith.addf %91, %111 : vector<8x32xf32>
    %cst_45 = arith.constant dense<0.000000e+00> : vector<8x96xf32>
    %113 = tpu.matmul %82, %83, %cst_45 {dimension_numbers = #tpu.dot_dimension_numbers<[1], [0], [0], [1], [0, 0, 1, 1], [], []>} : vector<8x64xf32>, vector<64x96xf32>, vector<8x96xf32> -> vector<8x96xf32>
    %114 = vector.extract_strided_slice %113 {offsets = [0, 0], sizes = [8, 32], strides = [1, 1]} : vector<8x96xf32> to vector<8x32xf32>
    %115 = vector.extract_strided_slice %113 {offsets = [0, 32], sizes = [8, 32], strides = [1, 1]} : vector<8x96xf32> to vector<8x32xf32>
    %116 = arith.addf %94, %115 : vector<8x32xf32>
    %117 = vector.extract_strided_slice %113 {offsets = [0, 64], sizes = [8, 32], strides = [1, 1]} : vector<8x96xf32> to vector<8x32xf32>
    %118 = arith.addf %95, %117 : vector<8x32xf32>
    %119 = vector.broadcast %84 : vector<1x32xf32> to vector<8x32xf32>
    %120 = arith.addf %88, %119 : vector<8x32xf32>
    %cst_46 = arith.constant 0.000000e+00 : f32
    %121 = vector.broadcast %cst_46 : f32 to vector<8x32xf32>
    %122 = arith.maximumf %120, %121 : vector<8x32xf32>
    %123 = vector.broadcast %84 : vector<1x32xf32> to vector<8x32xf32>
    %124 = arith.addf %92, %123 : vector<8x32xf32>
    %cst_47 = arith.constant 0.000000e+00 : f32
    %125 = vector.broadcast %cst_47 : f32 to vector<8x32xf32>
    %126 = arith.maximumf %124, %125 : vector<8x32xf32>
    %127 = vector.broadcast %84 : vector<1x32xf32> to vector<8x32xf32>
    %128 = arith.addf %96, %127 : vector<8x32xf32>
    %cst_48 = arith.constant 0.000000e+00 : f32
    %129 = vector.broadcast %cst_48 : f32 to vector<8x32xf32>
    %130 = arith.maximumf %128, %129 : vector<8x32xf32>
    %131 = vector.broadcast %84 : vector<1x32xf32> to vector<8x32xf32>
    %132 = arith.addf %100, %131 : vector<8x32xf32>
    %cst_49 = arith.constant 0.000000e+00 : f32
    %133 = vector.broadcast %cst_49 : f32 to vector<8x32xf32>
    %134 = arith.maximumf %132, %133 : vector<8x32xf32>
    %135 = vector.broadcast %84 : vector<1x32xf32> to vector<8x32xf32>
    %136 = arith.addf %106, %135 : vector<8x32xf32>
    %cst_50 = arith.constant 0.000000e+00 : f32
    %137 = vector.broadcast %cst_50 : f32 to vector<8x32xf32>
    %138 = arith.maximumf %136, %137 : vector<8x32xf32>
    %139 = vector.broadcast %84 : vector<1x32xf32> to vector<8x32xf32>
    %140 = arith.addf %112, %139 : vector<8x32xf32>
    %cst_51 = arith.constant 0.000000e+00 : f32
    %141 = vector.broadcast %cst_51 : f32 to vector<8x32xf32>
    %142 = arith.maximumf %140, %141 : vector<8x32xf32>
    %143 = vector.broadcast %84 : vector<1x32xf32> to vector<8x32xf32>
    %144 = arith.addf %118, %143 : vector<8x32xf32>
    %cst_52 = arith.constant 0.000000e+00 : f32
    %145 = vector.broadcast %cst_52 : f32 to vector<8x32xf32>
    %146 = arith.maximumf %144, %145 : vector<8x32xf32>
    %147 = vector.broadcast %84 : vector<1x32xf32> to vector<8x32xf32>
    %148 = arith.addf %99, %147 : vector<8x32xf32>
    %cst_53 = arith.constant 0.000000e+00 : f32
    %149 = vector.broadcast %cst_53 : f32 to vector<8x32xf32>
    %150 = arith.maximumf %148, %149 : vector<8x32xf32>
    %151 = vector.broadcast %84 : vector<1x32xf32> to vector<8x32xf32>
    %152 = arith.addf %104, %151 : vector<8x32xf32>
    %cst_54 = arith.constant 0.000000e+00 : f32
    %153 = vector.broadcast %cst_54 : f32 to vector<8x32xf32>
    %154 = arith.maximumf %152, %153 : vector<8x32xf32>
    %155 = vector.broadcast %84 : vector<1x32xf32> to vector<8x32xf32>
    %156 = arith.addf %110, %155 : vector<8x32xf32>
    %cst_55 = arith.constant 0.000000e+00 : f32
    %157 = vector.broadcast %cst_55 : f32 to vector<8x32xf32>
    %158 = arith.maximumf %156, %157 : vector<8x32xf32>
    %159 = vector.broadcast %84 : vector<1x32xf32> to vector<8x32xf32>
    %160 = arith.addf %116, %159 : vector<8x32xf32>
    %cst_56 = arith.constant 0.000000e+00 : f32
    %161 = vector.broadcast %cst_56 : f32 to vector<8x32xf32>
    %162 = arith.maximumf %160, %161 : vector<8x32xf32>
    %163 = vector.broadcast %84 : vector<1x32xf32> to vector<8x32xf32>
    %164 = arith.addf %98, %163 : vector<8x32xf32>
    %cst_57 = arith.constant 0.000000e+00 : f32
    %165 = vector.broadcast %cst_57 : f32 to vector<8x32xf32>
    %166 = arith.maximumf %164, %165 : vector<8x32xf32>
    %167 = vector.broadcast %84 : vector<1x32xf32> to vector<8x32xf32>
    %168 = arith.addf %102, %167 : vector<8x32xf32>
    %cst_58 = arith.constant 0.000000e+00 : f32
    %169 = vector.broadcast %cst_58 : f32 to vector<8x32xf32>
    %170 = arith.maximumf %168, %169 : vector<8x32xf32>
    %171 = vector.broadcast %84 : vector<1x32xf32> to vector<8x32xf32>
    %172 = arith.addf %108, %171 : vector<8x32xf32>
    %cst_59 = arith.constant 0.000000e+00 : f32
    %173 = vector.broadcast %cst_59 : f32 to vector<8x32xf32>
    %174 = arith.maximumf %172, %173 : vector<8x32xf32>
    %175 = vector.broadcast %84 : vector<1x32xf32> to vector<8x32xf32>
    %176 = arith.addf %114, %175 : vector<8x32xf32>
    %cst_60 = arith.constant 0.000000e+00 : f32
    %177 = vector.broadcast %cst_60 : f32 to vector<8x32xf32>
    %178 = arith.maximumf %176, %177 : vector<8x32xf32>
    %179 = arith.addf %122, %126 : vector<8x32xf32>
    %180 = arith.addf %179, %130 : vector<8x32xf32>
    %181 = arith.addf %180, %134 : vector<8x32xf32>
    %182 = arith.addf %181, %138 : vector<8x32xf32>
    %183 = arith.addf %182, %142 : vector<8x32xf32>
    %184 = arith.addf %183, %146 : vector<8x32xf32>
    %185 = arith.addf %184, %150 : vector<8x32xf32>
    %186 = arith.addf %185, %154 : vector<8x32xf32>
    %187 = arith.addf %186, %158 : vector<8x32xf32>
    %188 = arith.addf %187, %162 : vector<8x32xf32>
    %189 = arith.addf %188, %166 : vector<8x32xf32>
    %190 = arith.addf %189, %170 : vector<8x32xf32>
    %191 = arith.addf %190, %174 : vector<8x32xf32>
    %192 = arith.addf %191, %178 : vector<8x32xf32>
    %cst_61 = arith.constant 0.0666666701 : f32
    %193 = vector.broadcast %cst_61 : f32 to vector<8x32xf32>
    %194 = arith.mulf %192, %193 : vector<8x32xf32>
    %c0_62 = arith.constant 0 : index
    %c0_63 = arith.constant 0 : index
    %c0_64 = arith.constant 0 : index
    %195 = vector.load %arg12[%c0_62, %c0_63, %c0_64] : memref<4x64x192xf32, #tpu.memory_space<vmem>>, vector<1x64x192xf32>
    %196 = vector.shape_cast %195 : vector<1x64x192xf32> to vector<64x192xf32>
    %cst_65 = arith.constant dense<0.000000e+00> : vector<8x192xf32>
    %197 = tpu.matmul %9, %196, %cst_65 {dimension_numbers = #tpu.dot_dimension_numbers<[1], [0], [0], [1], [0, 0, 1, 1], [], []>} : vector<8x64xf32>, vector<64x192xf32>, vector<8x192xf32> -> vector<8x192xf32>
    %c0_66 = arith.constant 0 : index
    %c0_67 = arith.constant 0 : index
    %c0_68 = arith.constant 0 : index
    %198 = vector.load %arg13[%c0_66, %c0_67, %c0_68] : memref<4x1x192xf32, #tpu.memory_space<vmem>>, vector<1x1x192xf32>
    %199 = vector.shape_cast %198 : vector<1x1x192xf32> to vector<1x192xf32>
    %200 = vector.broadcast %199 : vector<1x192xf32> to vector<8x192xf32>
    %201 = arith.addf %197, %200 : vector<8x192xf32>
    %202 = vector.extract_strided_slice %201 {offsets = [0, 0], sizes = [8, 64], strides = [1, 1]} : vector<8x192xf32> to vector<8x64xf32>
    %203 = arith.negf %202 : vector<8x64xf32>
    %204 = math.exp %203 : vector<8x64xf32>
    %cst_69 = arith.constant 1.000000e+00 : f32
    %205 = vector.broadcast %cst_69 : f32 to vector<8x64xf32>
    %206 = arith.addf %205, %204 : vector<8x64xf32>
    %207 = arith.divf %205, %206 : vector<8x64xf32>
    %208 = vector.extract_strided_slice %201 {offsets = [0, 64], sizes = [8, 64], strides = [1, 1]} : vector<8x192xf32> to vector<8x64xf32>
    %209 = math.tanh %208 : vector<8x64xf32>
    %210 = vector.extract_strided_slice %201 {offsets = [0, 128], sizes = [8, 64], strides = [1, 1]} : vector<8x192xf32> to vector<8x64xf32>
    %211 = arith.negf %210 : vector<8x64xf32>
    %212 = math.exp %211 : vector<8x64xf32>
    %cst_70 = arith.constant 1.000000e+00 : f32
    %213 = vector.broadcast %cst_70 : f32 to vector<8x64xf32>
    %214 = arith.addf %213, %212 : vector<8x64xf32>
    %215 = arith.divf %213, %214 : vector<8x64xf32>
    %216 = arith.mulf %207, %209 : vector<8x64xf32>
    %217 = math.tanh %216 : vector<8x64xf32>
    %218 = arith.mulf %215, %217 : vector<8x64xf32>
    %c1 = arith.constant 1 : index
    %c0_71 = arith.constant 0 : index
    %c0_72 = arith.constant 0 : index
    %219 = vector.load %arg12[%c1, %c0_71, %c0_72] : memref<4x64x192xf32, #tpu.memory_space<vmem>>, vector<1x64x192xf32>
    %220 = vector.shape_cast %219 : vector<1x64x192xf32> to vector<64x192xf32>
    %cst_73 = arith.constant dense<0.000000e+00> : vector<8x192xf32>
    %221 = tpu.matmul %218, %220, %cst_73 {dimension_numbers = #tpu.dot_dimension_numbers<[1], [0], [0], [1], [0, 0, 1, 1], [], []>} : vector<8x64xf32>, vector<64x192xf32>, vector<8x192xf32> -> vector<8x192xf32>
    %c1_74 = arith.constant 1 : index
    %c0_75 = arith.constant 0 : index
    %c0_76 = arith.constant 0 : index
    %222 = vector.load %arg13[%c1_74, %c0_75, %c0_76] : memref<4x1x192xf32, #tpu.memory_space<vmem>>, vector<1x1x192xf32>
    %223 = vector.shape_cast %222 : vector<1x1x192xf32> to vector<1x192xf32>
    %224 = vector.broadcast %223 : vector<1x192xf32> to vector<8x192xf32>
    %225 = arith.addf %221, %224 : vector<8x192xf32>
    %226 = vector.extract_strided_slice %225 {offsets = [0, 0], sizes = [8, 64], strides = [1, 1]} : vector<8x192xf32> to vector<8x64xf32>
    %227 = arith.negf %226 : vector<8x64xf32>
    %228 = math.exp %227 : vector<8x64xf32>
    %cst_77 = arith.constant 1.000000e+00 : f32
    %229 = vector.broadcast %cst_77 : f32 to vector<8x64xf32>
    %230 = arith.addf %229, %228 : vector<8x64xf32>
    %231 = arith.divf %229, %230 : vector<8x64xf32>
    %232 = vector.extract_strided_slice %225 {offsets = [0, 64], sizes = [8, 64], strides = [1, 1]} : vector<8x192xf32> to vector<8x64xf32>
    %233 = math.tanh %232 : vector<8x64xf32>
    %234 = vector.extract_strided_slice %225 {offsets = [0, 128], sizes = [8, 64], strides = [1, 1]} : vector<8x192xf32> to vector<8x64xf32>
    %235 = arith.negf %234 : vector<8x64xf32>
    %236 = math.exp %235 : vector<8x64xf32>
    %cst_78 = arith.constant 1.000000e+00 : f32
    %237 = vector.broadcast %cst_78 : f32 to vector<8x64xf32>
    %238 = arith.addf %237, %236 : vector<8x64xf32>
    %239 = arith.divf %237, %238 : vector<8x64xf32>
    %240 = arith.mulf %231, %233 : vector<8x64xf32>
    %241 = math.tanh %240 : vector<8x64xf32>
    %242 = arith.mulf %239, %241 : vector<8x64xf32>
    %c2 = arith.constant 2 : index
    %c0_79 = arith.constant 0 : index
    %c0_80 = arith.constant 0 : index
    %243 = vector.load %arg12[%c2, %c0_79, %c0_80] : memref<4x64x192xf32, #tpu.memory_space<vmem>>, vector<1x64x192xf32>
    %244 = vector.shape_cast %243 : vector<1x64x192xf32> to vector<64x192xf32>
    %cst_81 = arith.constant dense<0.000000e+00> : vector<8x192xf32>
    %245 = tpu.matmul %242, %244, %cst_81 {dimension_numbers = #tpu.dot_dimension_numbers<[1], [0], [0], [1], [0, 0, 1, 1], [], []>} : vector<8x64xf32>, vector<64x192xf32>, vector<8x192xf32> -> vector<8x192xf32>
    %c2_82 = arith.constant 2 : index
    %c0_83 = arith.constant 0 : index
    %c0_84 = arith.constant 0 : index
    %246 = vector.load %arg13[%c2_82, %c0_83, %c0_84] : memref<4x1x192xf32, #tpu.memory_space<vmem>>, vector<1x1x192xf32>
    %247 = vector.shape_cast %246 : vector<1x1x192xf32> to vector<1x192xf32>
    %248 = vector.broadcast %247 : vector<1x192xf32> to vector<8x192xf32>
    %249 = arith.addf %245, %248 : vector<8x192xf32>
    %250 = vector.extract_strided_slice %249 {offsets = [0, 0], sizes = [8, 64], strides = [1, 1]} : vector<8x192xf32> to vector<8x64xf32>
    %251 = arith.negf %250 : vector<8x64xf32>
    %252 = math.exp %251 : vector<8x64xf32>
    %cst_85 = arith.constant 1.000000e+00 : f32
    %253 = vector.broadcast %cst_85 : f32 to vector<8x64xf32>
    %254 = arith.addf %253, %252 : vector<8x64xf32>
    %255 = arith.divf %253, %254 : vector<8x64xf32>
    %256 = vector.extract_strided_slice %249 {offsets = [0, 64], sizes = [8, 64], strides = [1, 1]} : vector<8x192xf32> to vector<8x64xf32>
    %257 = math.tanh %256 : vector<8x64xf32>
    %258 = vector.extract_strided_slice %249 {offsets = [0, 128], sizes = [8, 64], strides = [1, 1]} : vector<8x192xf32> to vector<8x64xf32>
    %259 = arith.negf %258 : vector<8x64xf32>
    %260 = math.exp %259 : vector<8x64xf32>
    %cst_86 = arith.constant 1.000000e+00 : f32
    %261 = vector.broadcast %cst_86 : f32 to vector<8x64xf32>
    %262 = arith.addf %261, %260 : vector<8x64xf32>
    %263 = arith.divf %261, %262 : vector<8x64xf32>
    %264 = arith.mulf %255, %257 : vector<8x64xf32>
    %265 = math.tanh %264 : vector<8x64xf32>
    %266 = arith.mulf %263, %265 : vector<8x64xf32>
    %c3 = arith.constant 3 : index
    %c0_87 = arith.constant 0 : index
    %c0_88 = arith.constant 0 : index
    %267 = vector.load %arg12[%c3, %c0_87, %c0_88] : memref<4x64x192xf32, #tpu.memory_space<vmem>>, vector<1x64x192xf32>
    %268 = vector.shape_cast %267 : vector<1x64x192xf32> to vector<64x192xf32>
    %cst_89 = arith.constant dense<0.000000e+00> : vector<8x192xf32>
    %269 = tpu.matmul %266, %268, %cst_89 {dimension_numbers = #tpu.dot_dimension_numbers<[1], [0], [0], [1], [0, 0, 1, 1], [], []>} : vector<8x64xf32>, vector<64x192xf32>, vector<8x192xf32> -> vector<8x192xf32>
    %c3_90 = arith.constant 3 : index
    %c0_91 = arith.constant 0 : index
    %c0_92 = arith.constant 0 : index
    %270 = vector.load %arg13[%c3_90, %c0_91, %c0_92] : memref<4x1x192xf32, #tpu.memory_space<vmem>>, vector<1x1x192xf32>
    %271 = vector.shape_cast %270 : vector<1x1x192xf32> to vector<1x192xf32>
    %272 = vector.broadcast %271 : vector<1x192xf32> to vector<8x192xf32>
    %273 = arith.addf %269, %272 : vector<8x192xf32>
    %274 = vector.extract_strided_slice %273 {offsets = [0, 0], sizes = [8, 64], strides = [1, 1]} : vector<8x192xf32> to vector<8x64xf32>
    %275 = arith.negf %274 : vector<8x64xf32>
    %276 = math.exp %275 : vector<8x64xf32>
    %cst_93 = arith.constant 1.000000e+00 : f32
    %277 = vector.broadcast %cst_93 : f32 to vector<8x64xf32>
    %278 = arith.addf %277, %276 : vector<8x64xf32>
    %279 = arith.divf %277, %278 : vector<8x64xf32>
    %280 = vector.extract_strided_slice %273 {offsets = [0, 64], sizes = [8, 64], strides = [1, 1]} : vector<8x192xf32> to vector<8x64xf32>
    %281 = math.tanh %280 : vector<8x64xf32>
    %282 = vector.extract_strided_slice %273 {offsets = [0, 128], sizes = [8, 64], strides = [1, 1]} : vector<8x192xf32> to vector<8x64xf32>
    %283 = arith.negf %282 : vector<8x64xf32>
    %284 = math.exp %283 : vector<8x64xf32>
    %cst_94 = arith.constant 1.000000e+00 : f32
    %285 = vector.broadcast %cst_94 : f32 to vector<8x64xf32>
    %286 = arith.addf %285, %284 : vector<8x64xf32>
    %287 = arith.divf %285, %286 : vector<8x64xf32>
    %288 = arith.mulf %279, %281 : vector<8x64xf32>
    %289 = math.tanh %288 : vector<8x64xf32>
    %290 = arith.mulf %287, %289 : vector<8x64xf32>
    %c0_95 = arith.constant 0 : index
    %c0_96 = arith.constant 0 : index
    %c0_97 = arith.constant 0 : index
    %291 = vector.load %arg14[%c0_95, %c0_96, %c0_97] : memref<4x64x64xf32, #tpu.memory_space<vmem>>, vector<1x64x64xf32>
    %292 = vector.shape_cast %291 : vector<1x64x64xf32> to vector<64x64xf32>
    %cst_98 = arith.constant dense<0.000000e+00> : vector<8x64xf32>
    %293 = tpu.matmul %10, %292, %cst_98 {dimension_numbers = #tpu.dot_dimension_numbers<[1], [0], [0], [1], [0, 0, 1, 1], [], []>} : vector<8x64xf32>, vector<64x64xf32>, vector<8x64xf32> -> vector<8x64xf32>
    %c0_99 = arith.constant 0 : index
    %c0_100 = arith.constant 0 : index
    %c0_101 = arith.constant 0 : index
    %294 = vector.load %arg15[%c0_99, %c0_100, %c0_101] : memref<4x1x64xf32, #tpu.memory_space<vmem>>, vector<1x1x64xf32>
    %295 = vector.shape_cast %294 : vector<1x1x64xf32> to vector<1x64xf32>
    %296 = vector.broadcast %295 : vector<1x64xf32> to vector<8x64xf32>
    %297 = arith.addf %293, %296 : vector<8x64xf32>
    %298 = arith.addf %10, %297 : vector<8x64xf32>
    %c0_102 = arith.constant 0 : index
    %c0_103 = arith.constant 0 : index
    %c0_104 = arith.constant 0 : index
    %299 = vector.load %arg16[%c0_102, %c0_103, %c0_104] : memref<4x1x64xf32, #tpu.memory_space<vmem>>, vector<1x1x64xf32>
    %300 = vector.shape_cast %299 : vector<1x1x64xf32> to vector<1x64xf32>
    %c0_105 = arith.constant 0 : index
    %c0_106 = arith.constant 0 : index
    %c0_107 = arith.constant 0 : index
    %301 = vector.load %arg17[%c0_105, %c0_106, %c0_107] : memref<4x1x64xf32, #tpu.memory_space<vmem>>, vector<1x1x64xf32>
    %302 = vector.shape_cast %301 : vector<1x1x64xf32> to vector<1x64xf32>
    %cst_108 = arith.constant dense<0.000000e+00> : vector<8xf32>
    %303 = vector.multi_reduction <add>, %298, %cst_108 [1] : vector<8x64xf32> to vector<8xf32>
    %304 = vector.shape_cast %303 : vector<8xf32> to vector<8x1xf32>
    %cst_109 = arith.constant 6.400000e+01 : f32
    %305 = vector.broadcast %cst_109 : f32 to vector<8x1xf32>
    %306 = arith.divf %304, %305 : vector<8x1xf32>
    %307 = vector.broadcast %306 : vector<8x1xf32> to vector<8x64xf32>
    %308 = arith.subf %298, %307 : vector<8x64xf32>
    %309 = arith.mulf %308, %308 : vector<8x64xf32>
    %cst_110 = arith.constant dense<0.000000e+00> : vector<8xf32>
    %310 = vector.multi_reduction <add>, %309, %cst_110 [1] : vector<8x64xf32> to vector<8xf32>
    %311 = vector.shape_cast %310 : vector<8xf32> to vector<8x1xf32>
    %cst_111 = arith.constant 6.400000e+01 : f32
    %312 = vector.broadcast %cst_111 : f32 to vector<8x1xf32>
    %313 = arith.divf %311, %312 : vector<8x1xf32>
    %314 = vector.broadcast %306 : vector<8x1xf32> to vector<8x64xf32>
    %315 = arith.subf %298, %314 : vector<8x64xf32>
    %cst_112 = arith.constant 9.99999974E-6 : f32
    %316 = vector.broadcast %cst_112 : f32 to vector<8x1xf32>
    %317 = arith.addf %313, %316 : vector<8x1xf32>
    %318 = math.rsqrt %317 : vector<8x1xf32>
    %319 = vector.broadcast %318 : vector<8x1xf32> to vector<8x64xf32>
    %320 = arith.mulf %315, %319 : vector<8x64xf32>
    %321 = vector.broadcast %300 : vector<1x64xf32> to vector<8x64xf32>
    %322 = arith.mulf %320, %321 : vector<8x64xf32>
    %323 = vector.broadcast %302 : vector<1x64xf32> to vector<8x64xf32>
    %324 = arith.addf %322, %323 : vector<8x64xf32>
    %c0_113 = arith.constant 0 : index
    %c0_114 = arith.constant 0 : index
    %c0_115 = arith.constant 0 : index
    %325 = vector.load %arg18[%c0_113, %c0_114, %c0_115] : memref<4x64x128xf32, #tpu.memory_space<vmem>>, vector<1x64x128xf32>
    %326 = vector.shape_cast %325 : vector<1x64x128xf32> to vector<64x128xf32>
    %cst_116 = arith.constant dense<0.000000e+00> : vector<8x128xf32>
    %327 = tpu.matmul %324, %326, %cst_116 {dimension_numbers = #tpu.dot_dimension_numbers<[1], [0], [0], [1], [0, 0, 1, 1], [], []>} : vector<8x64xf32>, vector<64x128xf32>, vector<8x128xf32> -> vector<8x128xf32>
    %c0_117 = arith.constant 0 : index
    %c0_118 = arith.constant 0 : index
    %c0_119 = arith.constant 0 : index
    %328 = vector.load %arg19[%c0_117, %c0_118, %c0_119] : memref<4x1x128xf32, #tpu.memory_space<vmem>>, vector<1x1x128xf32>
    %329 = vector.shape_cast %328 : vector<1x1x128xf32> to vector<1x128xf32>
    %330 = vector.broadcast %329 : vector<1x128xf32> to vector<8x128xf32>
    %331 = arith.addf %327, %330 : vector<8x128xf32>
    %cst_120 = arith.constant 0.000000e+00 : f32
    %332 = vector.broadcast %cst_120 : f32 to vector<8x128xf32>
    %333 = arith.maximumf %331, %332 : vector<8x128xf32>
    %c0_121 = arith.constant 0 : index
    %c0_122 = arith.constant 0 : index
    %c0_123 = arith.constant 0 : index
    %334 = vector.load %arg20[%c0_121, %c0_122, %c0_123] : memref<4x128x64xf32, #tpu.memory_space<vmem>>, vector<1x128x64xf32>
    %335 = vector.shape_cast %334 : vector<1x128x64xf32> to vector<128x64xf32>
    %cst_124 = arith.constant dense<0.000000e+00> : vector<8x64xf32>
    %336 = tpu.matmul %333, %335, %cst_124 {dimension_numbers = #tpu.dot_dimension_numbers<[1], [0], [0], [1], [0, 0, 1, 1], [], []>} : vector<8x128xf32>, vector<128x64xf32>, vector<8x64xf32> -> vector<8x64xf32>
    %c0_125 = arith.constant 0 : index
    %c0_126 = arith.constant 0 : index
    %c0_127 = arith.constant 0 : index
    %337 = vector.load %arg21[%c0_125, %c0_126, %c0_127] : memref<4x1x64xf32, #tpu.memory_space<vmem>>, vector<1x1x64xf32>
    %338 = vector.shape_cast %337 : vector<1x1x64xf32> to vector<1x64xf32>
    %339 = vector.broadcast %338 : vector<1x64xf32> to vector<8x64xf32>
    %340 = arith.addf %336, %339 : vector<8x64xf32>
    %341 = arith.addf %324, %340 : vector<8x64xf32>
    %c0_128 = arith.constant 0 : index
    %c0_129 = arith.constant 0 : index
    %c0_130 = arith.constant 0 : index
    %342 = vector.load %arg22[%c0_128, %c0_129, %c0_130] : memref<4x1x64xf32, #tpu.memory_space<vmem>>, vector<1x1x64xf32>
    %343 = vector.shape_cast %342 : vector<1x1x64xf32> to vector<1x64xf32>
    %c0_131 = arith.constant 0 : index
    %c0_132 = arith.constant 0 : index
    %c0_133 = arith.constant 0 : index
    %344 = vector.load %arg23[%c0_131, %c0_132, %c0_133] : memref<4x1x64xf32, #tpu.memory_space<vmem>>, vector<1x1x64xf32>
    %345 = vector.shape_cast %344 : vector<1x1x64xf32> to vector<1x64xf32>
    %cst_134 = arith.constant dense<0.000000e+00> : vector<8xf32>
    %346 = vector.multi_reduction <add>, %341, %cst_134 [1] : vector<8x64xf32> to vector<8xf32>
    %347 = vector.shape_cast %346 : vector<8xf32> to vector<8x1xf32>
    %cst_135 = arith.constant 6.400000e+01 : f32
    %348 = vector.broadcast %cst_135 : f32 to vector<8x1xf32>
    %349 = arith.divf %347, %348 : vector<8x1xf32>
    %350 = vector.broadcast %349 : vector<8x1xf32> to vector<8x64xf32>
    %351 = arith.subf %341, %350 : vector<8x64xf32>
    %352 = arith.mulf %351, %351 : vector<8x64xf32>
    %cst_136 = arith.constant dense<0.000000e+00> : vector<8xf32>
    %353 = vector.multi_reduction <add>, %352, %cst_136 [1] : vector<8x64xf32> to vector<8xf32>
    %354 = vector.shape_cast %353 : vector<8xf32> to vector<8x1xf32>
    %cst_137 = arith.constant 6.400000e+01 : f32
    %355 = vector.broadcast %cst_137 : f32 to vector<8x1xf32>
    %356 = arith.divf %354, %355 : vector<8x1xf32>
    %357 = vector.broadcast %349 : vector<8x1xf32> to vector<8x64xf32>
    %358 = arith.subf %341, %357 : vector<8x64xf32>
    %cst_138 = arith.constant 9.99999974E-6 : f32
    %359 = vector.broadcast %cst_138 : f32 to vector<8x1xf32>
    %360 = arith.addf %356, %359 : vector<8x1xf32>
    %361 = math.rsqrt %360 : vector<8x1xf32>
    %362 = vector.broadcast %361 : vector<8x1xf32> to vector<8x64xf32>
    %363 = arith.mulf %358, %362 : vector<8x64xf32>
    %364 = vector.broadcast %343 : vector<1x64xf32> to vector<8x64xf32>
    %365 = arith.mulf %363, %364 : vector<8x64xf32>
    %366 = vector.broadcast %345 : vector<1x64xf32> to vector<8x64xf32>
    %367 = arith.addf %365, %366 : vector<8x64xf32>
    %c1_139 = arith.constant 1 : index
    %c0_140 = arith.constant 0 : index
    %c0_141 = arith.constant 0 : index
    %368 = vector.load %arg14[%c1_139, %c0_140, %c0_141] : memref<4x64x64xf32, #tpu.memory_space<vmem>>, vector<1x64x64xf32>
    %369 = vector.shape_cast %368 : vector<1x64x64xf32> to vector<64x64xf32>
    %cst_142 = arith.constant dense<0.000000e+00> : vector<8x64xf32>
    %370 = tpu.matmul %367, %369, %cst_142 {dimension_numbers = #tpu.dot_dimension_numbers<[1], [0], [0], [1], [0, 0, 1, 1], [], []>} : vector<8x64xf32>, vector<64x64xf32>, vector<8x64xf32> -> vector<8x64xf32>
    %c1_143 = arith.constant 1 : index
    %c0_144 = arith.constant 0 : index
    %c0_145 = arith.constant 0 : index
    %371 = vector.load %arg15[%c1_143, %c0_144, %c0_145] : memref<4x1x64xf32, #tpu.memory_space<vmem>>, vector<1x1x64xf32>
    %372 = vector.shape_cast %371 : vector<1x1x64xf32> to vector<1x64xf32>
    %373 = vector.broadcast %372 : vector<1x64xf32> to vector<8x64xf32>
    %374 = arith.addf %370, %373 : vector<8x64xf32>
    %375 = arith.addf %367, %374 : vector<8x64xf32>
    %c1_146 = arith.constant 1 : index
    %c0_147 = arith.constant 0 : index
    %c0_148 = arith.constant 0 : index
    %376 = vector.load %arg16[%c1_146, %c0_147, %c0_148] : memref<4x1x64xf32, #tpu.memory_space<vmem>>, vector<1x1x64xf32>
    %377 = vector.shape_cast %376 : vector<1x1x64xf32> to vector<1x64xf32>
    %c1_149 = arith.constant 1 : index
    %c0_150 = arith.constant 0 : index
    %c0_151 = arith.constant 0 : index
    %378 = vector.load %arg17[%c1_149, %c0_150, %c0_151] : memref<4x1x64xf32, #tpu.memory_space<vmem>>, vector<1x1x64xf32>
    %379 = vector.shape_cast %378 : vector<1x1x64xf32> to vector<1x64xf32>
    %cst_152 = arith.constant dense<0.000000e+00> : vector<8xf32>
    %380 = vector.multi_reduction <add>, %375, %cst_152 [1] : vector<8x64xf32> to vector<8xf32>
    %381 = vector.shape_cast %380 : vector<8xf32> to vector<8x1xf32>
    %cst_153 = arith.constant 6.400000e+01 : f32
    %382 = vector.broadcast %cst_153 : f32 to vector<8x1xf32>
    %383 = arith.divf %381, %382 : vector<8x1xf32>
    %384 = vector.broadcast %383 : vector<8x1xf32> to vector<8x64xf32>
    %385 = arith.subf %375, %384 : vector<8x64xf32>
    %386 = arith.mulf %385, %385 : vector<8x64xf32>
    %cst_154 = arith.constant dense<0.000000e+00> : vector<8xf32>
    %387 = vector.multi_reduction <add>, %386, %cst_154 [1] : vector<8x64xf32> to vector<8xf32>
    %388 = vector.shape_cast %387 : vector<8xf32> to vector<8x1xf32>
    %cst_155 = arith.constant 6.400000e+01 : f32
    %389 = vector.broadcast %cst_155 : f32 to vector<8x1xf32>
    %390 = arith.divf %388, %389 : vector<8x1xf32>
    %391 = vector.broadcast %383 : vector<8x1xf32> to vector<8x64xf32>
    %392 = arith.subf %375, %391 : vector<8x64xf32>
    %cst_156 = arith.constant 9.99999974E-6 : f32
    %393 = vector.broadcast %cst_156 : f32 to vector<8x1xf32>
    %394 = arith.addf %390, %393 : vector<8x1xf32>
    %395 = math.rsqrt %394 : vector<8x1xf32>
    %396 = vector.broadcast %395 : vector<8x1xf32> to vector<8x64xf32>
    %397 = arith.mulf %392, %396 : vector<8x64xf32>
    %398 = vector.broadcast %377 : vector<1x64xf32> to vector<8x64xf32>
    %399 = arith.mulf %397, %398 : vector<8x64xf32>
    %400 = vector.broadcast %379 : vector<1x64xf32> to vector<8x64xf32>
    %401 = arith.addf %399, %400 : vector<8x64xf32>
    %c1_157 = arith.constant 1 : index
    %c0_158 = arith.constant 0 : index
    %c0_159 = arith.constant 0 : index
    %402 = vector.load %arg18[%c1_157, %c0_158, %c0_159] : memref<4x64x128xf32, #tpu.memory_space<vmem>>, vector<1x64x128xf32>
    %403 = vector.shape_cast %402 : vector<1x64x128xf32> to vector<64x128xf32>
    %cst_160 = arith.constant dense<0.000000e+00> : vector<8x128xf32>
    %404 = tpu.matmul %401, %403, %cst_160 {dimension_numbers = #tpu.dot_dimension_numbers<[1], [0], [0], [1], [0, 0, 1, 1], [], []>} : vector<8x64xf32>, vector<64x128xf32>, vector<8x128xf32> -> vector<8x128xf32>
    %c1_161 = arith.constant 1 : index
    %c0_162 = arith.constant 0 : index
    %c0_163 = arith.constant 0 : index
    %405 = vector.load %arg19[%c1_161, %c0_162, %c0_163] : memref<4x1x128xf32, #tpu.memory_space<vmem>>, vector<1x1x128xf32>
    %406 = vector.shape_cast %405 : vector<1x1x128xf32> to vector<1x128xf32>
    %407 = vector.broadcast %406 : vector<1x128xf32> to vector<8x128xf32>
    %408 = arith.addf %404, %407 : vector<8x128xf32>
    %cst_164 = arith.constant 0.000000e+00 : f32
    %409 = vector.broadcast %cst_164 : f32 to vector<8x128xf32>
    %410 = arith.maximumf %408, %409 : vector<8x128xf32>
    %c1_165 = arith.constant 1 : index
    %c0_166 = arith.constant 0 : index
    %c0_167 = arith.constant 0 : index
    %411 = vector.load %arg20[%c1_165, %c0_166, %c0_167] : memref<4x128x64xf32, #tpu.memory_space<vmem>>, vector<1x128x64xf32>
    %412 = vector.shape_cast %411 : vector<1x128x64xf32> to vector<128x64xf32>
    %cst_168 = arith.constant dense<0.000000e+00> : vector<8x64xf32>
    %413 = tpu.matmul %410, %412, %cst_168 {dimension_numbers = #tpu.dot_dimension_numbers<[1], [0], [0], [1], [0, 0, 1, 1], [], []>} : vector<8x128xf32>, vector<128x64xf32>, vector<8x64xf32> -> vector<8x64xf32>
    %c1_169 = arith.constant 1 : index
    %c0_170 = arith.constant 0 : index
    %c0_171 = arith.constant 0 : index
    %414 = vector.load %arg21[%c1_169, %c0_170, %c0_171] : memref<4x1x64xf32, #tpu.memory_space<vmem>>, vector<1x1x64xf32>
    %415 = vector.shape_cast %414 : vector<1x1x64xf32> to vector<1x64xf32>
    %416 = vector.broadcast %415 : vector<1x64xf32> to vector<8x64xf32>
    %417 = arith.addf %413, %416 : vector<8x64xf32>
    %418 = arith.addf %401, %417 : vector<8x64xf32>
    %c1_172 = arith.constant 1 : index
    %c0_173 = arith.constant 0 : index
    %c0_174 = arith.constant 0 : index
    %419 = vector.load %arg22[%c1_172, %c0_173, %c0_174] : memref<4x1x64xf32, #tpu.memory_space<vmem>>, vector<1x1x64xf32>
    %420 = vector.shape_cast %419 : vector<1x1x64xf32> to vector<1x64xf32>
    %c1_175 = arith.constant 1 : index
    %c0_176 = arith.constant 0 : index
    %c0_177 = arith.constant 0 : index
    %421 = vector.load %arg23[%c1_175, %c0_176, %c0_177] : memref<4x1x64xf32, #tpu.memory_space<vmem>>, vector<1x1x64xf32>
    %422 = vector.shape_cast %421 : vector<1x1x64xf32> to vector<1x64xf32>
    %cst_178 = arith.constant dense<0.000000e+00> : vector<8xf32>
    %423 = vector.multi_reduction <add>, %418, %cst_178 [1] : vector<8x64xf32> to vector<8xf32>
    %424 = vector.shape_cast %423 : vector<8xf32> to vector<8x1xf32>
    %cst_179 = arith.constant 6.400000e+01 : f32
    %425 = vector.broadcast %cst_179 : f32 to vector<8x1xf32>
    %426 = arith.divf %424, %425 : vector<8x1xf32>
    %427 = vector.broadcast %426 : vector<8x1xf32> to vector<8x64xf32>
    %428 = arith.subf %418, %427 : vector<8x64xf32>
    %429 = arith.mulf %428, %428 : vector<8x64xf32>
    %cst_180 = arith.constant dense<0.000000e+00> : vector<8xf32>
    %430 = vector.multi_reduction <add>, %429, %cst_180 [1] : vector<8x64xf32> to vector<8xf32>
    %431 = vector.shape_cast %430 : vector<8xf32> to vector<8x1xf32>
    %cst_181 = arith.constant 6.400000e+01 : f32
    %432 = vector.broadcast %cst_181 : f32 to vector<8x1xf32>
    %433 = arith.divf %431, %432 : vector<8x1xf32>
    %434 = vector.broadcast %426 : vector<8x1xf32> to vector<8x64xf32>
    %435 = arith.subf %418, %434 : vector<8x64xf32>
    %cst_182 = arith.constant 9.99999974E-6 : f32
    %436 = vector.broadcast %cst_182 : f32 to vector<8x1xf32>
    %437 = arith.addf %433, %436 : vector<8x1xf32>
    %438 = math.rsqrt %437 : vector<8x1xf32>
    %439 = vector.broadcast %438 : vector<8x1xf32> to vector<8x64xf32>
    %440 = arith.mulf %435, %439 : vector<8x64xf32>
    %441 = vector.broadcast %420 : vector<1x64xf32> to vector<8x64xf32>
    %442 = arith.mulf %440, %441 : vector<8x64xf32>
    %443 = vector.broadcast %422 : vector<1x64xf32> to vector<8x64xf32>
    %444 = arith.addf %442, %443 : vector<8x64xf32>
    %c2_183 = arith.constant 2 : index
    %c0_184 = arith.constant 0 : index
    %c0_185 = arith.constant 0 : index
    %445 = vector.load %arg14[%c2_183, %c0_184, %c0_185] : memref<4x64x64xf32, #tpu.memory_space<vmem>>, vector<1x64x64xf32>
    %446 = vector.shape_cast %445 : vector<1x64x64xf32> to vector<64x64xf32>
    %cst_186 = arith.constant dense<0.000000e+00> : vector<8x64xf32>
    %447 = tpu.matmul %444, %446, %cst_186 {dimension_numbers = #tpu.dot_dimension_numbers<[1], [0], [0], [1], [0, 0, 1, 1], [], []>} : vector<8x64xf32>, vector<64x64xf32>, vector<8x64xf32> -> vector<8x64xf32>
    %c2_187 = arith.constant 2 : index
    %c0_188 = arith.constant 0 : index
    %c0_189 = arith.constant 0 : index
    %448 = vector.load %arg15[%c2_187, %c0_188, %c0_189] : memref<4x1x64xf32, #tpu.memory_space<vmem>>, vector<1x1x64xf32>
    %449 = vector.shape_cast %448 : vector<1x1x64xf32> to vector<1x64xf32>
    %450 = vector.broadcast %449 : vector<1x64xf32> to vector<8x64xf32>
    %451 = arith.addf %447, %450 : vector<8x64xf32>
    %452 = arith.addf %444, %451 : vector<8x64xf32>
    %c2_190 = arith.constant 2 : index
    %c0_191 = arith.constant 0 : index
    %c0_192 = arith.constant 0 : index
    %453 = vector.load %arg16[%c2_190, %c0_191, %c0_192] : memref<4x1x64xf32, #tpu.memory_space<vmem>>, vector<1x1x64xf32>
    %454 = vector.shape_cast %453 : vector<1x1x64xf32> to vector<1x64xf32>
    %c2_193 = arith.constant 2 : index
    %c0_194 = arith.constant 0 : index
    %c0_195 = arith.constant 0 : index
    %455 = vector.load %arg17[%c2_193, %c0_194, %c0_195] : memref<4x1x64xf32, #tpu.memory_space<vmem>>, vector<1x1x64xf32>
    %456 = vector.shape_cast %455 : vector<1x1x64xf32> to vector<1x64xf32>
    %cst_196 = arith.constant dense<0.000000e+00> : vector<8xf32>
    %457 = vector.multi_reduction <add>, %452, %cst_196 [1] : vector<8x64xf32> to vector<8xf32>
    %458 = vector.shape_cast %457 : vector<8xf32> to vector<8x1xf32>
    %cst_197 = arith.constant 6.400000e+01 : f32
    %459 = vector.broadcast %cst_197 : f32 to vector<8x1xf32>
    %460 = arith.divf %458, %459 : vector<8x1xf32>
    %461 = vector.broadcast %460 : vector<8x1xf32> to vector<8x64xf32>
    %462 = arith.subf %452, %461 : vector<8x64xf32>
    %463 = arith.mulf %462, %462 : vector<8x64xf32>
    %cst_198 = arith.constant dense<0.000000e+00> : vector<8xf32>
    %464 = vector.multi_reduction <add>, %463, %cst_198 [1] : vector<8x64xf32> to vector<8xf32>
    %465 = vector.shape_cast %464 : vector<8xf32> to vector<8x1xf32>
    %cst_199 = arith.constant 6.400000e+01 : f32
    %466 = vector.broadcast %cst_199 : f32 to vector<8x1xf32>
    %467 = arith.divf %465, %466 : vector<8x1xf32>
    %468 = vector.broadcast %460 : vector<8x1xf32> to vector<8x64xf32>
    %469 = arith.subf %452, %468 : vector<8x64xf32>
    %cst_200 = arith.constant 9.99999974E-6 : f32
    %470 = vector.broadcast %cst_200 : f32 to vector<8x1xf32>
    %471 = arith.addf %467, %470 : vector<8x1xf32>
    %472 = math.rsqrt %471 : vector<8x1xf32>
    %473 = vector.broadcast %472 : vector<8x1xf32> to vector<8x64xf32>
    %474 = arith.mulf %469, %473 : vector<8x64xf32>
    %475 = vector.broadcast %454 : vector<1x64xf32> to vector<8x64xf32>
    %476 = arith.mulf %474, %475 : vector<8x64xf32>
    %477 = vector.broadcast %456 : vector<1x64xf32> to vector<8x64xf32>
    %478 = arith.addf %476, %477 : vector<8x64xf32>
    %c2_201 = arith.constant 2 : index
    %c0_202 = arith.constant 0 : index
    %c0_203 = arith.constant 0 : index
    %479 = vector.load %arg18[%c2_201, %c0_202, %c0_203] : memref<4x64x128xf32, #tpu.memory_space<vmem>>, vector<1x64x128xf32>
    %480 = vector.shape_cast %479 : vector<1x64x128xf32> to vector<64x128xf32>
    %cst_204 = arith.constant dense<0.000000e+00> : vector<8x128xf32>
    %481 = tpu.matmul %478, %480, %cst_204 {dimension_numbers = #tpu.dot_dimension_numbers<[1], [0], [0], [1], [0, 0, 1, 1], [], []>} : vector<8x64xf32>, vector<64x128xf32>, vector<8x128xf32> -> vector<8x128xf32>
    %c2_205 = arith.constant 2 : index
    %c0_206 = arith.constant 0 : index
    %c0_207 = arith.constant 0 : index
    %482 = vector.load %arg19[%c2_205, %c0_206, %c0_207] : memref<4x1x128xf32, #tpu.memory_space<vmem>>, vector<1x1x128xf32>
    %483 = vector.shape_cast %482 : vector<1x1x128xf32> to vector<1x128xf32>
    %484 = vector.broadcast %483 : vector<1x128xf32> to vector<8x128xf32>
    %485 = arith.addf %481, %484 : vector<8x128xf32>
    %cst_208 = arith.constant 0.000000e+00 : f32
    %486 = vector.broadcast %cst_208 : f32 to vector<8x128xf32>
    %487 = arith.maximumf %485, %486 : vector<8x128xf32>
    %c2_209 = arith.constant 2 : index
    %c0_210 = arith.constant 0 : index
    %c0_211 = arith.constant 0 : index
    %488 = vector.load %arg20[%c2_209, %c0_210, %c0_211] : memref<4x128x64xf32, #tpu.memory_space<vmem>>, vector<1x128x64xf32>
    %489 = vector.shape_cast %488 : vector<1x128x64xf32> to vector<128x64xf32>
    %cst_212 = arith.constant dense<0.000000e+00> : vector<8x64xf32>
    %490 = tpu.matmul %487, %489, %cst_212 {dimension_numbers = #tpu.dot_dimension_numbers<[1], [0], [0], [1], [0, 0, 1, 1], [], []>} : vector<8x128xf32>, vector<128x64xf32>, vector<8x64xf32> -> vector<8x64xf32>
    %c2_213 = arith.constant 2 : index
    %c0_214 = arith.constant 0 : index
    %c0_215 = arith.constant 0 : index
    %491 = vector.load %arg21[%c2_213, %c0_214, %c0_215] : memref<4x1x64xf32, #tpu.memory_space<vmem>>, vector<1x1x64xf32>
    %492 = vector.shape_cast %491 : vector<1x1x64xf32> to vector<1x64xf32>
    %493 = vector.broadcast %492 : vector<1x64xf32> to vector<8x64xf32>
    %494 = arith.addf %490, %493 : vector<8x64xf32>
    %495 = arith.addf %478, %494 : vector<8x64xf32>
    %c2_216 = arith.constant 2 : index
    %c0_217 = arith.constant 0 : index
    %c0_218 = arith.constant 0 : index
    %496 = vector.load %arg22[%c2_216, %c0_217, %c0_218] : memref<4x1x64xf32, #tpu.memory_space<vmem>>, vector<1x1x64xf32>
    %497 = vector.shape_cast %496 : vector<1x1x64xf32> to vector<1x64xf32>
    %c2_219 = arith.constant 2 : index
    %c0_220 = arith.constant 0 : index
    %c0_221 = arith.constant 0 : index
    %498 = vector.load %arg23[%c2_219, %c0_220, %c0_221] : memref<4x1x64xf32, #tpu.memory_space<vmem>>, vector<1x1x64xf32>
    %499 = vector.shape_cast %498 : vector<1x1x64xf32> to vector<1x64xf32>
    %cst_222 = arith.constant dense<0.000000e+00> : vector<8xf32>
    %500 = vector.multi_reduction <add>, %495, %cst_222 [1] : vector<8x64xf32> to vector<8xf32>
    %501 = vector.shape_cast %500 : vector<8xf32> to vector<8x1xf32>
    %cst_223 = arith.constant 6.400000e+01 : f32
    %502 = vector.broadcast %cst_223 : f32 to vector<8x1xf32>
    %503 = arith.divf %501, %502 : vector<8x1xf32>
    %504 = vector.broadcast %503 : vector<8x1xf32> to vector<8x64xf32>
    %505 = arith.subf %495, %504 : vector<8x64xf32>
    %506 = arith.mulf %505, %505 : vector<8x64xf32>
    %cst_224 = arith.constant dense<0.000000e+00> : vector<8xf32>
    %507 = vector.multi_reduction <add>, %506, %cst_224 [1] : vector<8x64xf32> to vector<8xf32>
    %508 = vector.shape_cast %507 : vector<8xf32> to vector<8x1xf32>
    %cst_225 = arith.constant 6.400000e+01 : f32
    %509 = vector.broadcast %cst_225 : f32 to vector<8x1xf32>
    %510 = arith.divf %508, %509 : vector<8x1xf32>
    %511 = vector.broadcast %503 : vector<8x1xf32> to vector<8x64xf32>
    %512 = arith.subf %495, %511 : vector<8x64xf32>
    %cst_226 = arith.constant 9.99999974E-6 : f32
    %513 = vector.broadcast %cst_226 : f32 to vector<8x1xf32>
    %514 = arith.addf %510, %513 : vector<8x1xf32>
    %515 = math.rsqrt %514 : vector<8x1xf32>
    %516 = vector.broadcast %515 : vector<8x1xf32> to vector<8x64xf32>
    %517 = arith.mulf %512, %516 : vector<8x64xf32>
    %518 = vector.broadcast %497 : vector<1x64xf32> to vector<8x64xf32>
    %519 = arith.mulf %517, %518 : vector<8x64xf32>
    %520 = vector.broadcast %499 : vector<1x64xf32> to vector<8x64xf32>
    %521 = arith.addf %519, %520 : vector<8x64xf32>
    %c3_227 = arith.constant 3 : index
    %c0_228 = arith.constant 0 : index
    %c0_229 = arith.constant 0 : index
    %522 = vector.load %arg14[%c3_227, %c0_228, %c0_229] : memref<4x64x64xf32, #tpu.memory_space<vmem>>, vector<1x64x64xf32>
    %523 = vector.shape_cast %522 : vector<1x64x64xf32> to vector<64x64xf32>
    %cst_230 = arith.constant dense<0.000000e+00> : vector<8x64xf32>
    %524 = tpu.matmul %521, %523, %cst_230 {dimension_numbers = #tpu.dot_dimension_numbers<[1], [0], [0], [1], [0, 0, 1, 1], [], []>} : vector<8x64xf32>, vector<64x64xf32>, vector<8x64xf32> -> vector<8x64xf32>
    %c3_231 = arith.constant 3 : index
    %c0_232 = arith.constant 0 : index
    %c0_233 = arith.constant 0 : index
    %525 = vector.load %arg15[%c3_231, %c0_232, %c0_233] : memref<4x1x64xf32, #tpu.memory_space<vmem>>, vector<1x1x64xf32>
    %526 = vector.shape_cast %525 : vector<1x1x64xf32> to vector<1x64xf32>
    %527 = vector.broadcast %526 : vector<1x64xf32> to vector<8x64xf32>
    %528 = arith.addf %524, %527 : vector<8x64xf32>
    %529 = arith.addf %521, %528 : vector<8x64xf32>
    %c3_234 = arith.constant 3 : index
    %c0_235 = arith.constant 0 : index
    %c0_236 = arith.constant 0 : index
    %530 = vector.load %arg16[%c3_234, %c0_235, %c0_236] : memref<4x1x64xf32, #tpu.memory_space<vmem>>, vector<1x1x64xf32>
    %531 = vector.shape_cast %530 : vector<1x1x64xf32> to vector<1x64xf32>
    %c3_237 = arith.constant 3 : index
    %c0_238 = arith.constant 0 : index
    %c0_239 = arith.constant 0 : index
    %532 = vector.load %arg17[%c3_237, %c0_238, %c0_239] : memref<4x1x64xf32, #tpu.memory_space<vmem>>, vector<1x1x64xf32>
    %533 = vector.shape_cast %532 : vector<1x1x64xf32> to vector<1x64xf32>
    %cst_240 = arith.constant dense<0.000000e+00> : vector<8xf32>
    %534 = vector.multi_reduction <add>, %529, %cst_240 [1] : vector<8x64xf32> to vector<8xf32>
    %535 = vector.shape_cast %534 : vector<8xf32> to vector<8x1xf32>
    %cst_241 = arith.constant 6.400000e+01 : f32
    %536 = vector.broadcast %cst_241 : f32 to vector<8x1xf32>
    %537 = arith.divf %535, %536 : vector<8x1xf32>
    %538 = vector.broadcast %537 : vector<8x1xf32> to vector<8x64xf32>
    %539 = arith.subf %529, %538 : vector<8x64xf32>
    %540 = arith.mulf %539, %539 : vector<8x64xf32>
    %cst_242 = arith.constant dense<0.000000e+00> : vector<8xf32>
    %541 = vector.multi_reduction <add>, %540, %cst_242 [1] : vector<8x64xf32> to vector<8xf32>
    %542 = vector.shape_cast %541 : vector<8xf32> to vector<8x1xf32>
    %cst_243 = arith.constant 6.400000e+01 : f32
    %543 = vector.broadcast %cst_243 : f32 to vector<8x1xf32>
    %544 = arith.divf %542, %543 : vector<8x1xf32>
    %545 = vector.broadcast %537 : vector<8x1xf32> to vector<8x64xf32>
    %546 = arith.subf %529, %545 : vector<8x64xf32>
    %cst_244 = arith.constant 9.99999974E-6 : f32
    %547 = vector.broadcast %cst_244 : f32 to vector<8x1xf32>
    %548 = arith.addf %544, %547 : vector<8x1xf32>
    %549 = math.rsqrt %548 : vector<8x1xf32>
    %550 = vector.broadcast %549 : vector<8x1xf32> to vector<8x64xf32>
    %551 = arith.mulf %546, %550 : vector<8x64xf32>
    %552 = vector.broadcast %531 : vector<1x64xf32> to vector<8x64xf32>
    %553 = arith.mulf %551, %552 : vector<8x64xf32>
    %554 = vector.broadcast %533 : vector<1x64xf32> to vector<8x64xf32>
    %555 = arith.addf %553, %554 : vector<8x64xf32>
    %c3_245 = arith.constant 3 : index
    %c0_246 = arith.constant 0 : index
    %c0_247 = arith.constant 0 : index
    %556 = vector.load %arg18[%c3_245, %c0_246, %c0_247] : memref<4x64x128xf32, #tpu.memory_space<vmem>>, vector<1x64x128xf32>
    %557 = vector.shape_cast %556 : vector<1x64x128xf32> to vector<64x128xf32>
    %cst_248 = arith.constant dense<0.000000e+00> : vector<8x128xf32>
    %558 = tpu.matmul %555, %557, %cst_248 {dimension_numbers = #tpu.dot_dimension_numbers<[1], [0], [0], [1], [0, 0, 1, 1], [], []>} : vector<8x64xf32>, vector<64x128xf32>, vector<8x128xf32> -> vector<8x128xf32>
    %c3_249 = arith.constant 3 : index
    %c0_250 = arith.constant 0 : index
    %c0_251 = arith.constant 0 : index
    %559 = vector.load %arg19[%c3_249, %c0_250, %c0_251] : memref<4x1x128xf32, #tpu.memory_space<vmem>>, vector<1x1x128xf32>
    %560 = vector.shape_cast %559 : vector<1x1x128xf32> to vector<1x128xf32>
    %561 = vector.broadcast %560 : vector<1x128xf32> to vector<8x128xf32>
    %562 = arith.addf %558, %561 : vector<8x128xf32>
    %cst_252 = arith.constant 0.000000e+00 : f32
    %563 = vector.broadcast %cst_252 : f32 to vector<8x128xf32>
    %564 = arith.maximumf %562, %563 : vector<8x128xf32>
    %c3_253 = arith.constant 3 : index
    %c0_254 = arith.constant 0 : index
    %c0_255 = arith.constant 0 : index
    %565 = vector.load %arg20[%c3_253, %c0_254, %c0_255] : memref<4x128x64xf32, #tpu.memory_space<vmem>>, vector<1x128x64xf32>
    %566 = vector.shape_cast %565 : vector<1x128x64xf32> to vector<128x64xf32>
    %cst_256 = arith.constant dense<0.000000e+00> : vector<8x64xf32>
    %567 = tpu.matmul %564, %566, %cst_256 {dimension_numbers = #tpu.dot_dimension_numbers<[1], [0], [0], [1], [0, 0, 1, 1], [], []>} : vector<8x128xf32>, vector<128x64xf32>, vector<8x64xf32> -> vector<8x64xf32>
    %c3_257 = arith.constant 3 : index
    %c0_258 = arith.constant 0 : index
    %c0_259 = arith.constant 0 : index
    %568 = vector.load %arg21[%c3_257, %c0_258, %c0_259] : memref<4x1x64xf32, #tpu.memory_space<vmem>>, vector<1x1x64xf32>
    %569 = vector.shape_cast %568 : vector<1x1x64xf32> to vector<1x64xf32>
    %570 = vector.broadcast %569 : vector<1x64xf32> to vector<8x64xf32>
    %571 = arith.addf %567, %570 : vector<8x64xf32>
    %572 = arith.addf %555, %571 : vector<8x64xf32>
    %c3_260 = arith.constant 3 : index
    %c0_261 = arith.constant 0 : index
    %c0_262 = arith.constant 0 : index
    %573 = vector.load %arg22[%c3_260, %c0_261, %c0_262] : memref<4x1x64xf32, #tpu.memory_space<vmem>>, vector<1x1x64xf32>
    %574 = vector.shape_cast %573 : vector<1x1x64xf32> to vector<1x64xf32>
    %c3_263 = arith.constant 3 : index
    %c0_264 = arith.constant 0 : index
    %c0_265 = arith.constant 0 : index
    %575 = vector.load %arg23[%c3_263, %c0_264, %c0_265] : memref<4x1x64xf32, #tpu.memory_space<vmem>>, vector<1x1x64xf32>
    %576 = vector.shape_cast %575 : vector<1x1x64xf32> to vector<1x64xf32>
    %cst_266 = arith.constant dense<0.000000e+00> : vector<8xf32>
    %577 = vector.multi_reduction <add>, %572, %cst_266 [1] : vector<8x64xf32> to vector<8xf32>
    %578 = vector.shape_cast %577 : vector<8xf32> to vector<8x1xf32>
    %cst_267 = arith.constant 6.400000e+01 : f32
    %579 = vector.broadcast %cst_267 : f32 to vector<8x1xf32>
    %580 = arith.divf %578, %579 : vector<8x1xf32>
    %581 = vector.broadcast %580 : vector<8x1xf32> to vector<8x64xf32>
    %582 = arith.subf %572, %581 : vector<8x64xf32>
    %583 = arith.mulf %582, %582 : vector<8x64xf32>
    %cst_268 = arith.constant dense<0.000000e+00> : vector<8xf32>
    %584 = vector.multi_reduction <add>, %583, %cst_268 [1] : vector<8x64xf32> to vector<8xf32>
    %585 = vector.shape_cast %584 : vector<8xf32> to vector<8x1xf32>
    %cst_269 = arith.constant 6.400000e+01 : f32
    %586 = vector.broadcast %cst_269 : f32 to vector<8x1xf32>
    %587 = arith.divf %585, %586 : vector<8x1xf32>
    %588 = vector.broadcast %580 : vector<8x1xf32> to vector<8x64xf32>
    %589 = arith.subf %572, %588 : vector<8x64xf32>
    %cst_270 = arith.constant 9.99999974E-6 : f32
    %590 = vector.broadcast %cst_270 : f32 to vector<8x1xf32>
    %591 = arith.addf %587, %590 : vector<8x1xf32>
    %592 = math.rsqrt %591 : vector<8x1xf32>
    %593 = vector.broadcast %592 : vector<8x1xf32> to vector<8x64xf32>
    %594 = arith.mulf %589, %593 : vector<8x64xf32>
    %595 = vector.broadcast %574 : vector<1x64xf32> to vector<8x64xf32>
    %596 = arith.mulf %594, %595 : vector<8x64xf32>
    %597 = vector.broadcast %576 : vector<1x64xf32> to vector<8x64xf32>
    %598 = arith.addf %596, %597 : vector<8x64xf32>
    %c0_271 = arith.constant 0 : index
    %c0_272 = arith.constant 0 : index
    %599 = vector.load %arg24[%c0_271, %c0_272] : memref<64x32xf32, #tpu.memory_space<vmem>>, vector<64x32xf32>
    %cst_273 = arith.constant dense<0.000000e+00> : vector<8x32xf32>
    %600 = tpu.matmul %13, %599, %cst_273 {dimension_numbers = #tpu.dot_dimension_numbers<[1], [0], [0], [1], [0, 0, 1, 1], [], []>} : vector<8x64xf32>, vector<64x32xf32>, vector<8x32xf32> -> vector<8x32xf32>
    %c0_274 = arith.constant 0 : index
    %c0_275 = arith.constant 0 : index
    %601 = vector.load %arg25[%c0_274, %c0_275] : memref<1x32xf32, #tpu.memory_space<vmem>>, vector<1x32xf32>
    %602 = vector.broadcast %601 : vector<1x32xf32> to vector<8x32xf32>
    %603 = arith.addf %600, %602 : vector<8x32xf32>
    %c0_276 = arith.constant 0 : index
    %c0_277 = arith.constant 0 : index
    %604 = vector.load %arg26[%c0_276, %c0_277] : memref<256x8xf32, #tpu.memory_space<vmem>>, vector<256x8xf32>
    %605 = vector.extract_strided_slice %604 {offsets = [0, 0], sizes = [64, 8], strides = [1, 1]} : vector<256x8xf32> to vector<64x8xf32>
    %cst_278 = arith.constant dense<0.000000e+00> : vector<8x8xf32>
    %606 = tpu.matmul %20, %605, %cst_278 {dimension_numbers = #tpu.dot_dimension_numbers<[1], [0], [0], [1], [0, 0, 1, 1], [], []>} : vector<8x64xf32>, vector<64x8xf32>, vector<8x8xf32> -> vector<8x8xf32>
    %607 = vector.extract_strided_slice %604 {offsets = [64, 0], sizes = [32, 8], strides = [1, 1]} : vector<256x8xf32> to vector<32x8xf32>
    %cst_279 = arith.constant dense<0.000000e+00> : vector<8x8xf32>
    %608 = tpu.matmul %194, %607, %cst_279 {dimension_numbers = #tpu.dot_dimension_numbers<[1], [0], [0], [1], [0, 0, 1, 1], [], []>} : vector<8x32xf32>, vector<32x8xf32>, vector<8x8xf32> -> vector<8x8xf32>
    %609 = arith.addf %606, %608 : vector<8x8xf32>
    %610 = vector.extract_strided_slice %604 {offsets = [96, 0], sizes = [64, 8], strides = [1, 1]} : vector<256x8xf32> to vector<64x8xf32>
    %cst_280 = arith.constant dense<0.000000e+00> : vector<8x8xf32>
    %611 = tpu.matmul %290, %610, %cst_280 {dimension_numbers = #tpu.dot_dimension_numbers<[1], [0], [0], [1], [0, 0, 1, 1], [], []>} : vector<8x64xf32>, vector<64x8xf32>, vector<8x8xf32> -> vector<8x8xf32>
    %612 = arith.addf %609, %611 : vector<8x8xf32>
    %613 = vector.extract_strided_slice %604 {offsets = [160, 0], sizes = [64, 8], strides = [1, 1]} : vector<256x8xf32> to vector<64x8xf32>
    %cst_281 = arith.constant dense<0.000000e+00> : vector<8x8xf32>
    %614 = tpu.matmul %598, %613, %cst_281 {dimension_numbers = #tpu.dot_dimension_numbers<[1], [0], [0], [1], [0, 0, 1, 1], [], []>} : vector<8x64xf32>, vector<64x8xf32>, vector<8x8xf32> -> vector<8x8xf32>
    %615 = arith.addf %612, %614 : vector<8x8xf32>
    %616 = vector.extract_strided_slice %604 {offsets = [224, 0], sizes = [32, 8], strides = [1, 1]} : vector<256x8xf32> to vector<32x8xf32>
    %cst_282 = arith.constant dense<0.000000e+00> : vector<8x8xf32>
    %617 = tpu.matmul %603, %616, %cst_282 {dimension_numbers = #tpu.dot_dimension_numbers<[1], [0], [0], [1], [0, 0, 1, 1], [], []>} : vector<8x32xf32>, vector<32x8xf32>, vector<8x8xf32> -> vector<8x8xf32>
    %618 = arith.addf %615, %617 : vector<8x8xf32>
    %c0_283 = arith.constant 0 : index
    %c0_284 = arith.constant 0 : index
    %619 = vector.load %arg27[%c0_283, %c0_284] : memref<1x8xf32, #tpu.memory_space<vmem>>, vector<1x8xf32>
    %620 = vector.broadcast %619 : vector<1x8xf32> to vector<8x8xf32>
    %621 = arith.addf %618, %620 : vector<8x8xf32>
    %622 = arith.negf %621 : vector<8x8xf32>
    %623 = math.exp %622 : vector<8x8xf32>
    %cst_285 = arith.constant 1.000000e+00 : f32
    %624 = vector.broadcast %cst_285 : f32 to vector<8x8xf32>
    %625 = arith.addf %624, %623 : vector<8x8xf32>
    %626 = arith.divf %624, %625 : vector<8x8xf32>
    %c0_286 = arith.constant 0 : index
    %c0_287 = arith.constant 0 : index
    %627 = vector.load %arg28[%c0_286, %c0_287] : memref<1x8xf32, #tpu.memory_space<vmem>>, vector<1x8xf32>
    %cst_288 = arith.constant dense<0xFF800000> : vector<1xf32>
    %628 = vector.multi_reduction <maximumf>, %627, %cst_288 [1] : vector<1x8xf32> to vector<1xf32>
    %cst_289 = arith.constant 0xFF800000 : f32
    %629 = vector.broadcast %cst_289 : f32 to vector<1xf32>
    %630 = arith.maximumf %629, %628 : vector<1xf32>
    %631 = vector.shape_cast %630 : vector<1xf32> to vector<1x1xf32>
    %632 = vector.broadcast %631 : vector<1x1xf32> to vector<1x8xf32>
    %633 = arith.subf %627, %632 : vector<1x8xf32>
    %634 = math.exp %633 : vector<1x8xf32>
    %cst_290 = arith.constant dense<0.000000e+00> : vector<1xf32>
    %635 = vector.multi_reduction <add>, %634, %cst_290 [1] : vector<1x8xf32> to vector<1xf32>
    %636 = vector.shape_cast %635 : vector<1xf32> to vector<1x1xf32>
    %637 = vector.broadcast %636 : vector<1x1xf32> to vector<1x8xf32>
    %638 = arith.divf %634, %637 : vector<1x8xf32>
    %639 = vector.broadcast %638 : vector<1x8xf32> to vector<8x8xf32>
    %640 = arith.mulf %626, %639 : vector<8x8xf32>
    %cst_291 = arith.constant dense<0.000000e+00> : vector<8xf32>
    %641 = vector.multi_reduction <add>, %640, %cst_291 [1] : vector<8x8xf32> to vector<8xf32>
    %642 = vector.shape_cast %641 : vector<8xf32> to vector<8x1xf32>
    %c0_292 = arith.constant 0 : index
    %c0_293 = arith.constant 0 : index
    %643 = vector.load %arg29[%c0_292, %c0_293] : memref<8x1xf32, #tpu.memory_space<vmem>>, vector<8x1xf32>
    tpu.vector_store %arg29[%c0_292, %c0_293], %642 {strides = array<i32>} : memref<8x1xf32, #tpu.memory_space<vmem>>, vector<8x1xf32>,
    return
  }
  func.func @transform_0(%arg0: i32) -> (i32, i32) {
    %c0_i32 = arith.constant 0 : i32
    %c0_i32_0 = arith.constant 0 : i32
    return %arg0, %c0_i32 : i32, i32
  }
  func.func @transform_1(%arg0: i32) -> (i32, i32) {
    %c0_i32 = arith.constant 0 : i32
    %c0_i32_0 = arith.constant 0 : i32
    %c0_i32_1 = arith.constant 0 : i32
    return %c0_i32, %c0_i32_0 : i32, i32
  }
  func.func @transform_2(%arg0: i32) -> (i32, i32) {
    %c0_i32 = arith.constant 0 : i32
    %c0_i32_0 = arith.constant 0 : i32
    %c0_i32_1 = arith.constant 0 : i32
    return %c0_i32, %c0_i32_0 : i32, i32
  }
  func.func @transform_3(%arg0: i32) -> (i32, i32) {
    %c0_i32 = arith.constant 0 : i32
    %c0_i32_0 = arith.constant 0 : i32
    %c0_i32_1 = arith.constant 0 : i32
    return %c0_i32, %c0_i32_0 : i32, i32
  }
  func.func @transform_4(%arg0: i32) -> (i32, i32) {
    %c0_i32 = arith.constant 0 : i32
    %c0_i32_0 = arith.constant 0 : i32
    %c0_i32_1 = arith.constant 0 : i32
    return %c0_i32, %c0_i32_0 : i32, i32
  }
  func.func @transform_5(%arg0: i32) -> (i32, i32) {
    %c0_i32 = arith.constant 0 : i32
    %c0_i32_0 = arith.constant 0 : i32
    %c0_i32_1 = arith.constant 0 : i32
    return %c0_i32, %c0_i32_0 : i32, i32
  }
  func.func @transform_6(%arg0: i32) -> (i32, i32) {
    %c0_i32 = arith.constant 0 : i32
    %c0_i32_0 = arith.constant 0 : i32
    %c0_i32_1 = arith.constant 0 : i32
    return %c0_i32, %c0_i32_0 : i32, i32
  }
  func.func @transform_7(%arg0: i32) -> (i32, i32) {
    %c0_i32 = arith.constant 0 : i32
    %c0_i32_0 = arith.constant 0 : i32
    %c0_i32_1 = arith.constant 0 : i32
    return %c0_i32, %c0_i32_0 : i32, i32
  }
  func.func @transform_8(%arg0: i32) -> (i32, i32) {
    %c0_i32 = arith.constant 0 : i32
    %c0_i32_0 = arith.constant 0 : i32
    %c0_i32_1 = arith.constant 0 : i32
    return %c0_i32, %c0_i32_0 : i32, i32
  }
  func.func @transform_9(%arg0: i32) -> (i32, i32) {
    %c0_i32 = arith.constant 0 : i32
    %c0_i32_0 = arith.constant 0 : i32
    %c0_i32_1 = arith.constant 0 : i32
    return %c0_i32, %c0_i32_0 : i32, i32
  }
  func.func @transform_10(%arg0: i32) -> (i32, i32) {
    %c0_i32 = arith.constant 0 : i32
    %c0_i32_0 = arith.constant 0 : i32
    %c0_i32_1 = arith.constant 0 : i32
    return %c0_i32, %c0_i32_0 : i32, i32
  }
  func.func @transform_11(%arg0: i32) -> (i32, i32, i32) {
    %c0_i32 = arith.constant 0 : i32
    %c0_i32_0 = arith.constant 0 : i32
    %c0_i32_1 = arith.constant 0 : i32
    %c0_i32_2 = arith.constant 0 : i32
    return %c0_i32, %c0_i32_0, %c0_i32_1 : i32, i32, i32
  }
  func.func @transform_12(%arg0: i32) -> (i32, i32, i32) {
    %c0_i32 = arith.constant 0 : i32
    %c0_i32_0 = arith.constant 0 : i32
    %c0_i32_1 = arith.constant 0 : i32
    %c0_i32_2 = arith.constant 0 : i32
    return %c0_i32, %c0_i32_0, %c0_i32_1 : i32, i32, i32
  }
  func.func @transform_13(%arg0: i32) -> (i32, i32, i32) {
    %c0_i32 = arith.constant 0 : i32
    %c0_i32_0 = arith.constant 0 : i32
    %c0_i32_1 = arith.constant 0 : i32
    %c0_i32_2 = arith.constant 0 : i32
    return %c0_i32, %c0_i32_0, %c0_i32_1 : i32, i32, i32
  }
  func.func @transform_14(%arg0: i32) -> (i32, i32, i32) {
    %c0_i32 = arith.constant 0 : i32
    %c0_i32_0 = arith.constant 0 : i32
    %c0_i32_1 = arith.constant 0 : i32
    %c0_i32_2 = arith.constant 0 : i32
    return %c0_i32, %c0_i32_0, %c0_i32_1 : i32, i32, i32
  }
  func.func @transform_15(%arg0: i32) -> (i32, i32, i32) {
    %c0_i32 = arith.constant 0 : i32
    %c0_i32_0 = arith.constant 0 : i32
    %c0_i32_1 = arith.constant 0 : i32
    %c0_i32_2 = arith.constant 0 : i32
    return %c0_i32, %c0_i32_0, %c0_i32_1 : i32, i32, i32
  }
  func.func @transform_16(%arg0: i32) -> (i32, i32, i32) {
    %c0_i32 = arith.constant 0 : i32
    %c0_i32_0 = arith.constant 0 : i32
    %c0_i32_1 = arith.constant 0 : i32
    %c0_i32_2 = arith.constant 0 : i32
    return %c0_i32, %c0_i32_0, %c0_i32_1 : i32, i32, i32
  }
  func.func @transform_17(%arg0: i32) -> (i32, i32, i32) {
    %c0_i32 = arith.constant 0 : i32
    %c0_i32_0 = arith.constant 0 : i32
    %c0_i32_1 = arith.constant 0 : i32
    %c0_i32_2 = arith.constant 0 : i32
    return %c0_i32, %c0_i32_0, %c0_i32_1 : i32, i32, i32
  }
  func.func @transform_18(%arg0: i32) -> (i32, i32, i32) {
    %c0_i32 = arith.constant 0 : i32
    %c0_i32_0 = arith.constant 0 : i32
    %c0_i32_1 = arith.constant 0 : i32
    %c0_i32_2 = arith.constant 0 : i32
    return %c0_i32, %c0_i32_0, %c0_i32_1 : i32, i32, i32
  }
  func.func @transform_19(%arg0: i32) -> (i32, i32, i32) {
    %c0_i32 = arith.constant 0 : i32
    %c0_i32_0 = arith.constant 0 : i32
    %c0_i32_1 = arith.constant 0 : i32
    %c0_i32_2 = arith.constant 0 : i32
    return %c0_i32, %c0_i32_0, %c0_i32_1 : i32, i32, i32
  }
  func.func @transform_20(%arg0: i32) -> (i32, i32, i32) {
    %c0_i32 = arith.constant 0 : i32
    %c0_i32_0 = arith.constant 0 : i32
    %c0_i32_1 = arith.constant 0 : i32
    %c0_i32_2 = arith.constant 0 : i32
    return %c0_i32, %c0_i32_0, %c0_i32_1 : i32, i32, i32
  }
  func.func @transform_21(%arg0: i32) -> (i32, i32, i32) {
    %c0_i32 = arith.constant 0 : i32
    %c0_i32_0 = arith.constant 0 : i32
    %c0_i32_1 = arith.constant 0 : i32
    %c0_i32_2 = arith.constant 0 : i32
    return %c0_i32, %c0_i32_0, %c0_i32_1 : i32, i32, i32
  }
  func.func @transform_22(%arg0: i32) -> (i32, i32, i32) {
    %c0_i32 = arith.constant 0 : i32
    %c0_i32_0 = arith.constant 0 : i32
    %c0_i32_1 = arith.constant 0 : i32
    %c0_i32_2 = arith.constant 0 : i32
    return %c0_i32, %c0_i32_0, %c0_i32_1 : i32, i32, i32
  }
  func.func @transform_23(%arg0: i32) -> (i32, i32) {
    %c0_i32 = arith.constant 0 : i32
    %c0_i32_0 = arith.constant 0 : i32
    %c0_i32_1 = arith.constant 0 : i32
    return %c0_i32, %c0_i32_0 : i32, i32
  }
  func.func @transform_24(%arg0: i32) -> (i32, i32) {
    %c0_i32 = arith.constant 0 : i32
    %c0_i32_0 = arith.constant 0 : i32
    %c0_i32_1 = arith.constant 0 : i32
    return %c0_i32, %c0_i32_0 : i32, i32
  }
  func.func @transform_25(%arg0: i32) -> (i32, i32) {
    %c0_i32 = arith.constant 0 : i32
    %c0_i32_0 = arith.constant 0 : i32
    %c0_i32_1 = arith.constant 0 : i32
    return %c0_i32, %c0_i32_0 : i32, i32
  }
  func.func @transform_26(%arg0: i32) -> (i32, i32) {
    %c0_i32 = arith.constant 0 : i32
    %c0_i32_0 = arith.constant 0 : i32
    %c0_i32_1 = arith.constant 0 : i32
    return %c0_i32, %c0_i32_0 : i32, i32
  }
  func.func @transform_27(%arg0: i32) -> (i32, i32) {
    %c0_i32 = arith.constant 0 : i32
    %c0_i32_0 = arith.constant 0 : i32
    %c0_i32_1 = arith.constant 0 : i32
    return %c0_i32, %c0_i32_0 : i32, i32
  }
  func.func @transform_28(%arg0: i32) -> (i32, i32) {
    %c0_i32 = arith.constant 0 : i32
    %c0_i32_0 = arith.constant 0 : i32
    return %arg0, %c0_i32 : i32, i32
  }
}

</mosaic_0001>

<bundles_post_ra>
// kernel: ensemble_forward.1
= control target key start
LH: loop header
LB: loop body
LE: loop exit
PB: predicated region body
PF: predicated region fallthrough
CT: control target
= control target key end

     0   :  { %s7779_s0 = inlined_call_operand.vmem [shape: f32[8,42], index: 0, kind: input, shape index: {}]   ;;  %s7780_s1 = inlined_call_operand.hbm [shape: f32[42,320], index: 1, kind: input, shape index: {}]   ;;  %s7781_s2 = inlined_call_operand.hbm [shape: f32[1,320], index: 2, kind: input, shape index: {}]   ;;  %s7782_s3 = inlined_call_operand.vmem [shape: f32[128,64], index: 3, kind: input, shape index: {}]   ;;  %s7783_s4 = inlined_call_operand.vmem [shape: f32[1,64], index: 4, kind: input, shape index: {}]   ;;  %s7784_s5 = inlined_call_operand.hbm [shape: f32[42,192], index: 5, kind: input, shape index: {}]   ;;  %s7785_s6 = inlined_call_operand.hbm [shape: f32[1,64], index: 6, kind: input, shape index: {}]   ;;  %s7786_s7 = inlined_call_operand.hbm [shape: f32[64,192], index: 7, kind: input, shape index: {}]   ;;  %s7787_s8 = inlined_call_operand.hbm [shape: f32[1,64], index: 8, kind: input, shape index: {}]   ;;  %s7788_s9 = inlined_call_operand.hbm [shape: f32[64,96], index: 9, kind: input, shape index: {}]   ;;  %s7789_s10 = inlined_call_operand.hbm [shape: f32[1,32], index: 10, kind: input, shape index: {}]   ;;  %s7790_s11 = inlined_call_operand.vmem [shape: f32[4,64,192], index: 11, kind: input, shape index: {}]   ;;  %s7791_s12 = inlined_call_operand.hbm [shape: f32[4,1,192], index: 12, kind: input, shape index: {}]   ;;  %s7792_s13 = inlined_call_operand.vmem [shape: f32[4,64,64], index: 13, kind: input, shape index: {}]   ;;  %s7793_s14 = inlined_call_operand.vmem [shape: f32[4,1,64], index: 14, kind: input, shape index: {}]   ;;  %s7794_s15 = inlined_call_operand.hbm [shape: f32[4,1,64], index: 15, kind: input, shape index: {}]   ;;  %s7795_s16 = inlined_call_operand.hbm [shape: f32[4,1,64], index: 16, kind: input, shape index: {}]   ;;  %s7796_s17 = inlined_call_operand.vmem [shape: f32[4,64,128], index: 17, kind: input, shape index: {}]   ;;  %s7797_s18 = inlined_call_operand.vmem [shape: f32[4,1,128], index: 18, kind: input, shape index: {}]   ;;  %s7798_s19 = inlined_call_operand.vmem [shape: f32[4,128,64], index: 19, kind: input, shape index: {}]   ;;  %s7799_s20 = inlined_call_operand.hbm [shape: f32[4,1,64], index: 20, kind: input, shape index: {}]   ;;  %s7800_s21 = inlined_call_operand.hbm [shape: f32[4,1,64], index: 21, kind: input, shape index: {}]   ;;  %s7801_s22 = inlined_call_operand.vmem [shape: f32[4,1,64], index: 22, kind: input, shape index: {}]   ;;  %s7802_s23 = inlined_call_operand.vmem [shape: f32[64,32], index: 23, kind: input, shape index: {}]   ;;  %s7803_s24 = inlined_call_operand.vmem [shape: f32[1,32], index: 24, kind: input, shape index: {}]   ;;  %s7804_s25 = inlined_call_operand.vmem [shape: f32[256,8], index: 25, kind: input, shape index: {}]   ;;  %s7805_s26 = inlined_call_operand.vmem [shape: f32[1,8], index: 26, kind: input, shape index: {}]   ;;  %s7806_s27 = inlined_call_operand.vmem [shape: f32[1,8], index: 27, kind: input, shape index: {}]   ;;  %s7807_s28 = inlined_call_operand.vmem [shape: f32[8,1], index: 28, kind: output, shape index: {}]  }
   0x1   :  { %7821 = sst [smem:[#allocation29_spill]] %s7779_s0 }
   0x2   :  { %7822 = sst [smem:[#allocation30_spill]] %s7780_s1 }
   0x3   :  { %7823 = sst [smem:[#allocation31_spill]] %s7781_s2 }
   0x4   :  { %7824 = sst [smem:[#allocation32_spill]] %s7782_s3 }
   0x5   :  { %7825 = sst [smem:[#allocation33_spill]] %s7783_s4 }
   0x6   :  { %7826 = sst [smem:[#allocation34_spill]] %s7784_s5 }
   0x7   :  { %7827 = sst [smem:[#allocation35_spill]] %s7785_s6 }
   0x8   :  { %7828 = sst [smem:[#allocation36_spill]] %s7786_s7 }
   0x9   :  { %7829 = sst [smem:[#allocation37_spill]] %s7787_s8 }
   0xa   :  { %7830 = sst [smem:[#allocation38_spill]] %s7788_s9 }
   0xb   :  { %7831 = sst [smem:[#allocation39_spill]] %s7789_s10 }
   0xc   :  { %7832 = sst [smem:[#allocation40_spill]] %s7790_s11 }
   0xd   :  { %7833 = sst [smem:[#allocation41_spill]] %s7791_s12 }
   0xe   :  { %7834 = sst [smem:[#allocation42_spill]] %s7807_s28 }
   0xf   :  { %33 = vsyncpa [#allocation3], 0 }
  0x10   :  { %34 = vsyncpa [#allocation5], 0 }
  0x11   :  { %35 = vsyncpa [#allocation8], 0 }
  0x12   :  { %36 = vsyncpa [#allocation11], 0 }
  0x13   :  { %37 = vsyncpa [#allocation14], 0 }
  0x14   :  { %38 = vsyncpa [#allocation17], 0 }
  0x15   :  { %39 = vsyncpa [#allocation20], 0  ;;  %s6084_s8 = smov [#allocation4]   ;;  %s6085_s9 = smov [#allocation7]  }
  0x16   :  { %s60_s5 = sshll.u32 %s6084_s8, 4  ;;  %s86_s30 = sshll.u32 %s6085_s9, 4  ;;  %s61_s5 = int_to_ptr.vmem [resolvable:$true] %s60_s5  ;;  %s87_s30 = int_to_ptr.vmem [resolvable:$true] %s86_s30 }
  0x17   :  { %s7835_s10 = sld [smem:[#allocation31_spill]] }
  0x1d   :  { %s5784_s0 = scalar_lea.hbm %s7835_s10, 48 }
  0x1e   :  { %p5785_p0 = scmp.ne.s32.totalorder %s7835_s10, %s5784_s0  ;;  %p5788_p1 = scmp.lt.u32.totalorder %s5784_s0, %s7835_s10 }
  0x20   :  { %p5790_p2 = pnand %p5788_p1, %p5785_p0 }
  0x22   :  { %5793 = shalt.err (!%p5790_p2)
}
  0x23   :  { %s5794_s12 = scalar_lea.vmem %s61_s5, 48  ;;  %s5798_s1 = scalar_lea.vmem %s61_s5, 64 }
  0x24   :  { %p5795_p3 = scmp.ne.s32.totalorder %s61_s5, %s5794_s12  ;;  %p5799_p4 = scmp.lt.s32.totalorder %s61_s5, %s61_s5 }
  0x25   :  { %p5800_p5 = scmp.lt.s32.totalorder %s5798_s1, %s5794_s12 }
  0x27   :  { %p5801_p6 = por %p5800_p5, %p5799_p4 }
  0x29   :  { %p5802_p7 = pnand %p5801_p6, %p5795_p3 }
  0x2b   :  { %5805 = shalt.err (!%p5802_p7)
}
  0x2c   :  { %63 = dma.hbm_to_vmem [thread:$0]  %s7835_s10, 48, %s61_s5, [#allocation5]  }
  0x2d   :  { %s7836_s6 = sld [smem:[#allocation35_spill]] }
  0x33   :  { %s5806_s11 = scalar_lea.hbm %s7836_s6, 16 }
  0x34   :  { %p5807_p8 = scmp.ne.s32.totalorder %s7836_s6, %s5806_s11  ;;  %p5810_p9 = scmp.lt.u32.totalorder %s5806_s11, %s7836_s6 }
  0x36   :  { %p5812_p10 = pnand %p5810_p9, %p5807_p8 }
  0x38   :  { %5815 = shalt.err (!%p5812_p10)
}
  0x39   :  { %s5816_s12 = scalar_lea.vmem %s87_s30, 16  ;;  %s5820_s1 = scalar_lea.vmem %s87_s30, 32 }
  0x3a   :  { %p5817_p11 = scmp.ne.s32.totalorder %s87_s30, %s5816_s12  ;;  %p5821_p12 = scmp.lt.s32.totalorder %s87_s30, %s87_s30 }
  0x3b   :  { %p5822_p13 = scmp.lt.s32.totalorder %s5820_s1, %s5816_s12 }
  0x3d   :  { %p5823_p0 = por %p5822_p13, %p5821_p12 }
  0x3f   :  { %p5824_p1 = pnand %p5823_p0, %p5817_p11 }
  0x41   :  { %5827 = shalt.err (!%p5824_p1)
}
  0x42   :  { %89 = dma.hbm_to_vmem [thread:$0]  %s7836_s6, 16, %s87_s30, [#allocation8]  }
  0x43   :  { %s6086_s4 = smov [#allocation10]   ;;  %s6087_s9 = smov [#allocation13]  }
  0x44   :  { %s108_s8 = sshll.u32 %s6086_s4, 4  ;;  %s130_s3 = sshll.u32 %s6087_s9, 4  ;;  %s109_s8 = int_to_ptr.vmem [resolvable:$true] %s108_s8  ;;  %s131_s3 = int_to_ptr.vmem [resolvable:$true] %s130_s3 }
  0x45   :  { %s7837_s0 = sld [smem:[#allocation37_spill]] }
  0x4b   :  { %s5828_s2 = scalar_lea.hbm %s7837_s0, 16 }
  0x4c   :  { %p5829_p2 = scmp.ne.s32.totalorder %s7837_s0, %s5828_s2  ;;  %p5832_p3 = scmp.lt.u32.totalorder %s5828_s2, %s7837_s0 }
  0x4e   :  { %p5834_p4 = pnand %p5832_p3, %p5829_p2 }
  0x50   :  { %5837 = shalt.err (!%p5834_p4)
}
  0x51   :  { %s5838_s30 = scalar_lea.vmem %s109_s8, 16  ;;  %s5842_s6 = scalar_lea.vmem %s109_s8, 32 }
  0x52   :  { %p5839_p5 = scmp.ne.s32.totalorder %s109_s8, %s5838_s30  ;;  %p5843_p6 = scmp.lt.s32.totalorder %s109_s8, %s109_s8 }
  0x53   :  { %p5844_p7 = scmp.lt.s32.totalorder %s5842_s6, %s5838_s30 }
  0x55   :  { %p5845_p8 = por %p5844_p7, %p5843_p6 }
  0x57   :  { %p5846_p9 = pnand %p5845_p8, %p5839_p5 }
  0x59   :  { %5849 = shalt.err (!%p5846_p9)
}
  0x5a   :  { %111 = dma.hbm_to_vmem [thread:$0]  %s7837_s0, 16, %s109_s8, [#allocation11]  }
  0x5b   :  { %s7838_s9 = sld [smem:[#allocation39_spill]] }
  0x61   :  { %s5850_s11 = scalar_lea.hbm %s7838_s9, 16 }
  0x62   :  { %p5851_p10 = scmp.ne.s32.totalorder %s7838_s9, %s5850_s11  ;;  %p5854_p11 = scmp.lt.u32.totalorder %s5850_s11, %s7838_s9 }
  0x64   :  { %p5856_p12 = pnand %p5854_p11, %p5851_p10 }
  0x66   :  { %5859 = shalt.err (!%p5856_p12)
}
  0x67   :  { %s5860_s1 = scalar_lea.vmem %s131_s3, 16  ;;  %s5864_s30 = scalar_lea.vmem %s131_s3, 32 }
  0x68   :  { %p5861_p13 = scmp.ne.s32.totalorder %s131_s3, %s5860_s1  ;;  %p5865_p0 = scmp.lt.s32.totalorder %s131_s3, %s131_s3 }
  0x69   :  { %p5866_p1 = scmp.lt.s32.totalorder %s5864_s30, %s5860_s1 }
  0x6b   :  { %p5867_p2 = por %p5866_p1, %p5865_p0 }
  0x6d   :  { %p5868_p3 = pnand %p5867_p2, %p5861_p13 }
  0x6f   :  { %5871 = shalt.err (!%p5868_p3)
}
  0x70   :  { %133 = dma.hbm_to_vmem [thread:$0]  %s7838_s9, 16, %s131_s3, [#allocation14]  }
  0x71   :  { %s6088_s6 = smov [#allocation16]   ;;  %s5872_s4 = scalar_lea.hbm %s7794_s15, 64 }
  0x72   :  { %s157_s5 = sshll.u32 %s6088_s6, 4  ;;  %p5873_p4 = scmp.ne.s32.totalorder %s7794_s15, %s5872_s4  ;;  %s158_s5 = int_to_ptr.vmem [resolvable:$true] %s157_s5 }
  0x73   :  { %p5876_p5 = scmp.lt.u32.totalorder %s5872_s4, %s7794_s15 }
  0x75   :  { %p5878_p6 = pnand %p5876_p5, %p5873_p4 }
  0x77   :  { %5881 = shalt.err (!%p5878_p6)
}
  0x78   :  { %s5882_s12 = scalar_lea.vmem %s158_s5, 64  ;;  %p5887_p8 = scmp.lt.s32.totalorder %s158_s5, %s158_s5 }
  0x79   :  { %p5883_p7 = scmp.ne.s32.totalorder %s158_s5, %s5882_s12  ;;  %p5888_p9 = scmp.lt.s32.totalorder %s5882_s12, %s5882_s12 }
  0x7b   :  { %p5889_p10 = por %p5888_p9, %p5887_p8 }
  0x7d   :  { %p5890_p11 = pnand %p5889_p10, %p5883_p7 }
  0x7f   :  { %5893 = shalt.err (!%p5890_p11)
}
  0x80   :  { %s6089_s3 = smov 16   ;;  %s7819_s9 = smov 1  }
  0x81   :  { %163 = dma.hbm_to_vmem [thread:$0]  %s7794_s15, 64, %s158_s5, [#allocation17], %s6089_s3, %s6089_s3, %s7819_s9  }
  0x82   :  { %s6091_s8 = smov [#allocation19]   ;;  %s6092_s6 = smov [#allocation2]  }
  0x83   :  { %s187_s0 = sshll.u32 %s6091_s8, 4  ;;  %s47_s10 = sshll.u32 %s6092_s6, 4  ;;  %s188_s0 = int_to_ptr.vmem [resolvable:$true] %s187_s0  ;;  %s48_s10 = int_to_ptr.vmem [resolvable:$true] %s47_s10 }
  0x84   :  { %s5894_s11 = scalar_lea.hbm %s7799_s20, 64 }
  0x85   :  { %p5895_p12 = scmp.ne.s32.totalorder %s7799_s20, %s5894_s11  ;;  %p5898_p13 = scmp.lt.u32.totalorder %s5894_s11, %s7799_s20 }
  0x87   :  { %p5900_p0 = pnand %p5898_p13, %p5895_p12 }
  0x89   :  { %5903 = shalt.err (!%p5900_p0)
}
  0x8a   :  { %s5904_s15 = scalar_lea.vmem %s188_s0, 64  ;;  %p5909_p2 = scmp.lt.s32.totalorder %s188_s0, %s188_s0 }
  0x8b   :  { %p5905_p1 = scmp.ne.s32.totalorder %s188_s0, %s5904_s15  ;;  %p5910_p3 = scmp.lt.s32.totalorder %s5904_s15, %s5904_s15 }
  0x8d   :  { %p5911_p4 = por %p5910_p3, %p5909_p2 }
  0x8f   :  { %p5912_p5 = pnand %p5911_p4, %p5905_p1 }
  0x91   :  { %5915 = shalt.err (!%p5912_p5)
}
  0x92   :  { %193 = dma.hbm_to_vmem [thread:$0]  %s7799_s20, 64, %s188_s0, [#allocation20], %s6089_s3, %s6089_s3, %s7819_s9  }
  0x93   :  { %s7839_s6 = sld [smem:[#allocation30_spill]] }
  0x99   :  { %s5916_s28 = scalar_lea.hbm %s7839_s6, 2304 }
  0x9a   :  { %p5917_p6 = scmp.ne.s32.totalorder %s7839_s6, %s5916_s28  ;;  %p5920_p7 = scmp.lt.u32.totalorder %s5916_s28, %s7839_s6 }
  0x9c   :  { %p5922_p8 = pnand %p5920_p7, %p5917_p6 }
  0x9e   :  { %5925 = shalt.err (!%p5922_p8)
}
  0x9f   :  { %s5926_s7 = scalar_lea.vmem %s48_s10, 2304  ;;  %p5931_p10 = scmp.lt.s32.totalorder %s48_s10, %s48_s10 }
  0xa0   :  { %p5927_p9 = scmp.ne.s32.totalorder %s48_s10, %s5926_s7  ;;  %p5932_p11 = scmp.lt.s32.totalorder %s5926_s7, %s5926_s7 }
  0xa2   :  { %p5933_p12 = por %p5932_p11, %p5931_p10 }
  0xa4   :  { %p5934_p13 = pnand %p5933_p12, %p5927_p9 }
  0xa6   :  { %5937 = shalt.err (!%p5934_p13)
}
  0xa7   :  { %s6093_s20 = smov 384   ;;  %s6094_s0 = smov 24  }
  0xa8   :  { %53 = dma.hbm_to_vmem [thread:$0]  %s7839_s6, 2304, %s48_s10, [#allocation3], %s6093_s20, %s6093_s20, %s6094_s0  }
  0xa9   :  { %s6095_s5 = smov [#allocation6]   ;;  %s7840_s28 = sld [smem:[#allocation34_spill]] }
  0xaa   :  { %s73_s1 = sshll.u32 %s6095_s5, 4  ;;  %s74_s1 = int_to_ptr.vmem [resolvable:$true] %s73_s1 }
  0xaf   :  { %s5938_s4 = scalar_lea.hbm %s7840_s28, 1536 }
  0xb0   :  { %p5939_p0 = scmp.ne.s32.totalorder %s7840_s28, %s5938_s4  ;;  %p5942_p1 = scmp.lt.u32.totalorder %s5938_s4, %s7840_s28 }
  0xb2   :  { %p5944_p2 = pnand %p5942_p1, %p5939_p0 }
  0xb4   :  { %5947 = shalt.err (!%p5944_p2)
}
  0xb5   :  { %s5948_s9 = scalar_lea.vmem %s74_s1, 1536  ;;  %p5953_p4 = scmp.lt.s32.totalorder %s74_s1, %s74_s1 }
  0xb6   :  { %p5949_p3 = scmp.ne.s32.totalorder %s74_s1, %s5948_s9  ;;  %p5954_p5 = scmp.lt.s32.totalorder %s5948_s9, %s5948_s9 }
  0xb8   :  { %p5955_p6 = por %p5954_p5, %p5953_p4 }
  0xba   :  { %p5956_p7 = pnand %p5955_p6, %p5949_p3 }
  0xbc   :  { %5959 = shalt.err (!%p5956_p7)
}
  0xbd   :  { %s6096_s10 = smov 256   ;;  %s6097_s0 = smov [#allocation9]  }
  0xbe   :  { %79 = dma.hbm_to_vmem [thread:$0]  %s7840_s28, 1536, %s74_s1, [#allocation5], %s6096_s10, %s6096_s10, %s6089_s3  }
  0xbf   :  { %s95_s12 = sshll.u32 %s6097_s0, 4  ;;  %s6098_s15 = smov [#allocation12]   ;;  %s96_s12 = int_to_ptr.vmem [resolvable:$true] %s95_s12 }
  0xc0   :  { %s117_s5 = sshll.u32 %s6098_s15, 4  ;;  %s7841_s4 = sld [smem:[#allocation36_spill]]  ;;  %s118_s5 = int_to_ptr.vmem [resolvable:$true] %s117_s5 }
  0xc6   :  { %s5960_s11 = scalar_lea.hbm %s7841_s4, 2048 }
  0xc7   :  { %p5961_p8 = scmp.ne.s32.totalorder %s7841_s4, %s5960_s11  ;;  %p5964_p9 = scmp.lt.u32.totalorder %s5960_s11, %s7841_s4 }
  0xc9   :  { %p5966_p10 = pnand %p5964_p9, %p5961_p8 }
  0xcb   :  { %5969 = shalt.err (!%p5966_p10)
}
  0xcc   :  { %s5970_s1 = scalar_lea.vmem %s96_s12, 2048  ;;  %p5975_p12 = scmp.lt.s32.totalorder %s96_s12, %s96_s12 }
  0xcd   :  { %p5971_p11 = scmp.ne.s32.totalorder %s96_s12, %s5970_s1  ;;  %p5976_p13 = scmp.lt.s32.totalorder %s5970_s1, %s5970_s1 }
  0xcf   :  { %p5977_p0 = por %p5976_p13, %p5975_p12 }
  0xd1   :  { %p5978_p1 = pnand %p5977_p0, %p5971_p11 }
  0xd3   :  { %5981 = shalt.err (!%p5978_p1)
}
  0xd4   :  { %101 = dma.hbm_to_vmem [thread:$0]  %s7841_s4, 2048, %s96_s12, [#allocation8], %s6096_s10, %s6096_s10, %s6089_s3  }
  0xd5   :  { %s7842_s15 = sld [smem:[#allocation38_spill]] }
  0xdb   :  { %s5982_s30 = scalar_lea.hbm %s7842_s15, 1024 }
  0xdc   :  { %p5983_p2 = scmp.ne.s32.totalorder %s7842_s15, %s5982_s30  ;;  %p5986_p3 = scmp.lt.u32.totalorder %s5982_s30, %s7842_s15 }
  0xde   :  { %p5988_p4 = pnand %p5986_p3, %p5983_p2 }
  0xe0   :  { %5991 = shalt.err (!%p5988_p4)
}
  0xe1   :  { %s5992_s2 = scalar_lea.vmem %s118_s5, 1024  ;;  %p5997_p6 = scmp.lt.s32.totalorder %s118_s5, %s118_s5 }
  0xe2   :  { %p5993_p5 = scmp.ne.s32.totalorder %s118_s5, %s5992_s2  ;;  %p5998_p7 = scmp.lt.s32.totalorder %s5992_s2, %s5992_s2 }
  0xe4   :  { %p5999_p8 = por %p5998_p7, %p5997_p6 }
  0xe6   :  { %p6000_p9 = pnand %p5999_p8, %p5993_p5 }
  0xe8   :  { %6003 = shalt.err (!%p6000_p9)
}
  0xe9   :  { %s6099_s10 = smov 128   ;;  %s6100_s12 = smov 8  }
  0xea   :  { %123 = dma.hbm_to_vmem [thread:$0]  %s7842_s15, 1024, %s118_s5, [#allocation11], %s6099_s10, %s6099_s10, %s6100_s12  }
  0xeb   :  { %s6101_s1 = smov [#allocation15]   ;;  %s7843_s0 = sld [smem:[#allocation41_spill]] }
  0xec   :  { %s141_s28 = sshll.u32 %s6101_s1, 4  ;;  %s142_s28 = int_to_ptr.vmem [resolvable:$true] %s141_s28 }
  0xf1   :  { %s6004_s30 = scalar_lea.hbm %s7843_s0, 128 }
  0xf2   :  { %p6005_p10 = scmp.ne.s32.totalorder %s7843_s0, %s6004_s30  ;;  %p6008_p11 = scmp.lt.u32.totalorder %s6004_s30, %s7843_s0 }
  0xf4   :  { %p6010_p12 = pnand %p6008_p11, %p6005_p10 }
  0xf6   :  { %6013 = shalt.err (!%p6010_p12)
}
  0xf7   :  { %s6014_s2 = scalar_lea.vmem %s142_s28, 128  ;;  %p6019_p0 = scmp.lt.s32.totalorder %s142_s28, %s142_s28 }
  0xf8   :  { %p6015_p13 = scmp.ne.s32.totalorder %s142_s28, %s6014_s2  ;;  %p6020_p1 = scmp.lt.s32.totalorder %s6014_s2, %s6014_s2 }
  0xfa   :  { %p6021_p2 = por %p6020_p1, %p6019_p0 }
  0xfc   :  { %p6022_p3 = pnand %p6021_p2, %p6015_p13 }
  0xfe   :  { %6025 = shalt.err (!%p6022_p3)
}
  0xff   :  { %s6102_s5 = smov 32   ;;  %s6103_s15 = smov 2  }
 0x100   :  { %147 = dma.hbm_to_vmem [thread:$0]  %s7843_s0, 128, %s142_s28, [#allocation14], %s6102_s5, %s6102_s5, %s6103_s15  }
 0x101   :  { %s6104_s4 = smov [#allocation18]   ;;  %s6105_s1 = smov [#allocation21]  }
 0x102   :  { %s169_s7 = sshll.u32 %s6104_s4, 4  ;;  %s199_s6 = sshll.u32 %s6105_s1, 4  ;;  %s170_s7 = int_to_ptr.vmem [resolvable:$true] %s169_s7  ;;  %s6399_s6 = int_to_ptr.vmem [resolvable:$true] %s199_s6 }
 0x103   :  { %s6026_s8 = scalar_lea.hbm %s7795_s16, 64 }
 0x104   :  { %p6027_p4 = scmp.ne.s32.totalorder %s7795_s16, %s6026_s8  ;;  %p6030_p5 = scmp.lt.u32.totalorder %s6026_s8, %s7795_s16 }
 0x106   :  { %p6032_p6 = pnand %p6030_p5, %p6027_p4 }
 0x108   :  { %6035 = shalt.err (!%p6032_p6)
}
 0x109   :  { %s6036_s28 = scalar_lea.vmem %s170_s7, 64  ;;  %p6041_p8 = scmp.lt.s32.totalorder %s170_s7, %s170_s7 }
 0x10a   :  { %p6037_p7 = scmp.ne.s32.totalorder %s170_s7, %s6036_s28  ;;  %p6042_p9 = scmp.lt.s32.totalorder %s6036_s28, %s6036_s28 }
 0x10c   :  { %p6043_p10 = por %p6042_p9, %p6041_p8 }
 0x10e   :  { %p6044_p11 = pnand %p6043_p10, %p6037_p7 }
 0x110   :  { %6047 = shalt.err (!%p6044_p11)
}
 0x111   :  { %s7844_s0 = smov 1   ;;  %s6048_s1 = scalar_lea.hbm %s7800_s21, 64 }
 0x112   :  { %175 = dma.hbm_to_vmem [thread:$0]  %s7795_s16, 64, %s170_s7, [#allocation17], %s6089_s3, %s6089_s3, %s7844_s0  }
 0x113   :  { %p6049_p12 = scmp.ne.s32.totalorder %s7800_s21, %s6048_s1  ;;  %p6052_p13 = scmp.lt.u32.totalorder %s6048_s1, %s7800_s21 }
 0x115   :  { %p6054_p0 = pnand %p6052_p13, %p6049_p12 }
 0x117   :  { %6057 = shalt.err (!%p6054_p0)
}
 0x118   :  { %s6058_s29 = scalar_lea.vmem %s6399_s6, 64  ;;  %p6063_p2 = scmp.lt.s32.totalorder %s6399_s6, %s6399_s6 }
 0x119   :  { %p6059_p1 = scmp.ne.s32.totalorder %s6399_s6, %s6058_s29  ;;  %p6064_p3 = scmp.lt.s32.totalorder %s6058_s29, %s6058_s29 }
 0x11b   :  { %p6065_p4 = por %p6064_p3, %p6063_p2 }
 0x11d   :  { %p6066_p5 = pnand %p6065_p4, %p6059_p1 }
 0x11f   :  { %6069 = shalt.err (!%p6066_p5)
}
 0x120   :  { %205 = dma.hbm_to_vmem [thread:$0]  %s7800_s21, 64, %s6399_s6, [#allocation20], %s6089_s3, %s6089_s3, %s7844_s0  }
 0x121   :  { %6070 = dma.done.wait [#allocation3], 2304  }
 0x122   :  { %6071 = vsyncadd [#allocation3], 4294964992 }
 0x123   :  { %6072 = dma.done.wait [#allocation5], 1584  }
 0x124   :  { %6073 = vsyncadd [#allocation5], 4294965712 }
 0x125   :  { %6074 = dma.done.wait [#allocation8], 2064  }
 0x126   :  { %6075 = vsyncadd [#allocation8], 4294965232 }
 0x127   :  { %6076 = dma.done.wait [#allocation11], 1040  }
 0x128   :  { %6077 = vsyncadd [#allocation11], 4294966256 }
 0x129   :  { %6078 = dma.done.wait [#allocation14], 144  }
 0x12a   :  { %6079 = vsyncadd [#allocation14], 4294967152 }
 0x12b   :  { %6080 = dma.done.wait [#allocation17], 128  }
 0x12c   :  { %6081 = vsyncadd [#allocation17], 4294967168 }
 0x12d   :  { %6082 = dma.done.wait [#allocation20], 128  }
 0x12e   :  { %6083 = vsyncadd [#allocation20], 4294967168  ;;  %v6106_v0 = vmov 0.0|0.0   ;;  %v6107_v1 = vmov 0.0   ;;  %vm6108_vm0 = vmmov 0   ;;  %v259_v2 = vld [vmem:[#allocation2 + $0x8] sm:$0xff] }
 0x12f   :  { %5188 = vmatprep.subr.bf16.mxu1 %v6106_v0  ;;  %371 = vmatprep.mubr.f32.mxu0 %v6107_v1  ;;  %v262_v3 = vld [vmem:[#allocation2 + $0x20] sm:$0xff]  ;;  %v260_v4 = vld [vmem:[#allocation2 + $0x10] sm:$0xff]  ;;  %v263_v6 = vld [vmem:[#allocation2 + $0x28] sm:$0xff]  ;;  %vm297_vm1 = vcmask 1041408   ;;  %vm6109_vm2 = vmmov 1   ;;  %s7847_s6 = sld [smem:[#allocation32_spill]] }
 0x130   :  { %4613 = vmatprep.mubr.msk.f32.mxu1 %vm6108_vm0, %v6107_v1  ;;  %v5174_v5 = vpack.c.bf16 %v262_v3, %v259_v2  ;;  %v258_v7 = vld [vmem:[#allocation2] sm:$0xff]  ;;  %v261_v8 = vld [vmem:[#allocation2 + $0x18] sm:$0xff]  ;;  %v5189_v9 = vpack.c.bf16 %v263_v6, %v260_v4  ;;  %v268_v12 = vld [vmem:[#allocation2 + $0x50] sm:$0xff]  ;;  %s6110_s9 = smov 64   ;;  %s7848_s10 = sld [smem:[#allocation29_spill]]  ;;  %vm293_vm4 = vcmask 343040  }
 0x131   :  { %v5176_v10 = vpack.c.bf16 %v261_v8, %v258_v7  ;;  %v265_v11 = vld [vmem:[#allocation2 + $0x38] sm:$0xff]  ;;  %v266_v13 = vld [vmem:[#allocation2 + $0x40] sm:$0xff]  ;;  %v264_v16 = vld [vmem:[#allocation2 + $0x30] sm:$0xff]  ;;  %vm666_vm5 = vcmask 523264   ;;  %s7849_s2 = sld [smem:[#allocation40_spill]]  ;;  %s7850_s3 = sld [smem:[#allocation33_spill]] }
 0x132   :  { %5175 = vmatprep.subr.bf16.mxu0 %v5174_v5  ;;  %v5178_v14 = vpack.c.bf16 %v268_v12, %v265_v11  ;;  %v269_v15 = vld [vmem:[#allocation2 + $0x58] sm:$0xff]  ;;  %v267_v17 = vld [vmem:[#allocation2 + $0x48] sm:$0xff]  ;;  %5190 = vmatpush3.bf16.msra.mxu1 %v5189_v9  ;;  %v274_v21 = vld [vmem:[#allocation2 + $0x80] sm:$0x3]  ;;  %vm3675_vm6 = vcmask 261120   ;;  %vm4060_vm7 = vcmask 57344  }
 0x133   :  { %5177 = vmatpush1.bf16.msra.mxu0 %v5176_v10  ;;  %v5192_v18 = vpack.c.bf16 %v269_v15, %v266_v13  ;;  %v5180_v19 = vpack.c.bf16 %v267_v17, %v264_v16  ;;  %v271_v20 = vld [vmem:[#allocation2 + $0x68] sm:$0xff]  ;;  %v272_v22 = vld [vmem:[#allocation2 + $0x70] sm:$0xff]  ;;  %5191 = vmatprep.subr.bf16.mxu1 %v6106_v0  ;;  %v270_v25 = vld [vmem:[#allocation2 + $0x60] sm:$0xff]  ;;  %vm4079_vm8 = vcmask 64512   ;;  %vm4083_vm9 = vcmask 7168  }
 0x134   :  { %5179 = vmatprep.subr.bf16.mxu0 %v5178_v14  ;;  %v5182_v23 = vpack.c.bf16 %v274_v21, %v271_v20  ;;  %v275_v24 = vld [vmem:[#allocation2 + $0x88] sm:$0x3]  ;;  %v273_v26 = vld [vmem:[#allocation2 + $0x78] sm:$0x3]  ;;  %vm6442_vm3 = vmpackc.low %vm297_vm1, %vm6109_vm2 }
 0x135   :  { %v545_v28 = vld [vmem:[#allocation6 + $0x8] sm:$0xff]  ;;  %v547_v29 = vld [vmem:[#allocation6 + $0x18] sm:$0xff]  ;;  %v5195_v30 = vpack.c.bf16 %v275_v24, %v272_v22  ;;  %v5185_v31 = vpack.c.bf16 %v273_v26, %v270_v25  ;;  %v544_v33 = vld [vmem:[#allocation6] sm:$0xff] }
 0x136   :  { %5193 = vmatpush3.bf16.msra.mxu1 %v5192_v18  ;;  %v5222_v32 = vpack.c.bf16 %v547_v29, %v545_v28  ;;  %v546_v34 = vld [vmem:[#allocation6 + $0x10] sm:$0xff]  ;;  %v549_v35 = vld [vmem:[#allocation6 + $0x28] sm:$0xff]  ;;  %v551_v36 = vld [vmem:[#allocation6 + $0x38] sm:$0xff] }
 0x137   :  { %5181 = vmatpush1.bf16.msra.mxu0 %v5180_v19  ;;  %5194 = vmatprep.subr.bf16.mxu1 %v6106_v0  ;;  %v6449_v37 = vld [vmem:[#allocation7] ss:$0 sm:$0xff]  ;;  %v450_v38 = vld [vmem:[%s7847_s6] sm:$0xff]  ;;  %v451_v39 = vld [vmem:[%s7847_s6 + $0x8] sm:$0xff]  ;;  %v5224_v41 = vpack.c.bf16 %v546_v34, %v544_v33  ;;  %v5226_v42 = vpack.c.bf16 %v551_v36, %v549_v35  ;;  %v278_v36 = vlaneseq }
 0x138   :  { %5184 = vmatprep.subr.msk.bf16.mxu0 %vm6442_vm3, %v5182_v23  ;;  %642 = vrot.lane.b32.xlu0 %v6449_v37, %s6110_s9  ;;  %v257_v40 = vld [vmem:[%s7848_s10] sm:$0xff]  ;;  %v548_v43 = vld [vmem:[#allocation6 + $0x20] sm:$0xff]  ;;  %v5199_v46 = vpack.c.bf16 %v451_v39, %v450_v38  ;;  %v555_v47 = vld [vmem:[#allocation6 + $0x58] sm:$0x3] }
 0x139   :  { %v550_v44 = vld [vmem:[#allocation6 + $0x30] sm:$0xff]  ;;  %v553_v45 = vld [vmem:[#allocation6 + $0x48] sm:$0xff]  ;;  %v452_v48 = vld [vmem:[%s7847_s6 + $0x10] sm:$0xff]  ;;  %v6548_v38 = vshrl.u32 %v278_v36, 7 }
 0x13a   :  { %5197 = vmatpush3.bf16.msk.msra.mxu1 %vm6442_vm3, %v5195_v30  ;;  %v453_v49 = vld [vmem:[%s7847_s6 + $0x18] sm:$0xff]  ;;  %v5228_v50 = vpack.c.bf16 %v550_v44, %v548_v43  ;;  %v5230_v51 = vpack.c.bf16 %v555_v47, %v553_v45  ;;  %v554_v53 = vld [vmem:[#allocation6 + $0x50] sm:$0x3]  ;;  %v455_v56 = vld [vmem:[%s7847_s6 + $0x28] sm:$0xff] }
 0x13b   :  { %5187 = vmatpush1.bf16.msk.msra.mxu0 %vm6442_vm3, %v5185_v31  ;;  %5223 = vmatprep.subr.bf16.mxu1 %v5222_v32  ;;  %v552_v52 = vld [vmem:[#allocation6 + $0x40] sm:$0xff]  ;;  %v5202_v54 = vpack.c.bf16 %v453_v49, %v452_v48  ;;  %v454_v55 = vld [vmem:[%s7847_s6 + $0x20] sm:$0xff]  ;;  %v459_v63 = vld [vmem:[%s7847_s6 + $0x48] sm:$0xff]  ;;  %v6551_v39 = vsub.s32 0, %v6548_v38 }
 0x13c   :  { %5198 = vmatprep.subr.bf16.mxu0 %v6106_v0  ;;  %v5233_v57 = vpack.c.bf16 %v554_v53, %v552_v52  ;;  %v5205_v58 = vpack.c.bf16 %v455_v56, %v454_v55  ;;  %v456_v59 = vld [vmem:[%s7847_s6 + $0x30] sm:$0xff]  ;;  %v457_v60 = vld [vmem:[%s7847_s6 + $0x38] sm:$0xff]  ;;  %v458_v62 = vld [vmem:[%s7847_s6 + $0x40] sm:$0xff] }
 0x13d   :  { %4614 = vmatmul.mubr.msk.f32.vlgmr.msra.gmra.mrb[0].mxu1 %vm293_vm4, %v257_v40  ;;  %v5208_v61 = vpack.c.bf16 %v457_v60, %v456_v59  ;;  %v5211_v2 = vpack.c.bf16 %v459_v63, %v458_v62  ;;  %v460_v3 = vld [vmem:[%s7847_s6 + $0x50] sm:$0xff]  ;;  %v461_v4 = vld [vmem:[%s7847_s6 + $0x58] sm:$0xff]  ;;  %v462_v6 = vld [vmem:[%s7847_s6 + $0x60] sm:$0xff] }
 0x13e   :  { %4098 = vmatmul.mubr.msk.f32.vlgmr.msra.gmra.mrb[0].mxu0 %vm293_vm4, %v257_v40  ;;  %5225 = vmatpush1.bf16.msra.mxu1 %v5224_v41  ;;  %v5214_v5 = vpack.c.bf16 %v461_v4, %v460_v3  ;;  %v463_v7 = vld [vmem:[%s7847_s6 + $0x68] sm:$0xff]  ;;  %v464_v9 = vld [vmem:[%s7847_s6 + $0x70] sm:$0xff]  ;;  %v465_v10 = vld [vmem:[%s7847_s6 + $0x78] sm:$0xff] }
 0x13f   :  { %627 = vmatprep.mubr.f32.mxu1 %v6107_v1  ;;  %5227 = vmatprep.subr.bf16.mxu1 %v5226_v42  ;;  %v5217_v8 = vpack.c.bf16 %v463_v7, %v462_v6  ;;  %v650_v11 = vld [vmem:[#allocation9 + $0x8] sm:$0xff]  ;;  %v5220_v12 = vpack.c.bf16 %v465_v10, %v464_v9  ;;  %v652_v13 = vld [vmem:[#allocation9 + $0x18] sm:$0xff]  ;;  %v649_v14 = vld [vmem:[#allocation9] sm:$0xff] }
 0x140   :  { %5200 = vmatpush3.bf16.msra.mxu0 %v5199_v46  ;;  %4648 = vmatprep.mubr.msk.f32.mxu0 %vm6108_vm0, %v6107_v1  ;;  %v651_v15 = vld [vmem:[#allocation9 + $0x10] sm:$0xff]  ;;  %v5236_v16 = vpack.c.bf16 %v652_v13, %v650_v11  ;;  %v654_v18 = vld [vmem:[#allocation9 + $0x28] sm:$0xff]  ;;  %v656_v19 = vld [vmem:[#allocation9 + $0x38] sm:$0xff] }
 0x141   :  { %5201 = vmatprep.subr.bf16.mxu0 %v6106_v0  ;;  %v6527_v17 = vpack.c.bf16 %v651_v15, %v649_v14  ;;  %v6530_v20 = vpack.c.bf16 %v656_v19, %v654_v18  ;;  %v653_v21 = vld [vmem:[#allocation9 + $0x20] sm:$0xff]  ;;  %v655_v22 = vld [vmem:[#allocation9 + $0x30] sm:$0xff]  ;;  %v658_v24 = vld [vmem:[#allocation9 + $0x48] sm:$0xff] }
 0x142   :  { %5229 = vmatpush1.bf16.msra.mxu1 %v5228_v50  ;;  %v6532_v23 = vpack.c.bf16 %v655_v22, %v653_v21  ;;  %v660_v25 = vld [vmem:[#allocation9 + $0x58] sm:$0xff]  ;;  %v657_v27 = vld [vmem:[#allocation9 + $0x40] sm:$0xff]  ;;  %v659_v28 = vld [vmem:[#allocation9 + $0x50] sm:$0xff] }
 0x143   :  { %5232 = vmatprep.subr.msk.bf16.mxu1 %vm6442_vm3, %v5230_v51  ;;  %v6536_v26 = vpack.c.bf16 %v660_v25, %v658_v24  ;;  %v6538_v29 = vpack.c.bf16 %v659_v28, %v657_v27  ;;  %v662_v30 = vld [vmem:[#allocation9 + $0x68] sm:$0xff]  ;;  %v664_v31 = vld [vmem:[#allocation9 + $0x78] sm:$0xff]  ;;  %v661_v33 = vld [vmem:[#allocation9 + $0x60] sm:$0xff] }
 0x144   :  { %5203 = vmatpush3.bf16.msra.mxu0 %v5202_v54  ;;  %v6542_v32 = vpack.c.bf16 %v664_v31, %v662_v30  ;;  %v663_v34 = vld [vmem:[#allocation9 + $0x70] sm:$0xff]  ;;  %v6554_v41 = vld [vmem:[#allocation4] sm:$0x7]  ;;  %v6566_v54 = vld [vmem:[#allocation10] ss:$0 sm:$0xff] }
 0x145   :  { %5204 = vmatprep.subr.bf16.mxu0 %v6106_v0  ;;  %v6544_v35 = vpack.c.bf16 %v663_v34, %v661_v33  ;;  %v281_v43 = vrot.slane %v6554_v41, %v6551_v39  ;;  %911 = vrot.lane.b32.xlu1 %v6566_v54, %s6110_s9  ;;  %v924_v60 = vld [vmem:[#allocation12] sm:$0xff]  ;;  %v926_v63 = vld [vmem:[#allocation12 + $0x10] sm:$0xff] }
 0x146   :  { %5235 = vmatpush1.bf16.msk.msra.mxu1 %vm6442_vm3, %v5233_v57  ;;  %v928_v4 = vld [vmem:[#allocation12 + $0x20] sm:$0xff]  ;;  %v930_v7 = vld [vmem:[#allocation12 + $0x30] sm:$0xff] }
 0x147   :  { %5237 = vmatprep.subr.bf16.mxu1 %v5236_v16  ;;  %v1565_v34 = vld [vmem:[%s7849_s2 + $0x8] sm:$0xff] }
 0x148   :  { %5206 = vmatpush3.bf16.msra.mxu0 %v5205_v58 }
 0x149   :  { %5207 = vmatprep.subr.bf16.mxu0 %v6106_v0  ;;  %4104 = vmatmul.mubr.msk.f32.vlgmr.msra.gmra.mrb[2].mxu1 %vm293_vm4, %v257_v40  ;;  %v288_v40 = vsub.s32 2, %v6548_v38 }
 0x14a   :  { %734 = vmatprep.mubr.f32.mxu1 %v6107_v1  ;;  %5239 = vmatpush1.bf16.msra.mxu1 %v6527_v17 }
 0x14b   :  { %5241 = vmatprep.subr.bf16.mxu1 %v6530_v20  ;;  %v289_v42 = vrot.slane %v6554_v41, %v288_v40 }
 0x14c   :  { %5209 = vmatpush3.bf16.msra.mxu0 %v5208_v61  ;;  %v925_v61 = vld [vmem:[#allocation12 + $0x8] sm:$0xff] }
 0x14d   :  { %5210 = vmatprep.subr.bf16.mxu0 %v6106_v0 }
 0x14e   :  { %5243 = vmatpush1.bf16.msra.mxu1 %v6532_v23 }
 0x14f   :  { %5245 = vmatprep.subr.bf16.mxu1 %v6536_v26 }
 0x150   :  { %5212 = vmatpush3.bf16.msra.mxu0 %v5211_v2  ;;  %v927_v2 = vld [vmem:[#allocation12 + $0x18] sm:$0xff] }
 0x151   :  { %5213 = vmatprep.subr.bf16.mxu0 %v6106_v0  ;;  %v6592_v3 = vpack.c.bf16 %v927_v2, %v926_v63  ;;  %v1577_v63 = vld [vmem:[%s7849_s2 + $0x68] sm:$0xff]  ;;  %v1579_v2 = vld [vmem:[%s7849_s2 + $0x78] sm:$0xff] }
 0x152   :  { %5247 = vmatpush1.bf16.msra.mxu1 %v6538_v29 }
 0x153   :  { %5249 = vmatprep.subr.bf16.mxu1 %v6542_v32 }
 0x154   :  { %5215 = vmatpush3.bf16.msra.mxu0 %v5214_v5  ;;  %v929_v5 = vld [vmem:[#allocation12 + $0x28] sm:$0xff] }
 0x155   :  { %5216 = vmatprep.subr.bf16.mxu0 %v6106_v0  ;;  %v6598_v6 = vpack.c.bf16 %v929_v5, %v928_v4 }
 0x156   :  { %5251 = vmatpush1.bf16.msra.mxu1 %v6544_v35 }
 0x157   :  { %5253 = vmatprep.subr.bf16.mxu1 %v5236_v16 }
 0x158   :  { %5218 = vmatpush3.bf16.msra.mxu0 %v5217_v8  ;;  %v931_v8 = vld [vmem:[#allocation12 + $0x38] sm:$0xff] }
 0x159   :  { %5219 = vmatprep.subr.bf16.mxu0 %v6106_v0  ;;  %v6604_v9 = vpack.c.bf16 %v931_v8, %v930_v7  ;;  %v6726_v7 = vsub.s32 1, %v6548_v38  ;;  %v5380_v8 = vpack.c.bf16 %v1579_v2, %v1577_v63 }
 0x15c   :  { %5221 = vmatpush3.bf16.msra.mxu0 %v5220_v12 }
 0x15d   :  { %5269 = vmatprep.subr.bf16.mxu0 %v5236_v16 }
 0x1aa   :  { %v643_v50 = vpop.permute.xlu0 %642 }
 0x1b7   :  { %v912_v19 = vpop.permute.xlu1 %911 }
 0x210   :  { %v444_v44 = vpop.f32.mrb[0].mxu1 }
 0x211   :  { %v373_v45 = vpop.f32.mrb[0].mxu0  ;;  %v6559_v46 = vadd.f32 %v444_v44, %v289_v42  ;;  %v4615_v48 = vpop.f32.mrb[1].mxu1  ;;  %v1566_v44 = vld [vmem:[%s7849_s2 + $0x10] sm:$0xff] }
 0x212   :  { %v374_v47 = vadd.f32 %v373_v45, %v281_v43  ;;  %v6568_v55 = vpop.f32.mrb[1].mxu0  ;;  %v1564_v43 = vld [vmem:[%s7849_s2] sm:$0xff]  ;;  %v1569_v45 = vld [vmem:[%s7849_s2 + $0x28] sm:$0xff] }
 0x214   :  { %v448_v49 = vmax.f32 %v374_v47, 0.0  ;;  %v1571_v47 = vld [vmem:[%s7849_s2 + $0x38] sm:$0xff] }
 0x216   :  { %4649 = vmatmul.mubr.f32.vlgmr.msra.gmra.mrb[2].mxu0 %v448_v49  ;;  %v5370_v49 = vpack.c.bf16 %v1566_v44, %v1564_v43  ;;  %v4130_v44 = vld [vmem:[%s7849_s2 + $0xc8] sm:$0xff] }
 0x217   :  { %5271 = vmatpush1.bf16.msra.mxu0 %v6527_v17  ;;  %884 = vmatprep.mubr.f32.mxu0 %v6107_v1 }
 0x218   :  { %5273 = vmatprep.subr.bf16.mxu0 %v6530_v20 }
 0x21b   :  { %5275 = vmatpush1.bf16.msra.mxu0 %v6532_v23 }
 0x21c   :  { %5277 = vmatprep.subr.bf16.mxu0 %v6536_v26  ;;  %v629_v51 = vpop.f32.mrb[2].mxu1 }
 0x21d   :  { %v645_v52 = vadd.f32 %v643_v50, %v629_v51  ;;  %v631_v53 = vpop.f32.mrb[3].mxu1  ;;  %v647_v58 = vadd.f32 %v6449_v37, %v629_v51  ;;  %v5372_v51 = vpack.c.bf16 %v1571_v47, %v1569_v45  ;;  %v4132_v45 = vld [vmem:[%s7849_s2 + $0xd8] sm:$0xff]  ;;  %v4129_v47 = vld [vmem:[%s7849_s2 + $0xc0] sm:$0xff] }
 0x21e   :  { %v640_v56 = vadd.f32 %v6449_v37, %v631_v53  ;;  %v6582_v37 = vpack.c.bf16 %v925_v61, %v924_v60  ;;  %v1570_v53 = vld [vmem:[%s7849_s2 + $0x30] sm:$0xff]  ;;  %v1572_v61 = vld [vmem:[%s7849_s2 + $0x40] sm:$0xff] }
 0x21f   :  { %5279 = vmatpush1.bf16.msra.mxu0 %v6538_v29  ;;  %v646_v57 = vmax.f32 %v645_v52, 0.0  ;;  %v648_v62 = vmax.f32 %v647_v58, 0.0  ;;  %v1568_v52 = vld [vmem:[%s7849_s2 + $0x20] sm:$0xff] }
 0x220   :  { %5281 = vmatprep.subr.bf16.mxu0 %v6542_v32  ;;  %v641_v59 = vmax.f32 %v640_v56, 0.0  ;;  %v1573_v56 = vld [vmem:[%s7849_s2 + $0x48] sm:$0xff] }
 0x221   :  { %742 = vrot.lane.b32.xlu0 %v646_v57, %s6110_s9  ;;  %v1575_v57 = vld [vmem:[%s7849_s2 + $0x58] sm:$0xff] }
 0x222   :  { %4106 = vmatmul.mubr.msk.f32.vlgmr.msra.gmra.mrb[4].mxu1 %vm666_vm5, %v641_v59  ;;  %v5374_v59 = vpack.c.bf16 %v1570_v53, %v1568_v52  ;;  %v5376_v60 = vpack.c.bf16 %v1575_v57, %v1573_v56  ;;  %v4133_v56 = vld [vmem:[%s7849_s2 + $0xe0] sm:$0xff]  ;;  %v4135_v57 = vld [vmem:[%s7849_s2 + $0xf0] sm:$0xff] }
 0x223   :  { %5283 = vmatpush1.bf16.msra.mxu0 %v6544_v35  ;;  %5255 = vmatpush1.bf16.msra.mxu1 %v6527_v17 }
 0x224   :  { %810 = vmatprep.mubr.f32.mxu1 %v6107_v1  ;;  %5257 = vmatprep.subr.bf16.mxu1 %v6530_v20 }
 0x225   :  { %5296 = vmatprep.subr.bf16.mxu0 %v6106_v0 }
 0x226   :  { %4108 = vmatmul.mubr.msk.f32.vlgmr.msra.gmra.mrb[4].mxu0 %vm666_vm5, %v648_v62  ;;  %v1574_v62 = vld [vmem:[%s7849_s2 + $0x50] sm:$0xff] }
 0x227   :  { %5298 = vmatpush3.bf16.msra.mxu0 %v6582_v37  ;;  %4686 = vmatprep.mubr.msk.f32.mxu0 %vm6108_vm0, %v6107_v1  ;;  %v5378_v5 = vpack.c.bf16 %v1574_v62, %v1572_v61 }
 0x228   :  { %5259 = vmatpush1.bf16.msra.mxu1 %v6532_v23  ;;  %5299 = vmatprep.subr.bf16.mxu0 %v6106_v0 }
 0x229   :  { %5261 = vmatprep.subr.bf16.mxu1 %v6536_v26 }
 0x22b   :  { %5301 = vmatpush3.bf16.msra.mxu0 %v6592_v3 }
 0x22c   :  { %5263 = vmatpush1.bf16.msra.mxu1 %v6538_v29  ;;  %5302 = vmatprep.subr.bf16.mxu0 %v6106_v0 }
 0x22d   :  { %5265 = vmatprep.subr.bf16.mxu1 %v6542_v32 }
 0x22f   :  { %5304 = vmatpush3.bf16.msra.mxu0 %v6598_v6 }
 0x230   :  { %5267 = vmatpush1.bf16.msra.mxu1 %v6544_v35  ;;  %5305 = vmatprep.subr.bf16.mxu0 %v6106_v0  ;;  %v1567_v35 = vld [vmem:[%s7849_s2 + $0x18] sm:$0xff] }
 0x231   :  { %5284 = vmatprep.subr.bf16.mxu1 %v6106_v0  ;;  %v5368_v42 = vpack.c.bf16 %v1567_v35, %v1565_v34  ;;  %v4128_v34 = vld [vmem:[%s7849_s2 + $0xb8] sm:$0xff] }
 0x233   :  { %5307 = vmatpush3.bf16.msra.mxu0 %v6604_v9 }
 0x234   :  { %5320 = vmatprep.subr.bf16.mxu0 %v6106_v0 }
 0x293   :  { %v743_v10 = vpop.permute.xlu0 %742 }
 0x294   :  { %4107 = vmatmul.mubr.msk.f32.vlgmr.msra.gmra.mrb[6].mxu1 %vm666_vm5, %v743_v10  ;;  %v1576_v10 = vld [vmem:[%s7849_s2 + $0x60] sm:$0xff] }
 0x295   :  { %5286 = vmatpush3.bf16.msra.mxu1 %v6582_v37  ;;  %4667 = vmatprep.mubr.msk.f32.mxu1 %vm6108_vm0, %v6107_v1 }
 0x296   :  { %5287 = vmatprep.subr.bf16.mxu1 %v6106_v0 }
 0x299   :  { %5289 = vmatpush3.bf16.msra.mxu1 %v6592_v3 }
 0x29a   :  { %5290 = vmatprep.subr.bf16.mxu1 %v6106_v0 }
 0x29d   :  { %5292 = vmatpush3.bf16.msra.mxu1 %v6598_v6 }
 0x29e   :  { %5293 = vmatprep.subr.bf16.mxu1 %v6106_v0 }
 0x2a1   :  { %5295 = vmatpush3.bf16.msra.mxu1 %v6604_v9 }
 0x2a2   :  { %5308 = vmatprep.subr.bf16.mxu1 %v6106_v0 }
 0x2e9   :  { %v6619_v11 = vpop.f32.mrb[2].mxu0 }
 0x2ea   :  { %v4650_v12 = vpop.f32.mrb[3].mxu0 }
 0x2eb   :  { %v1578_v12 = vld [vmem:[%s7849_s2 + $0x70] sm:$0xff] }
 0x2ec   :  { %v5382_v38 = vpack.c.bf16 %v1578_v12, %v1576_v10 }
 0x2f5   :  { %v6621_v13 = vpop.f32.mrb[4].mxu1 }
 0x2f6   :  { %v738_v14 = vpop.f32.mrb[5].mxu1 }
 0x2f7   :  { %v907_v15 = vadd.f32 %v6566_v54, %v738_v14 }
 0x2f9   :  { %v6624_v16 = vpop.f32.mrb[4].mxu0  ;;  %v908_v17 = vmax.f32 %v907_v15, 0.0 }
 0x2fa   :  { %v888_v18 = vpop.f32.mrb[5].mxu0 }
 0x2fb   :  { %897 = vrot.lane.b32.xlu0 %v888_v18, %s6110_s9  ;;  %4668 = vmatmul.mubr.msk.f32.vlgmr.msra.gmra.mrb[8].mxu1 %vm666_vm5, %v908_v17 }
 0x2fc   :  { %5310 = vmatpush3.bf16.msra.mxu1 %v6582_v37  ;;  %4705 = vmatprep.mubr.msk.f32.mxu1 %vm6108_vm0, %v6107_v1 }
 0x2fd   :  { %5311 = vmatprep.subr.bf16.mxu1 %v6106_v0 }
 0x2ff   :  { %892 = vrot.lane.b32.xlu0 %v6624_v16, %s6110_s9 }
 0x300   :  { %5313 = vmatpush3.bf16.msra.mxu1 %v6592_v3 }
 0x301   :  { %5314 = vmatprep.subr.bf16.mxu1 %v6106_v0 }
 0x304   :  { %5316 = vmatpush3.bf16.msra.mxu1 %v6598_v6 }
 0x305   :  { %5317 = vmatprep.subr.bf16.mxu1 %v6106_v0 }
 0x308   :  { %5319 = vmatpush3.bf16.msra.mxu1 %v6604_v9 }
 0x309   :  { %5332 = vmatprep.subr.bf16.mxu1 %v6106_v0 }
 0x367   :  { %v812_v20 = vpop.f32.mrb[6].mxu1 }
 0x368   :  { %v916_v21 = vadd.f32 %v912_v19, %v812_v20  ;;  %v814_v22 = vpop.f32.mrb[7].mxu1  ;;  %v920_v36 = vadd.f32 %v6566_v54, %v812_v20 }
 0x369   :  { %v909_v23 = vadd.f32 %v6566_v54, %v814_v22 }
 0x36a   :  { %v917_v24 = vmax.f32 %v916_v21, 0.0  ;;  %v921_v50 = vmax.f32 %v920_v36, 0.0 }
 0x36b   :  { %v910_v25 = vmax.f32 %v909_v23, 0.0  ;;  %v1580_v23 = vld [vmem:[#allocation15] sm:$0x3] }
 0x36c   :  { %1155 = vrot.lane.b32.xlu1 %v917_v24, %s6110_s9  ;;  %v1585_v24 = vrot.slane %v1580_v23, %v6551_v39 }
 0x36d   :  { %v898_v26 = vpop.permute.xlu0 %897  ;;  %4687 = vmatmul.mubr.msk.f32.vlgmr.msra.gmra.mrb[6].mxu0 %vm666_vm5, %v910_v25  ;;  %v1589_v25 = vrot.slane %v1580_v23, %v6726_v7 }
 0x36e   :  { %v900_v27 = vadd.f32 %v898_v26, %v6621_v13  ;;  %5322 = vmatpush3.bf16.msra.mxu0 %v6582_v37  ;;  %4724 = vmatprep.mubr.msk.f32.mxu0 %vm6108_vm0, %v6107_v1  ;;  %v4121_v26 = vld [vmem:[%s7849_s2 + $0x80] sm:$0xff] }
 0x36f   :  { %5323 = vmatprep.subr.bf16.mxu0 %v6106_v0 }
 0x370   :  { %v914_v28 = vadd.f32 %v912_v19, %v900_v27  ;;  %v4123_v27 = vld [vmem:[%s7849_s2 + $0x90] sm:$0xff] }
 0x371   :  { %v893_v40 = vpop.permute.xlu0 %892 }
 0x372   :  { %v915_v29 = vmax.f32 %v914_v28, 0.0  ;;  %5325 = vmatpush3.bf16.msra.mxu0 %v6592_v3  ;;  %v895_v48 = vadd.f32 %v893_v40, %v6621_v13  ;;  %v285_v13 = vrot.slane %v6554_v41, %v6726_v7  ;;  %v5386_v28 = vpack.c.bf16 %v4123_v27, %v4121_v26  ;;  %v4125_v40 = vld [vmem:[%s7849_s2 + $0xa0] sm:$0xff] }
 0x373   :  { %5326 = vmatprep.subr.bf16.mxu0 %v6106_v0 }
 0x374   :  { %1080 = vrot.lane.b32.xlu1 %v915_v29, %s6110_s9  ;;  %v918_v58 = vadd.f32 %v6566_v54, %v895_v48  ;;  %v6744_v14 = vadd.f32 %v6568_v55, %v285_v13  ;;  %v5392_v48 = vpack.c.bf16 %v4132_v45, %v4130_v44 }
 0x376   :  { %5328 = vmatpush3.bf16.msra.mxu0 %v6598_v6  ;;  %v919_v4 = vmax.f32 %v918_v58, 0.0 }
 0x377   :  { %5329 = vmatprep.subr.bf16.mxu0 %v6106_v0 }
 0x37a   :  { %5331 = vmatpush3.bf16.msra.mxu0 %v6604_v9 }
 0x37b   :  { %5344 = vmatprep.subr.bf16.mxu0 %v6106_v0 }
 0x3ce   :  { %v6655_v30 = vpop.f32.mrb[8].mxu1 }
 0x3cf   :  { %v4669_v31 = vpop.f32.mrb[9].mxu1 }
 0x3de   :  { %v1156_v32 = vpop.permute.xlu1 %1155 }
 0x3df   :  { %4725 = vmatmul.mubr.msk.f32.vlgmr.msra.gmra.mrb[8].mxu0 %vm666_vm5, %v1156_v32 }
 0x3e0   :  { %5346 = vmatpush3.bf16.msra.mxu0 %v6582_v37  ;;  %4762 = vmatprep.mubr.msk.f32.mxu0 %vm6108_vm0, %v6107_v1 }
 0x3e1   :  { %5347 = vmatprep.subr.bf16.mxu0 %v6106_v0 }
 0x3e4   :  { %5349 = vmatpush3.bf16.msra.mxu0 %v6592_v3 }
 0x3e5   :  { %5350 = vmatprep.subr.bf16.mxu0 %v6106_v0 }
 0x3e6   :  { %v1081_v33 = vpop.permute.xlu1 %1080 }
 0x3e7   :  { %4706 = vmatmul.mubr.msk.f32.vlgmr.msra.gmra.mrb[10].mxu1 %vm666_vm5, %v1081_v33  ;;  %v4126_v33 = vld [vmem:[%s7849_s2 + $0xa8] sm:$0xff] }
 0x3e8   :  { %5334 = vmatpush3.bf16.msra.mxu1 %v6582_v37  ;;  %4743 = vmatprep.mubr.msk.f32.mxu1 %vm6108_vm0, %v6107_v1  ;;  %v5388_v36 = vpack.c.bf16 %v4128_v34, %v4126_v33  ;;  %v4149_v33 = vld [vmem:[%s7849_s2 + $0x148] sm:$0xff]  ;;  %v4151_v34 = vld [vmem:[%s7849_s2 + $0x158] sm:$0xff] }
 0x3e9   :  { %5352 = vmatpush3.bf16.msra.mxu0 %v6598_v6  ;;  %5335 = vmatprep.subr.bf16.mxu1 %v6106_v0 }
 0x3ea   :  { %5353 = vmatprep.subr.bf16.mxu0 %v6106_v0 }
 0x3ec   :  { %5337 = vmatpush3.bf16.msra.mxu1 %v6592_v3 }
 0x3ed   :  { %5355 = vmatpush3.bf16.msra.mxu0 %v6604_v9  ;;  %5338 = vmatprep.subr.bf16.mxu1 %v6106_v0 }
 0x3ee   :  { %5369 = vmatprep.subr.bf16.mxu0 %v5368_v42  ;;  %v4127_v42 = vld [vmem:[%s7849_s2 + $0xb0] sm:$0xff] }
 0x3ef   :  { %v5390_v43 = vpack.c.bf16 %v4127_v42, %v4125_v40  ;;  %v4150_v40 = vld [vmem:[%s7849_s2 + $0x150] sm:$0xff]  ;;  %v4153_v42 = vld [vmem:[%s7849_s2 + $0x168] sm:$0xff] }
 0x3f0   :  { %5340 = vmatpush3.bf16.msra.mxu1 %v6598_v6  ;;  %4763 = vmatmul.mubr.msk.f32.vlgmr.msra.gmra.mrb[10].mxu0 %vm666_vm5, %v921_v50  ;;  %v4134_v50 = vld [vmem:[%s7849_s2 + $0xe8] sm:$0xff] }
 0x3f1   :  { %5371 = vmatpush1.bf16.msra.mxu0 %v5370_v49  ;;  %5341 = vmatprep.subr.bf16.mxu1 %v6106_v0  ;;  %v4131_v49 = vld [vmem:[%s7849_s2 + $0xd0] sm:$0xff] }
 0x3f2   :  { %5373 = vmatprep.subr.bf16.mxu0 %v5372_v51  ;;  %1659 = vmatprep.mubr.f32.mxu0 %v6107_v1  ;;  %v4136_v51 = vld [vmem:[%s7849_s2 + $0xf8] sm:$0xff]  ;;  %v5394_v52 = vpack.c.bf16 %v4131_v49, %v4129_v47  ;;  %v4152_v47 = vld [vmem:[%s7849_s2 + $0x160] sm:$0xff] }
 0x3f3   :  { %v5396_v53 = vpack.c.bf16 %v4136_v51, %v4134_v50 }
 0x3f4   :  { %5343 = vmatpush3.bf16.msra.mxu1 %v6604_v9 }
 0x3f5   :  { %5375 = vmatpush1.bf16.msra.mxu0 %v5374_v59  ;;  %5356 = vmatprep.subr.bf16.mxu1 %v6106_v0 }
 0x3f6   :  { %5377 = vmatprep.subr.bf16.mxu0 %v5376_v60  ;;  %v5398_v60 = vpack.c.bf16 %v4135_v57, %v4133_v56 }
 0x3f7   :  { %4744 = vmatmul.mubr.msk.f32.vlgmr.msra.gmra.mrb[12].mxu1 %vm666_vm5, %v919_v4 }
 0x3f8   :  { %5358 = vmatpush3.bf16.msra.mxu1 %v6582_v37  ;;  %4781 = vmatprep.mubr.msk.f32.mxu1 %vm6108_vm0, %v6107_v1  ;;  %v922_v37 = vadd.f32 %v6566_v54, %v6624_v16  ;;  %v4124_v54 = vld [vmem:[%s7849_s2 + $0x98] sm:$0xff] }
 0x3f9   :  { %5379 = vmatpush1.bf16.msra.mxu0 %v5378_v5  ;;  %5359 = vmatprep.subr.bf16.mxu1 %v6106_v0 }
 0x3fa   :  { %5381 = vmatprep.subr.bf16.mxu0 %v5380_v8  ;;  %v923_v41 = vmax.f32 %v922_v37, 0.0 }
 0x3fc   :  { %5361 = vmatpush3.bf16.msra.mxu1 %v6592_v3 }
 0x3fd   :  { %5383 = vmatpush1.bf16.msra.mxu0 %v5382_v38  ;;  %5362 = vmatprep.subr.bf16.mxu1 %v6106_v0 }
 0x400   :  { %5364 = vmatpush3.bf16.msra.mxu1 %v6598_v6  ;;  %4118 = vmatmul.mubr.msk.f32.vlgmr.msra.gmra.mrb[12].mxu0 %vm666_vm5, %v6744_v14  ;;  %v4122_v6 = vld [vmem:[%s7849_s2 + $0x88] sm:$0xff] }
 0x401   :  { %5365 = vmatprep.subr.bf16.mxu1 %v6106_v0  ;;  %1907 = vmatprep.mubr.f32.mxu0 %v6107_v1  ;;  %v5384_v15 = vpack.c.bf16 %v4124_v54, %v4122_v6  ;;  %v4143_v6 = vld [vmem:[%s7849_s2 + $0x118] sm:$0xff]  ;;  %v4140_v54 = vld [vmem:[%s7849_s2 + $0x100] sm:$0xff] }
 0x404   :  { %5367 = vmatpush3.bf16.msra.mxu1 %v6604_v9 }
 0x405   :  { %5385 = vmatprep.subr.bf16.mxu1 %v5384_v15 }
 0x407   :  { %4782 = vmatmul.mubr.msk.f32.vlgmr.msra.gmra.mrb[14].mxu1 %vm666_vm5, %v923_v41 }
 0x408   :  { %1783 = vmatprep.mubr.f32.mxu1 %v6107_v1  ;;  %5387 = vmatpush1.bf16.msra.mxu1 %v5386_v28 }
 0x409   :  { %5389 = vmatprep.subr.bf16.mxu1 %v5388_v36  ;;  %v5408_v36 = vpack.c.bf16 %v4151_v34, %v4149_v33  ;;  %v1828_v33 = vld [vmem:[#allocation15 + $0x4] sm:$0x3] }
 0x40a   :  { %v1833_v34 = vrot.slane %v1828_v33, %v6551_v39 }
 0x40c   :  { %5391 = vmatpush1.bf16.msra.mxu1 %v5390_v43  ;;  %v4155_v43 = vld [vmem:[%s7849_s2 + $0x178] sm:$0xff] }
 0x40d   :  { %5393 = vmatprep.subr.bf16.mxu1 %v5392_v48  ;;  %v5412_v45 = vpack.c.bf16 %v4155_v43, %v4153_v42  ;;  %v4154_v48 = vld [vmem:[%s7849_s2 + $0x170] sm:$0xff]  ;;  %v4159_v43 = vld [vmem:[%s7849_s2 + $0x180] sm:$0xff] }
 0x40e   :  { %v5414_v49 = vpack.c.bf16 %v4154_v48, %v4152_v47  ;;  %v4164_v47 = vld [vmem:[%s7849_s2 + $0x1a8] sm:$0xff]  ;;  %v4166_v48 = vld [vmem:[%s7849_s2 + $0x1b8] sm:$0xff] }
 0x410   :  { %5395 = vmatpush1.bf16.msra.mxu1 %v5394_v52 }
 0x411   :  { %5397 = vmatprep.subr.bf16.mxu1 %v5396_v53 }
 0x414   :  { %5399 = vmatpush1.bf16.msra.mxu1 %v5398_v60 }
 0x440   :  { %v6756_v55 = vpop.f32.mrb[6].mxu0 }
 0x441   :  { %v4688_v3 = vpop.f32.mrb[7].mxu0 }
 0x442   :  { %v4141_v3 = vld [vmem:[%s7849_s2 + $0x108] sm:$0xff] }
 0x443   :  { %v5400_v15 = vpack.c.bf16 %v4143_v6, %v4141_v3  ;;  %v2062_v3 = vld [vmem:[%s7792_s13 + $0x20] sm:$0xff]  ;;  %v2063_v6 = vld [vmem:[%s7792_s13 + $0x28] sm:$0xff] }
 0x445   :  { %5401 = vmatprep.subr.bf16.mxu0 %v5400_v15  ;;  %v2064_v15 = vld [vmem:[%s7792_s13 + $0x30] sm:$0xff] }
 0x4b2   :  { %v6764_v16 = vpop.f32.mrb[8].mxu0 }
 0x4b3   :  { %v4726_v9 = vpop.f32.mrb[9].mxu0 }
 0x4b4   :  { %v4142_v9 = vld [vmem:[%s7849_s2 + $0x110] sm:$0xff] }
 0x4ba   :  { %v6766_v17 = vpop.f32.mrb[10].mxu1 }
 0x4bb   :  { %v4707_v18 = vpop.f32.mrb[11].mxu1 }
 0x4bc   :  { %v5402_v18 = vpack.c.bf16 %v4142_v9, %v4140_v54  ;;  %v5439_v54 = vpack.c.bf16 %v2063_v6, %v2062_v3  ;;  %v2065_v9 = vld [vmem:[%s7792_s13 + $0x38] sm:$0xff] }
 0x4be   :  { %5403 = vmatpush1.bf16.msra.mxu0 %v5402_v18  ;;  %v5442_v18 = vpack.c.bf16 %v2065_v9, %v2064_v15 }
 0x4c3   :  { %v6768_v19 = vpop.f32.mrb[10].mxu0 }
 0x4c4   :  { %v4764_v20 = vpop.f32.mrb[11].mxu0 }
 0x4c5   :  { %v1704_v20 = vld [vmem:[#allocation15 + $0x2] sm:$0x3] }
 0x4c6   :  { %v1713_v52 = vrot.slane %v1704_v20, %v6726_v7 }
 0x4ca   :  { %v6770_v21 = vpop.f32.mrb[12].mxu1 }
 0x4cb   :  { %v4745_v22 = vpop.f32.mrb[13].mxu1 }
 0x4cc   :  { %v1709_v22 = vrot.slane %v1704_v20, %v6551_v39 }
 0x4d3   :  { %v1661_v29 = vpop.f32.mrb[12].mxu0 }
 0x4d4   :  { %v1662_v31 = vadd.f32 %v1661_v29, %v1585_v24  ;;  %v1663_v32 = vpop.f32.mrb[13].mxu0  ;;  %v4145_v24 = vld [vmem:[%s7849_s2 + $0x128] sm:$0xff]  ;;  %v4144_v29 = vld [vmem:[%s7849_s2 + $0x120] sm:$0xff] }
 0x4d5   :  { %v1664_v35 = vadd.f32 %v1663_v32, %v1589_v25  ;;  %v4147_v25 = vld [vmem:[%s7849_s2 + $0x138] sm:$0xff] }
 0x4d6   :  { %5712 = vtanh.f32 %v1662_v31  ;;  %v4119_v62 = vmul.f32 -1.442695, %v1662_v31  ;;  %v5404_v28 = vpack.c.bf16 %v4147_v25, %v4145_v24  ;;  %v4146_v31 = vld [vmem:[%s7849_s2 + $0x130] sm:$0xff]  ;;  %v4178_v24 = vld [vmem:[%s7793_s14] ss:$0 sm:$0xff] }
 0x4d7   :  { %v4120_v63 = vmul.f32 -1.442695, %v1664_v35  ;;  %v5406_v32 = vpack.c.bf16 %v4146_v31, %v4144_v29  ;;  %v4148_v35 = vld [vmem:[%s7849_s2 + $0x140] sm:$0xff] }
 0x4d8   :  { %5714 = vpow2.f32 %v4119_v62  ;;  %5405 = vmatprep.subr.bf16.mxu0 %v5404_v28  ;;  %v5410_v44 = vpack.c.bf16 %v4150_v40, %v4148_v35  ;;  %v4162_v40 = vld [vmem:[%s7849_s2 + $0x198] sm:$0xff] }
 0x4d9   :  { %5716 = vpow2.f32 %v4120_v63  ;;  %5407 = vmatpush1.bf16.msra.mxu0 %v5406_v32 }
 0x4da   :  { %v6816_v58 = vpop.f32.mrb[14].mxu1  ;;  %5409 = vmatprep.subr.bf16.mxu0 %v5408_v36  ;;  %v4160_v36 = vld [vmem:[%s7849_s2 + $0x188] sm:$0xff] }
 0x4db   :  { %v4783_v59 = vpop.f32.mrb[15].mxu1  ;;  %v5416_v42 = vpack.c.bf16 %v4162_v40, %v4160_v36  ;;  %v2197_v40 = vld [vmem:[%s7796_s17 + $0x18] sm:$0xff] }
 0x4dd   :  { %5411 = vmatpush1.bf16.msra.mxu0 %v5410_v44  ;;  %v4161_v44 = vld [vmem:[%s7849_s2 + $0x190] sm:$0xff]  ;;  %5417 = vmatprep.subr.bf16.mxu1 %v5416_v42  ;;  %v2198_v42 = vld [vmem:[%s7796_s17 + $0x20] sm:$0xff] }
 0x4de   :  { %5413 = vmatprep.subr.bf16.mxu0 %v5412_v45  ;;  %v5418_v45 = vpack.c.bf16 %v4161_v44, %v4159_v43  ;;  %v2199_v43 = vld [vmem:[%s7796_s17 + $0x28] sm:$0xff] }
 0x4df   :  { %v5451_v44 = vpack.c.bf16 %v2199_v43, %v2198_v42 }
 0x4e0   :  { %v5713_v61 = vpop.eup %5712 }
 0x4e1   :  { %1680 = vrot.lane.b32.xlu1 %v5713_v61, %s6110_s9  ;;  %5415 = vmatpush1.bf16.msra.mxu0 %v5414_v49  ;;  %v5420_v49 = vpack.c.bf16 %v4166_v48, %v4164_v47  ;;  %v2201_v47 = vld [vmem:[%s7796_s17 + $0x38] sm:$0xff] }
 0x4e2   :  { %v5715_v2 = vpop.eup %5714  ;;  %5432 = vmatprep.subr.bf16.mxu0 %v6106_v0 }
 0x4e3   :  { %v1669_v4 = vadd.f32 1.0, %v5715_v2  ;;  %v5717_v5 = vpop.eup %5716 }
 0x4e4   :  { %v1676_v8 = vadd.f32 1.0, %v5717_v5  ;;  %v2059_v5 = vld [vmem:[%s7792_s13 + $0x8] sm:$0xff] }
 0x4e5   :  { %2073 = vrot.lane.b32.xlu1 %v6744_v14, %s6110_s9  ;;  %5718 = vrcp.f32 %v1669_v4  ;;  %v2058_v4 = vld [vmem:[%s7792_s13] sm:$0xff] }
 0x4e6   :  { %5720 = vrcp.f32 %v1676_v8 }
 0x4ef   :  { %v5719_v10 = vpop.eup %5718 }
 0x4f0   :  { %v5721_v13 = vpop.eup %5720 }
 0x553   :  { %v1681_v12 = vpop.permute.xlu1 %1680 }
 0x554   :  { %v1683_v38 = vmul.f32 %v5719_v10, %v1681_v12  ;;  %v5433_v12 = vpack.c.bf16 %v2059_v5, %v2058_v4  ;;  %v4171_v5 = vld [vmem:[%s7849_s2 + $0x1e0] sm:$0xff] }
 0x556   :  { %5722 = vtanh.f32 %v1683_v38 }
 0x557   :  { %v2074_v20 = vpop.permute.xlu1 %2073 }
 0x560   :  { %v5723_v37 = vpop.eup %5722 }
 0x561   :  { %v1685_v41 = vmul.f32 %v5723_v37, %v5721_v13  ;;  %v2060_v13 = vld [vmem:[%s7792_s13 + $0x10] sm:$0xff]  ;;  %v2061_v37 = vld [vmem:[%s7792_s13 + $0x18] sm:$0xff] }
 0x563   :  { %4137 = vmatmul.mubr.msk.f32.vlgmr.msra.gmra.mrb[16].mxu1 %vm666_vm5, %v1685_v41  ;;  %v5436_v41 = vpack.c.bf16 %v2061_v37, %v2060_v13 }
 0x564   :  { %2031 = vmatprep.mubr.f32.mxu1 %v6107_v1  ;;  %5419 = vmatpush1.bf16.msra.mxu1 %v5418_v45  ;;  %v2200_v45 = vld [vmem:[%s7796_s17 + $0x30] sm:$0xff] }
 0x565   :  { %5421 = vmatprep.subr.bf16.mxu1 %v5420_v49  ;;  %v5454_v48 = vpack.c.bf16 %v2201_v47, %v2200_v45  ;;  %v4185_v45 = vld [vmem:[#allocation21] ss:$0 sm:$0xff] }
 0x636   :  { %v1785_v23 = vpop.f32.mrb[16].mxu1 }
 0x637   :  { %v1786_v26 = vadd.f32 %v1785_v23, %v1709_v22  ;;  %v1787_v27 = vpop.f32.mrb[17].mxu1 }
 0x638   :  { %v1788_v53 = vadd.f32 %v1787_v27, %v1713_v52 }
 0x639   :  { %5724 = vtanh.f32 %v1786_v26  ;;  %v4138_v51 = vmul.f32 -1.442695, %v1786_v26 }
 0x63a   :  { %v4139_v56 = vmul.f32 -1.442695, %v1788_v53  ;;  %v4168_v53 = vld [vmem:[%s7849_s2 + $0x1c8] sm:$0xff] }
 0x63b   :  { %5726 = vpow2.f32 %v4138_v51  ;;  %v4165_v51 = vld [vmem:[%s7849_s2 + $0x1b0] sm:$0xff] }
 0x63c   :  { %5728 = vpow2.f32 %v4139_v56  ;;  %v4170_v56 = vld [vmem:[%s7849_s2 + $0x1d8] sm:$0xff] }
 0x643   :  { %v5725_v50 = vpop.eup %5724 }
 0x644   :  { %1804 = vrot.lane.b32.xlu0 %v5725_v50, %s6110_s9  ;;  %v4163_v50 = vld [vmem:[%s7849_s2 + $0x1a0] sm:$0xff] }
 0x645   :  { %v5727_v57 = vpop.eup %5726  ;;  %v5422_v52 = vpack.c.bf16 %v4165_v51, %v4163_v50 }
 0x646   :  { %v1793_v59 = vadd.f32 1.0, %v5727_v57  ;;  %v5729_v60 = vpop.eup %5728  ;;  %v4167_v57 = vld [vmem:[%s7849_s2 + $0x1c0] sm:$0xff] }
 0x647   :  { %v1800_v61 = vadd.f32 1.0, %v5729_v60  ;;  %v5424_v60 = vpack.c.bf16 %v4170_v56, %v4168_v53  ;;  %5423 = vmatpush1.bf16.msra.mxu1 %v5422_v52  ;;  %v2285_v56 = vld [vmem:[%s7798_s19] sm:$0xff] }
 0x648   :  { %5730 = vrcp.f32 %v1793_v59 }
 0x649   :  { %5732 = vrcp.f32 %v1800_v61  ;;  %v4169_v61 = vld [vmem:[%s7849_s2 + $0x1d0] sm:$0xff]  ;;  %5425 = vmatprep.subr.bf16.mxu1 %v5424_v60 }
 0x652   :  { %v5731_v62 = vpop.eup %5730 }
 0x653   :  { %v5733_v8 = vpop.eup %5732 }
 0x6b6   :  { %v1805_v63 = vpop.permute.xlu0 %1804 }
 0x6b7   :  { %v1807_v2 = vmul.f32 %v5731_v62, %v1805_v63  ;;  %v4172_v62 = vld [vmem:[%s7849_s2 + $0x1e8] sm:$0xff]  ;;  %v4174_v63 = vld [vmem:[%s7849_s2 + $0x1f8] sm:$0xff] }
 0x6b8   :  { %v5428_v4 = vpack.c.bf16 %v4174_v63, %v4172_v62  ;;  %v2289_v63 = vld [vmem:[%s7798_s19 + $0x20] sm:$0xff] }
 0x6b9   :  { %5734 = vtanh.f32 %v1807_v2  ;;  %v5426_v2 = vpack.c.bf16 %v4169_v61, %v4167_v57  ;;  %v2286_v57 = vld [vmem:[%s7798_s19 + $0x8] sm:$0xff]  ;;  %v2288_v61 = vld [vmem:[%s7798_s19 + $0x18] sm:$0xff] }
 0x6ba   :  { %v5457_v60 = vpack.c.bf16 %v2286_v57, %v2285_v56  ;;  %v4186_v57 = vld [vmem:[%s7801_s22] ss:$0 sm:$0xff] }
 0x6bb   :  { %5427 = vmatpush1.bf16.msra.mxu1 %v5426_v2  ;;  %v2290_v2 = vld [vmem:[%s7798_s19 + $0x28] sm:$0xff] }
 0x6bc   :  { %5429 = vmatprep.subr.bf16.mxu1 %v5428_v4 }
 0x6c3   :  { %v5735_v10 = vpop.eup %5734 }
 0x6c4   :  { %v1809_v38 = vmul.f32 %v5735_v10, %v5733_v8  ;;  %v4173_v8 = vld [vmem:[%s7849_s2 + $0x1f0] sm:$0xff] }
 0x6c5   :  { %v5430_v10 = vpack.c.bf16 %v4173_v8, %v4171_v5  ;;  %v5463_v8 = vpack.c.bf16 %v2290_v2, %v2289_v63  ;;  %v4190_v63 = vld [vmem:[%s7792_s13 + $0x58] sm:$0xff] }
 0x6c6   :  { %4156 = vmatmul.mubr.msk.f32.vlgmr.msra.gmra.mrb[14].mxu0 %vm666_vm5, %v1809_v38  ;;  %v1837_v38 = vrot.slane %v1828_v33, %v6726_v7  ;;  %v2194_v33 = vld [vmem:[%s7796_s17] sm:$0xff] }
 0x6c7   :  { %5434 = vmatpush3.bf16.msra.mxu0 %v5433_v12  ;;  %4800 = vmatprep.mubr.msk.f32.mxu0 %vm6108_vm0, %v6107_v1 }
 0x6c8   :  { %5435 = vmatprep.subr.bf16.mxu0 %v6106_v0  ;;  %5431 = vmatpush1.bf16.msra.mxu1 %v5430_v10 }
 0x6c9   :  { %5444 = vmatprep.subr.bf16.mxu1 %v6106_v0 }
 0x6cb   :  { %5437 = vmatpush3.bf16.msra.mxu0 %v5436_v41 }
 0x6cc   :  { %5438 = vmatprep.subr.bf16.mxu0 %v6106_v0 }
 0x6cf   :  { %5440 = vmatpush3.bf16.msra.mxu0 %v5439_v54 }
 0x6d0   :  { %5441 = vmatprep.subr.bf16.mxu0 %v6106_v0 }
 0x6d3   :  { %5443 = vmatpush3.bf16.msra.mxu0 %v5442_v18 }
 0x6d4   :  { %5456 = vmatprep.subr.bf16.mxu0 %v6106_v0 }
 0x6d6   :  { %4801 = vmatmul.mubr.msk.f32.vlgmr.msra.gmra.mrb[16].mxu0 %vm666_vm5, %v2074_v20 }
 0x6d7   :  { %4854 = vmatprep.mubr.msk.f32.mxu0 %vm6108_vm0, %v6107_v1  ;;  %5458 = vmatpush3.bf16.msra.mxu0 %v5457_v60  ;;  %v4188_v60 = vld [vmem:[%s7792_s13 + $0x48] sm:$0xff] }
 0x6d8   :  { %5459 = vmatprep.subr.bf16.mxu0 %v6106_v0 }
 0x799   :  { %v1909_v22 = vpop.f32.mrb[14].mxu0 }
 0x79a   :  { %v1911_v23 = vpop.f32.mrb[15].mxu0  ;;  %v1910_v35 = vadd.f32 %v1909_v22, %v1833_v34  ;;  %v2195_v34 = vld [vmem:[%s7796_s17 + $0x8] sm:$0xff] }
 0x79b   :  { %v1912_v13 = vadd.f32 %v1911_v23, %v1837_v38  ;;  %v5445_v36 = vpack.c.bf16 %v2195_v34, %v2194_v33  ;;  %v2292_v38 = vld [vmem:[%s7798_s19 + $0x38] sm:$0xff]  ;;  %v4184_v34 = vld [vmem:[#allocation19] ss:$0 sm:$0xff] }
 0x79c   :  { %5736 = vtanh.f32 %v1910_v35  ;;  %v4157_v12 = vmul.f32 -1.442695, %v1910_v35  ;;  %v2196_v35 = vld [vmem:[%s7796_s17 + $0x10] sm:$0xff] }
 0x79d   :  { %v4158_v37 = vmul.f32 -1.442695, %v1912_v13 }
 0x79e   :  { %5738 = vpow2.f32 %v4157_v12  ;;  %v2291_v12 = vld [vmem:[%s7798_s19 + $0x30] sm:$0xff] }
 0x79f   :  { %5740 = vpow2.f32 %v4158_v37 }
 0x7a6   :  { %v5737_v59 = vpop.eup %5736 }
 0x7a8   :  { %v5739_v41 = vpop.eup %5738 }
 0x7a9   :  { %v2143_v25 = vpop.f32.mrb[16].mxu0  ;;  %v1917_v3 = vadd.f32 1.0, %v5739_v41  ;;  %v5741_v15 = vpop.eup %5740  ;;  %v5466_v41 = vpack.c.bf16 %v2292_v38, %v2291_v12  ;;  %v4194_v12 = vld [vmem:[%s7792_s13 + $0x78] sm:$0xff] }
 0x7aa   :  { %v2144_v26 = vadd.f32 %v4178_v24, %v2143_v25  ;;  %v4802_v27 = vpop.f32.mrb[17].mxu0  ;;  %v1924_v22 = vadd.f32 1.0, %v5741_v15  ;;  %v2295_v15 = vld [vmem:[%s7798_s19 + $0x50] sm:$0xff] }
 0x7ab   :  { %5742 = vrcp.f32 %v1917_v3  ;;  %v2293_v3 = vld [vmem:[%s7798_s19 + $0x40] sm:$0xff] }
 0x7ac   :  { %2148 = vrot.lane.b32.xlu0 %v2144_v26, %s6110_s9  ;;  %5744 = vrcp.f32 %v1924_v22  ;;  %v2298_v22 = vld [vmem:[%s7798_s19 + $0x68] sm:$0xff] }
 0x7b5   :  { %v5743_v24 = vpop.eup %5742 }
 0x7b6   :  { %v5745_v23 = vpop.eup %5744 }
 0x81e   :  { %v2149_v28 = vpop.permute.xlu0 %2148 }
 0x81f   :  { %v2151_v29 = vadd.f32 %v2149_v28, %v6744_v14  ;;  %v4180_v14 = vld [vmem:[#allocation16] ss:$0 sm:$0xff] }
 0x821   :  { %2155 = vrot.lane.b32.xlu1 %v2151_v29, %s6110_s9 }
 0x893   :  { %v2156_v31 = vpop.permute.xlu1 %2155 }
 0x894   :  { %v2158_v32 = vsel %vm666_vm5, %v2156_v31, 0.0 }
 0x895   :  { %2159 = vadd.xlane.f32.xlu0 %v2158_v32  ;;  %v4181_v32 = vld [vmem:[#allocation18] ss:$0 sm:$0xff] }
 0x8ab   :  { %2181 = vrot.lane.b32.xlu0 %v4180_v14, %s6110_s9  ;;  %v5448_v14 = vpack.c.bf16 %v2197_v40, %v2196_v35 }
 0x8af   :  { %1928 = vrot.lane.b32.xlu0 %v5737_v59, %s6110_s9  ;;  %v2287_v59 = vld [vmem:[%s7798_s19 + $0x10] sm:$0xff] }
 0x8b0   :  { %v5460_v62 = vpack.c.bf16 %v2288_v61, %v2287_v59  ;;  %v4187_v59 = vld [vmem:[%s7792_s13 + $0x40] sm:$0xff]  ;;  %v4189_v61 = vld [vmem:[%s7792_s13 + $0x50] sm:$0xff] }
 0x8b1   :  { %v5484_v2 = vpack.c.bf16 %v4190_v63, %v4189_v61  ;;  %v4211_v63 = vld [vmem:[%s7798_s19 + $0x80] sm:$0xff] }
 0x8b2   :  { %5461 = vmatpush3.bf16.msra.mxu0 %v5460_v62  ;;  %v5481_v62 = vpack.c.bf16 %v4188_v60, %v4187_v59 }
 0x8b3   :  { %5462 = vmatprep.subr.bf16.mxu0 %v6106_v0 }
 0x8b6   :  { %5464 = vmatpush3.bf16.msra.mxu0 %v5463_v8 }
 0x8b7   :  { %5465 = vmatprep.subr.bf16.mxu0 %v6106_v0 }
 0x8ba   :  { %5467 = vmatpush3.bf16.msra.mxu0 %v5466_v41 }
 0x8bb   :  { %5468 = vmatprep.subr.bf16.mxu0 %v6106_v0 }
 0x922   :  { %v2160_v6 = vpop.xlane.xlu0 %2159 }
 0x923   :  { %v2162_v54 = vmul.f32 0.015625, %v2160_v6  ;;  %v2294_v6 = vld [vmem:[%s7798_s19 + $0x48] sm:$0xff] }
 0x925   :  { %v2163_v9 = vsub.f32 %v2151_v29, %v2162_v54  ;;  %v5469_v54 = vpack.c.bf16 %v2294_v6, %v2293_v3 }
 0x926   :  { %v6969_v18 = vpop.permute.xlu0 %2181 }
 0x927   :  { %v2164_v20 = vmul.f32 %v2163_v9, %v2163_v9  ;;  %5470 = vmatpush3.bf16.msra.mxu0 %v5469_v54 }
 0x928   :  { %5471 = vmatprep.subr.bf16.mxu0 %v6106_v0 }
 0x929   :  { %2166 = vrot.lane.b32.xlu1 %v2164_v20, %s6110_s9  ;;  %v2297_v20 = vld [vmem:[%s7798_s19 + $0x60] sm:$0xff] }
 0x92a   :  { %v1929_v25 = vpop.permute.xlu0 %1928 }
 0x92b   :  { %v1931_v26 = vmul.f32 %v5743_v24, %v1929_v25  ;;  %v5475_v24 = vpack.c.bf16 %v2298_v22, %v2297_v20  ;;  %v4196_v22 = vld [vmem:[%s7793_s14 + $0x1] ss:$0 sm:$0xff] }
 0x92d   :  { %5746 = vtanh.f32 %v1931_v26  ;;  %v2299_v26 = vld [vmem:[%s7798_s19 + $0x70] sm:$0xff] }
 0x937   :  { %v5747_v27 = vpop.eup %5746 }
 0x938   :  { %v1933_v28 = vmul.f32 %v5747_v27, %v5745_v23  ;;  %v2300_v23 = vld [vmem:[%s7798_s19 + $0x78] sm:$0xff] }
 0x939   :  { %v5478_v27 = vpack.c.bf16 %v2300_v23, %v2299_v26 }
 0x93a   :  { %4175 = vmatmul.mubr.msk.f32.vlgmr.msra.gmra.mrb[18].mxu1 %vm666_vm5, %v1933_v28  ;;  %v4182_v28 = vld [vmem:[%s7797_s18] ss:$0 sm:$0xff] }
 0x93b   :  { %4819 = vmatprep.mubr.msk.f32.mxu1 %vm6108_vm0, %v6107_v1  ;;  %5446 = vmatpush3.bf16.msra.mxu1 %v5445_v36 }
 0x93c   :  { %5447 = vmatprep.subr.bf16.mxu1 %v6106_v0 }
 0x93f   :  { %5449 = vmatpush3.bf16.msra.mxu1 %v5448_v14 }
 0x940   :  { %5450 = vmatprep.subr.bf16.mxu1 %v6106_v0 }
 0x943   :  { %5452 = vmatpush3.bf16.msra.mxu1 %v5451_v44 }
 0x944   :  { %5453 = vmatprep.subr.bf16.mxu1 %v6106_v0 }
 0x947   :  { %5455 = vmatpush3.bf16.msra.mxu1 %v5454_v48 }
 0x948   :  { %5480 = vmatprep.subr.bf16.mxu1 %v6106_v0 }
 0x99b   :  { %v2167_v29 = vpop.permute.xlu1 %2166 }
 0x99c   :  { %v2169_v31 = vsel %vm666_vm5, %v2167_v29, 0.0 }
 0x99d   :  { %2170 = vadd.xlane.f32.xlu1 %v2169_v31 }
 0x9ae   :  { %2190 = vrot.lane.b32.xlu1 %v4181_v32, %s6110_s9 }
 0xa0d   :  { %v7005_v49 = vpop.f32.mrb[18].mxu1 }
 0xa0e   :  { %v7007_v50 = vpop.f32.mrb[19].mxu1 }
 0xa2a   :  { %v2171_v51 = vpop.xlane.xlu1 %2170 }
 0xa2b   :  { %v2172_v52 = vmul.f32 0.015625, %v2171_v51 }
 0xa2d   :  { %v2173_v53 = vadd.f32 1e-05, %v2172_v52 }
 0xa2e   :  { %v2191_v10 = vpop.permute.xlu1 %2190 }
 0xa2f   :  { %5748 = vrsqrt.f32 %v2173_v53 }
 0xa39   :  { %v5749_v4 = vpop.eup %5748 }
 0xa3a   :  { %v2175_v5 = vmul.f32 %v5749_v4, %v2163_v9  ;;  %v2296_v9 = vld [vmem:[%s7798_s19 + $0x58] sm:$0xff]  ;;  %v4191_v4 = vld [vmem:[%s7792_s13 + $0x60] sm:$0xff] }
 0xa3c   :  { %v2184_v13 = vmul.f32 %v6969_v18, %v2175_v5  ;;  %v5472_v18 = vpack.c.bf16 %v2296_v9, %v2295_v15  ;;  %v4192_v5 = vld [vmem:[%s7792_s13 + $0x68] sm:$0xff] }
 0xa3d   :  { %v5487_v8 = vpack.c.bf16 %v4192_v5, %v4191_v4  ;;  %v4213_v4 = vld [vmem:[%s7798_s19 + $0x90] sm:$0xff] }
 0xa3e   :  { %v2193_v37 = vadd.f32 %v2191_v10, %v2184_v13  ;;  %5473 = vmatpush3.bf16.msra.mxu0 %v5472_v18  ;;  %v4193_v10 = vld [vmem:[%s7792_s13 + $0x70] sm:$0xff] }
 0xa3f   :  { %5474 = vmatprep.subr.bf16.mxu0 %v6106_v0  ;;  %v5490_v38 = vpack.c.bf16 %v4194_v12, %v4193_v10  ;;  %v4215_v12 = vld [vmem:[%s7798_s19 + $0xa0] sm:$0xff] }
 0xa40   :  { %2210 = vrot.lane.b32.xlu0 %v2193_v37, %s6110_s9 }
 0xa42   :  { %5476 = vmatpush3.bf16.msra.mxu0 %v5475_v24 }
 0xa43   :  { %5477 = vmatprep.subr.bf16.mxu0 %v6106_v0 }
 0xa46   :  { %5479 = vmatpush3.bf16.msra.mxu0 %v5478_v27 }
 0xa47   :  { %5504 = vmatprep.subr.bf16.mxu0 %v6106_v0 }
 0xab2   :  { %v2211_v25 = vpop.permute.xlu0 %2210 }
 0xab3   :  { %4820 = vmatmul.mubr.msk.f32.vlgmr.msra.gmra.mrb[20].mxu1 %vm666_vm5, %v2211_v25 }
 0xab4   :  { %4873 = vmatprep.mubr.msk.f32.mxu1 %vm6108_vm0, %v6107_v1  ;;  %5482 = vmatpush3.bf16.msra.mxu1 %v5481_v62 }
 0xab5   :  { %5483 = vmatprep.subr.bf16.mxu1 %v6106_v0 }
 0xab8   :  { %5485 = vmatpush3.bf16.msra.mxu1 %v5484_v2  ;;  %v4212_v2 = vld [vmem:[%s7798_s19 + $0x88] sm:$0xff] }
 0xab9   :  { %5486 = vmatprep.subr.bf16.mxu1 %v6106_v0  ;;  %v5505_v5 = vpack.c.bf16 %v4212_v2, %v4211_v63 }
 0xabc   :  { %5488 = vmatpush3.bf16.msra.mxu1 %v5487_v8  ;;  %v4214_v8 = vld [vmem:[%s7798_s19 + $0x98] sm:$0xff] }
 0xabd   :  { %5489 = vmatprep.subr.bf16.mxu1 %v6106_v0  ;;  %v5508_v10 = vpack.c.bf16 %v4214_v8, %v4213_v4  ;;  %v4230_v4 = vld [vmem:[%s7801_s22 + $0x1] ss:$0 sm:$0xff]  ;;  %v4232_v8 = vld [vmem:[%s7792_s13 + $0x88] sm:$0xff] }
 0xac0   :  { %5491 = vmatpush3.bf16.msra.mxu1 %v5490_v38  ;;  %v4216_v38 = vld [vmem:[%s7798_s19 + $0xa8] sm:$0xff] }
 0xac1   :  { %5492 = vmatprep.subr.bf16.mxu1 %v6106_v0 }
 0xb86   :  { %v2280_v29 = vpop.f32.mrb[20].mxu1 }
 0xb87   :  { %v2281_v31 = vadd.f32 %v4182_v28, %v2280_v29  ;;  %v4821_v32 = vpop.f32.mrb[21].mxu1 }
 0xb89   :  { %v2284_v33 = vmax.f32 %v2281_v31, 0.0  ;;  %v4198_v31 = vld [vmem:[#allocation16 + $0x1] ss:$0 sm:$0xff] }
 0xb8b   :  { %4855 = vmatmul.mubr.f32.vlgmr.msra.gmra.mrb[18].mxu0 %v2284_v33 }
 0xb8c   :  { %4927 = vmatprep.mubr.msk.f32.mxu0 %vm6108_vm0, %v6107_v1  ;;  %5506 = vmatpush3.bf16.msra.mxu0 %v5505_v5  ;;  %v4231_v5 = vld [vmem:[%s7792_s13 + $0x80] sm:$0xff] }
 0xb8d   :  { %5507 = vmatprep.subr.bf16.mxu0 %v6106_v0 }
 0xb90   :  { %5509 = vmatpush3.bf16.msra.mxu0 %v5508_v10  ;;  %v4233_v10 = vld [vmem:[%s7792_s13 + $0x90] sm:$0xff] }
 0xb91   :  { %5510 = vmatprep.subr.bf16.mxu0 %v6106_v0 }
 0xc5e   :  { %v2374_v35 = vpop.f32.mrb[18].mxu0 }
 0xc5f   :  { %v2375_v36 = vadd.f32 %v4184_v34, %v2374_v35  ;;  %v4856_v40 = vpop.f32.mrb[19].mxu0 }
 0xc61   :  { %2379 = vrot.lane.b32.xlu1 %v2375_v36, %s6110_s9 }
 0xcd3   :  { %v2380_v14 = vpop.permute.xlu1 %2379 }
 0xcd4   :  { %v2382_v42 = vadd.f32 %v2380_v14, %v2193_v37  ;;  %v4199_v14 = vld [vmem:[#allocation18 + $0x1] ss:$0 sm:$0xff] }
 0xcd6   :  { %2386 = vrot.lane.b32.xlu0 %v2382_v42, %s6110_s9 }
 0xd48   :  { %v2387_v43 = vpop.permute.xlu0 %2386 }
 0xd49   :  { %v2389_v44 = vsel %vm666_vm5, %v2387_v43, 0.0  ;;  %v4201_v43 = vld [vmem:[%s7796_s17 + $0x48] sm:$0xff] }
 0xd4a   :  { %2390 = vadd.xlane.f32.xlu1 %v2389_v44  ;;  %v4202_v44 = vld [vmem:[%s7796_s17 + $0x50] sm:$0xff] }
 0xd5b   :  { %2411 = vrot.lane.b32.xlu1 %v4185_v45, %s6110_s9 }
 0xdd7   :  { %v2391_v47 = vpop.xlane.xlu1 %2390 }
 0xdd8   :  { %v2392_v48 = vmul.f32 0.015625, %v2391_v47  ;;  %v4203_v47 = vld [vmem:[%s7796_s17 + $0x58] sm:$0xff] }
 0xdda   :  { %v2393_v51 = vsub.f32 %v2382_v42, %v2392_v48  ;;  %v4200_v42 = vld [vmem:[%s7796_s17 + $0x40] sm:$0xff]  ;;  %v5496_v48 = vpack.c.bf16 %v4203_v47, %v4202_v44  ;;  %v4227_v44 = vld [vmem:[#allocation19 + $0x1] ss:$0 sm:$0xff] }
 0xddb   :  { %v2412_v6 = vpop.permute.xlu1 %2411  ;;  %v5493_v45 = vpack.c.bf16 %v4201_v43, %v4200_v42 }
 0xddc   :  { %v2394_v52 = vmul.f32 %v2393_v51, %v2393_v51 }
 0xdde   :  { %2396 = vrot.lane.b32.xlu0 %v2394_v52, %s6110_s9  ;;  %v4205_v52 = vld [vmem:[%s7796_s17 + $0x68] sm:$0xff] }
 0xe50   :  { %v2397_v53 = vpop.permute.xlu0 %2396 }
 0xe51   :  { %v2399_v56 = vsel %vm666_vm5, %v2397_v53, 0.0 }
 0xe52   :  { %2400 = vadd.xlane.f32.xlu0 %v2399_v56  ;;  %v4206_v56 = vld [vmem:[%s7796_s17 + $0x70] sm:$0xff] }
 0xe68   :  { %2420 = vrot.lane.b32.xlu0 %v4186_v57, %s6110_s9  ;;  %v4207_v57 = vld [vmem:[%s7796_s17 + $0x78] sm:$0xff] }
 0xe69   :  { %v5502_v59 = vpack.c.bf16 %v4207_v57, %v4206_v56  ;;  %v4229_v57 = vld [vmem:[#allocation21 + $0x1] ss:$0 sm:$0xff] }
 0xedf   :  { %v2401_v13 = vpop.xlane.xlu0 %2400 }
 0xee0   :  { %v2402_v37 = vmul.f32 0.015625, %v2401_v13 }
 0xee2   :  { %v2403_v41 = vadd.f32 1e-05, %v2402_v37 }
 0xee3   :  { %v2421_v15 = vpop.permute.xlu0 %2420 }
 0xee4   :  { %5750 = vrsqrt.f32 %v2403_v41 }
 0xeee   :  { %v5751_v3 = vpop.eup %5750 }
 0xeef   :  { %v2405_v54 = vmul.f32 %v5751_v3, %v2393_v51  ;;  %v4204_v51 = vld [vmem:[%s7796_s17 + $0x60] sm:$0xff]  ;;  %v5511_v3 = vpack.c.bf16 %v4216_v38, %v4215_v12  ;;  %v5529_v12 = vpack.c.bf16 %v4232_v8, %v4231_v5  ;;  %v4234_v38 = vld [vmem:[%s7792_s13 + $0x98] sm:$0xff] }
 0xef0   :  { %v5499_v53 = vpack.c.bf16 %v4205_v52, %v4204_v51 }
 0xef1   :  { %v2414_v9 = vmul.f32 %v2412_v6, %v2405_v54  ;;  %v4217_v54 = vld [vmem:[%s7798_s19 + $0xb0] sm:$0xff]  ;;  %5512 = vmatpush3.bf16.msra.mxu0 %v5511_v3 }
 0xef2   :  { %5513 = vmatprep.subr.bf16.mxu0 %v6106_v0 }
 0xef3   :  { %v2423_v18 = vadd.f32 %v2421_v15, %v2414_v9  ;;  %v4218_v15 = vld [vmem:[%s7798_s19 + $0xb8] sm:$0xff] }
 0xef5   :  { %2442 = vrot.lane.b32.xlu1 %v2423_v18, %s6110_s9 }
 0xf67   :  { %v2443_v20 = vpop.permute.xlu1 %2442 }
 0xf68   :  { %4874 = vmatmul.mubr.msk.f32.vlgmr.msra.gmra.mrb[22].mxu1 %vm666_vm5, %v2443_v20  ;;  %v5514_v20 = vpack.c.bf16 %v4218_v15, %v4217_v54  ;;  %v4238_v54 = vld [vmem:[%s7792_s13 + $0xb8] sm:$0xff] }
 0xf69   :  { %4892 = vmatprep.mubr.msk.f32.mxu1 %vm6108_vm0, %v6107_v1  ;;  %5494 = vmatpush3.bf16.msra.mxu1 %v5493_v45 }
 0xf6a   :  { %5495 = vmatprep.subr.bf16.mxu1 %v6106_v0  ;;  %5515 = vmatpush3.bf16.msra.mxu0 %v5514_v20 }
 0xf6b   :  { %5516 = vmatprep.subr.bf16.mxu0 %v6106_v0 }
 0xf6d   :  { %5497 = vmatpush3.bf16.msra.mxu1 %v5496_v48 }
 0xf6e   :  { %5498 = vmatprep.subr.bf16.mxu1 %v6106_v0 }
 0xf71   :  { %5500 = vmatpush3.bf16.msra.mxu1 %v5499_v53 }
 0xf72   :  { %5501 = vmatprep.subr.bf16.mxu1 %v6106_v0 }
 0xf75   :  { %5503 = vmatpush3.bf16.msra.mxu1 %v5502_v59 }
 0xf76   :  { %5528 = vmatprep.subr.bf16.mxu1 %v6106_v0 }
0x103b   :  { %v2512_v24 = vpop.f32.mrb[22].mxu1 }
0x103c   :  { %v2513_v25 = vadd.f32 %v4196_v22, %v2512_v24  ;;  %v4875_v26 = vpop.f32.mrb[23].mxu1  ;;  %v4219_v22 = vld [vmem:[%s7798_s19 + $0xc0] sm:$0xff]  ;;  %v4220_v24 = vld [vmem:[%s7798_s19 + $0xc8] sm:$0xff] }
0x103d   :  { %v4221_v26 = vld [vmem:[%s7798_s19 + $0xd0] sm:$0xff] }
0x103e   :  { %2517 = vrot.lane.b32.xlu1 %v2513_v25, %s6110_s9  ;;  %v5517_v25 = vpack.c.bf16 %v4220_v24, %v4219_v22 }
0x1040   :  { %5518 = vmatpush3.bf16.msra.mxu0 %v5517_v25 }
0x1041   :  { %5519 = vmatprep.subr.bf16.mxu0 %v6106_v0 }
0x10b0   :  { %v2518_v23 = vpop.permute.xlu1 %2517 }
0x10b1   :  { %v2520_v27 = vadd.f32 %v2518_v23, %v2423_v18  ;;  %v4222_v23 = vld [vmem:[%s7798_s19 + $0xd8] sm:$0xff] }
0x10b3   :  { %2526 = vrot.lane.b32.xlu0 %v2520_v27, %s6110_s9 }
0x1125   :  { %v2527_v28 = vpop.permute.xlu0 %2526 }
0x1126   :  { %v2529_v29 = vsel %vm666_vm5, %v2527_v28, 0.0  ;;  %v4223_v28 = vld [vmem:[%s7798_s19 + $0xe0] sm:$0xff] }
0x1127   :  { %2530 = vadd.xlane.f32.xlu1 %v2529_v29  ;;  %v4224_v29 = vld [vmem:[%s7798_s19 + $0xe8] sm:$0xff] }
0x1138   :  { %2551 = vrot.lane.b32.xlu1 %v4198_v31, %s6110_s9  ;;  %v5523_v31 = vpack.c.bf16 %v4224_v29, %v4223_v28  ;;  %v4240_v29 = vld [vmem:[%s7793_s14 + $0x2] ss:$0 sm:$0xff] }
0x11b4   :  { %v2531_v32 = vpop.xlane.xlu1 %2530 }
0x11b5   :  { %v2532_v33 = vmul.f32 0.015625, %v2531_v32 }
0x11b7   :  { %v2533_v34 = vsub.f32 %v2520_v27, %v2532_v33  ;;  %v5520_v27 = vpack.c.bf16 %v4222_v23, %v4221_v26  ;;  %v4225_v33 = vld [vmem:[%s7798_s19 + $0xf0] sm:$0xff] }
0x11b8   :  { %v2552_v37 = vpop.permute.xlu1 %2551 }
0x11b9   :  { %v2534_v35 = vmul.f32 %v2533_v34, %v2533_v34  ;;  %5521 = vmatpush3.bf16.msra.mxu0 %v5520_v27 }
0x11ba   :  { %5522 = vmatprep.subr.bf16.mxu0 %v6106_v0 }
0x11bb   :  { %2536 = vrot.lane.b32.xlu0 %v2534_v35, %s6110_s9 }
0x11bd   :  { %5524 = vmatpush3.bf16.msra.mxu0 %v5523_v31 }
0x11be   :  { %5525 = vmatprep.subr.bf16.mxu0 %v6106_v0 }
0x122d   :  { %v2537_v36 = vpop.permute.xlu0 %2536 }
0x122e   :  { %v2539_v40 = vsel %vm666_vm5, %v2537_v36, 0.0  ;;  %v4209_v36 = vld [vmem:[%s7797_s18 + $0x1] ss:$0 sm:$0xff] }
0x122f   :  { %2540 = vadd.xlane.f32.xlu0 %v2539_v40 }
0x1245   :  { %2560 = vrot.lane.b32.xlu0 %v4199_v14, %s6110_s9 }
0x12bc   :  { %v2541_v60 = vpop.xlane.xlu0 %2540 }
0x12bd   :  { %v2542_v61 = vmul.f32 0.015625, %v2541_v60 }
0x12bf   :  { %v2543_v62 = vadd.f32 1e-05, %v2542_v61 }
0x12c0   :  { %v2561_v6 = vpop.permute.xlu0 %2560 }
0x12c1   :  { %5752 = vrsqrt.f32 %v2543_v62 }
0x12cb   :  { %v5753_v13 = vpop.eup %5752 }
0x12cc   :  { %v2545_v41 = vmul.f32 %v5753_v13, %v2533_v34  ;;  %v4226_v34 = vld [vmem:[%s7798_s19 + $0xf8] sm:$0xff]  ;;  %v5532_v13 = vpack.c.bf16 %v4234_v38, %v4233_v10  ;;  %v4255_v38 = vld [vmem:[%s7798_s19 + $0x100] sm:$0xff] }
0x12cd   :  { %v5526_v35 = vpack.c.bf16 %v4226_v34, %v4225_v33 }
0x12ce   :  { %v2554_v9 = vmul.f32 %v2552_v37, %v2545_v41  ;;  %v4235_v37 = vld [vmem:[%s7792_s13 + $0xa0] sm:$0xff]  ;;  %v4236_v41 = vld [vmem:[%s7792_s13 + $0xa8] sm:$0xff] }
0x12cf   :  { %5527 = vmatpush3.bf16.msra.mxu0 %v5526_v35  ;;  %v5535_v3 = vpack.c.bf16 %v4236_v41, %v4235_v37  ;;  %v4257_v37 = vld [vmem:[%s7798_s19 + $0x110] sm:$0xff] }
0x12d0   :  { %v2563_v18 = vadd.f32 %v2561_v6, %v2554_v9  ;;  %5552 = vmatprep.subr.bf16.mxu0 %v6106_v0  ;;  %v4237_v6 = vld [vmem:[%s7792_s13 + $0xb0] sm:$0xff] }
0x12d1   :  { %v5538_v15 = vpack.c.bf16 %v4238_v54, %v4237_v6  ;;  %v4259_v54 = vld [vmem:[%s7798_s19 + $0x120] sm:$0xff] }
0x12d2   :  { %2582 = vrot.lane.b32.xlu1 %v2563_v18, %s6110_s9 }
0x1344   :  { %v2583_v32 = vpop.permute.xlu1 %2582 }
0x1345   :  { %4893 = vmatmul.mubr.msk.f32.vlgmr.msra.gmra.mrb[24].mxu1 %vm666_vm5, %v2583_v32 }
0x1346   :  { %4946 = vmatprep.mubr.msk.f32.mxu1 %vm6108_vm0, %v6107_v1  ;;  %5530 = vmatpush3.bf16.msra.mxu1 %v5529_v12 }
0x1347   :  { %5531 = vmatprep.subr.bf16.mxu1 %v6106_v0 }
0x134a   :  { %5533 = vmatpush3.bf16.msra.mxu1 %v5532_v13  ;;  %v4256_v13 = vld [vmem:[%s7798_s19 + $0x108] sm:$0xff] }
0x134b   :  { %5534 = vmatprep.subr.bf16.mxu1 %v6106_v0  ;;  %v5553_v41 = vpack.c.bf16 %v4256_v13, %v4255_v38 }
0x134e   :  { %5536 = vmatpush3.bf16.msra.mxu1 %v5535_v3  ;;  %v4258_v3 = vld [vmem:[%s7798_s19 + $0x118] sm:$0xff] }
0x134f   :  { %5537 = vmatprep.subr.bf16.mxu1 %v6106_v0  ;;  %v5556_v6 = vpack.c.bf16 %v4258_v3, %v4257_v37  ;;  %v4274_v37 = vld [vmem:[%s7801_s22 + $0x2] ss:$0 sm:$0xff]  ;;  %v4276_v3 = vld [vmem:[%s7792_s13 + $0xc8] sm:$0xff] }
0x1352   :  { %5539 = vmatpush3.bf16.msra.mxu1 %v5538_v15  ;;  %v4260_v15 = vld [vmem:[%s7798_s19 + $0x128] sm:$0xff] }
0x1353   :  { %5540 = vmatprep.subr.bf16.mxu1 %v6106_v0 }
0x1418   :  { %v2652_v40 = vpop.f32.mrb[24].mxu1 }
0x1419   :  { %v2653_v14 = vadd.f32 %v4209_v36, %v2652_v40  ;;  %v4894_v42 = vpop.f32.mrb[25].mxu1 }
0x141b   :  { %v2656_v43 = vmax.f32 %v2653_v14, 0.0  ;;  %v4242_v14 = vld [vmem:[#allocation16 + $0x2] ss:$0 sm:$0xff] }
0x141d   :  { %4928 = vmatmul.mubr.f32.vlgmr.msra.gmra.mrb[20].mxu0 %v2656_v43 }
0x141e   :  { %5000 = vmatprep.mubr.msk.f32.mxu0 %vm6108_vm0, %v6107_v1  ;;  %5554 = vmatpush3.bf16.msra.mxu0 %v5553_v41  ;;  %v4275_v41 = vld [vmem:[%s7792_s13 + $0xc0] sm:$0xff] }
0x141f   :  { %5555 = vmatprep.subr.bf16.mxu0 %v6106_v0 }
0x1422   :  { %5557 = vmatpush3.bf16.msra.mxu0 %v5556_v6  ;;  %v4277_v6 = vld [vmem:[%s7792_s13 + $0xd0] sm:$0xff] }
0x1423   :  { %5558 = vmatprep.subr.bf16.mxu0 %v6106_v0 }
0x14f0   :  { %v2748_v45 = vpop.f32.mrb[20].mxu0 }
0x14f1   :  { %v2749_v47 = vadd.f32 %v4227_v44, %v2748_v45  ;;  %v4929_v48 = vpop.f32.mrb[21].mxu0 }
0x14f3   :  { %2753 = vrot.lane.b32.xlu1 %v2749_v47, %s6110_s9 }
0x1565   :  { %v2754_v51 = vpop.permute.xlu1 %2753 }
0x1566   :  { %v2756_v52 = vadd.f32 %v2754_v51, %v2563_v18  ;;  %v4243_v51 = vld [vmem:[#allocation18 + $0x2] ss:$0 sm:$0xff] }
0x1568   :  { %2762 = vrot.lane.b32.xlu0 %v2756_v52, %s6110_s9 }
0x15da   :  { %v2763_v53 = vpop.permute.xlu0 %2762 }
0x15db   :  { %v2765_v56 = vsel %vm666_vm5, %v2763_v53, 0.0  ;;  %v4245_v53 = vld [vmem:[%s7796_s17 + $0x88] sm:$0xff] }
0x15dc   :  { %2766 = vadd.xlane.f32.xlu1 %v2765_v56  ;;  %v4246_v56 = vld [vmem:[%s7796_s17 + $0x90] sm:$0xff] }
0x15ed   :  { %2787 = vrot.lane.b32.xlu1 %v4229_v57, %s6110_s9 }
0x1669   :  { %v2767_v59 = vpop.xlane.xlu1 %2766 }
0x166a   :  { %v2768_v60 = vmul.f32 0.015625, %v2767_v59  ;;  %v4247_v59 = vld [vmem:[%s7796_s17 + $0x98] sm:$0xff] }
0x166c   :  { %v2769_v61 = vsub.f32 %v2756_v52, %v2768_v60  ;;  %v4244_v52 = vld [vmem:[%s7796_s17 + $0x80] sm:$0xff]  ;;  %v5544_v60 = vpack.c.bf16 %v4247_v59, %v4246_v56  ;;  %v4271_v56 = vld [vmem:[#allocation19 + $0x2] ss:$0 sm:$0xff] }
0x166d   :  { %v2788_v24 = vpop.permute.xlu1 %2787  ;;  %v5541_v57 = vpack.c.bf16 %v4245_v53, %v4244_v52 }
0x166e   :  { %v2770_v62 = vmul.f32 %v2769_v61, %v2769_v61 }
0x1670   :  { %2772 = vrot.lane.b32.xlu0 %v2770_v62, %s6110_s9  ;;  %v4249_v62 = vld [vmem:[%s7796_s17 + $0xa8] sm:$0xff] }
0x16e2   :  { %v2773_v63 = vpop.permute.xlu0 %2772 }
0x16e3   :  { %v2775_v2 = vsel %vm666_vm5, %v2773_v63, 0.0 }
0x16e4   :  { %2776 = vadd.xlane.f32.xlu0 %v2775_v2  ;;  %v4250_v2 = vld [vmem:[%s7796_s17 + $0xb0] sm:$0xff] }
0x16fa   :  { %2796 = vrot.lane.b32.xlu0 %v4230_v4, %s6110_s9  ;;  %v4251_v4 = vld [vmem:[%s7796_s17 + $0xb8] sm:$0xff] }
0x16fb   :  { %v5550_v5 = vpack.c.bf16 %v4251_v4, %v4250_v2  ;;  %v4273_v4 = vld [vmem:[#allocation21 + $0x2] ss:$0 sm:$0xff] }
0x1771   :  { %v2777_v9 = vpop.xlane.xlu0 %2776 }
0x1772   :  { %v2778_v18 = vmul.f32 0.015625, %v2777_v9 }
0x1774   :  { %v2779_v20 = vadd.f32 1e-05, %v2778_v18 }
0x1775   :  { %v2797_v26 = vpop.permute.xlu0 %2796 }
0x1776   :  { %5754 = vrsqrt.f32 %v2779_v20 }
0x1780   :  { %v5755_v22 = vpop.eup %5754 }
0x1781   :  { %v2781_v25 = vmul.f32 %v5755_v22, %v2769_v61  ;;  %v4248_v61 = vld [vmem:[%s7796_s17 + $0xa0] sm:$0xff]  ;;  %v5559_v22 = vpack.c.bf16 %v4260_v15, %v4259_v54  ;;  %v5577_v54 = vpack.c.bf16 %v4276_v3, %v4275_v41  ;;  %v4278_v15 = vld [vmem:[%s7792_s13 + $0xd8] sm:$0xff] }
0x1782   :  { %v5547_v63 = vpack.c.bf16 %v4249_v62, %v4248_v61 }
0x1783   :  { %v2790_v23 = vmul.f32 %v2788_v24, %v2781_v25  ;;  %v4261_v25 = vld [vmem:[%s7798_s19 + $0x130] sm:$0xff]  ;;  %5560 = vmatpush3.bf16.msra.mxu0 %v5559_v22 }
0x1784   :  { %5561 = vmatprep.subr.bf16.mxu0 %v6106_v0 }
0x1785   :  { %v2799_v27 = vadd.f32 %v2797_v26, %v2790_v23  ;;  %v4262_v26 = vld [vmem:[%s7798_s19 + $0x138] sm:$0xff] }
0x1787   :  { %2818 = vrot.lane.b32.xlu1 %v2799_v27, %s6110_s9 }
0x17f9   :  { %v2819_v28 = vpop.permute.xlu1 %2818 }
0x17fa   :  { %4947 = vmatmul.mubr.msk.f32.vlgmr.msra.gmra.mrb[26].mxu1 %vm666_vm5, %v2819_v28  ;;  %v5562_v28 = vpack.c.bf16 %v4262_v26, %v4261_v25  ;;  %v4282_v25 = vld [vmem:[%s7792_s13 + $0xf8] sm:$0xff] }
0x17fb   :  { %4965 = vmatprep.mubr.msk.f32.mxu1 %vm6108_vm0, %v6107_v1  ;;  %5542 = vmatpush3.bf16.msra.mxu1 %v5541_v57 }
0x17fc   :  { %5543 = vmatprep.subr.bf16.mxu1 %v6106_v0  ;;  %5563 = vmatpush3.bf16.msra.mxu0 %v5562_v28 }
0x17fd   :  { %5564 = vmatprep.subr.bf16.mxu0 %v6106_v0 }
0x17ff   :  { %5545 = vmatpush3.bf16.msra.mxu1 %v5544_v60 }
0x1800   :  { %5546 = vmatprep.subr.bf16.mxu1 %v6106_v0 }
0x1803   :  { %5548 = vmatpush3.bf16.msra.mxu1 %v5547_v63 }
0x1804   :  { %5549 = vmatprep.subr.bf16.mxu1 %v6106_v0 }
0x1807   :  { %5551 = vmatpush3.bf16.msra.mxu1 %v5550_v5 }
0x1808   :  { %5576 = vmatprep.subr.bf16.mxu1 %v6106_v0 }
0x18cd   :  { %v2888_v31 = vpop.f32.mrb[26].mxu1 }
0x18ce   :  { %v2889_v32 = vadd.f32 %v4240_v29, %v2888_v31  ;;  %v4948_v33 = vpop.f32.mrb[27].mxu1  ;;  %v4263_v29 = vld [vmem:[%s7798_s19 + $0x140] sm:$0xff]  ;;  %v4264_v31 = vld [vmem:[%s7798_s19 + $0x148] sm:$0xff] }
0x18cf   :  { %v4265_v33 = vld [vmem:[%s7798_s19 + $0x150] sm:$0xff] }
0x18d0   :  { %2893 = vrot.lane.b32.xlu1 %v2889_v32, %s6110_s9  ;;  %v5565_v32 = vpack.c.bf16 %v4264_v31, %v4263_v29 }
0x18d2   :  { %5566 = vmatpush3.bf16.msra.mxu0 %v5565_v32 }
0x18d3   :  { %5567 = vmatprep.subr.bf16.mxu0 %v6106_v0 }
0x1942   :  { %v2894_v34 = vpop.permute.xlu1 %2893 }
0x1943   :  { %v2896_v35 = vadd.f32 %v2894_v34, %v2799_v27  ;;  %v4266_v34 = vld [vmem:[%s7798_s19 + $0x158] sm:$0xff] }
0x1945   :  { %2902 = vrot.lane.b32.xlu0 %v2896_v35, %s6110_s9 }
0x19b7   :  { %v2903_v36 = vpop.permute.xlu0 %2902 }
0x19b8   :  { %v2905_v40 = vsel %vm666_vm5, %v2903_v36, 0.0  ;;  %v4267_v36 = vld [vmem:[%s7798_s19 + $0x160] sm:$0xff] }
0x19b9   :  { %2906 = vadd.xlane.f32.xlu1 %v2905_v40  ;;  %v4268_v40 = vld [vmem:[%s7798_s19 + $0x168] sm:$0xff] }
0x19ca   :  { %2927 = vrot.lane.b32.xlu1 %v4242_v14, %s6110_s9  ;;  %v5571_v14 = vpack.c.bf16 %v4268_v40, %v4267_v36  ;;  %v4284_v40 = vld [vmem:[%s7793_s14 + $0x3] ss:$0 sm:$0xff] }
0x1a46   :  { %v2907_v42 = vpop.xlane.xlu1 %2906 }
0x1a47   :  { %v2908_v43 = vmul.f32 0.015625, %v2907_v42 }
0x1a49   :  { %v2909_v44 = vsub.f32 %v2896_v35, %v2908_v43  ;;  %v5568_v35 = vpack.c.bf16 %v4266_v34, %v4265_v33  ;;  %v4269_v43 = vld [vmem:[%s7798_s19 + $0x170] sm:$0xff] }
0x1a4a   :  { %v2928_v18 = vpop.permute.xlu1 %2927 }
0x1a4b   :  { %v2910_v45 = vmul.f32 %v2909_v44, %v2909_v44  ;;  %5569 = vmatpush3.bf16.msra.mxu0 %v5568_v35 }
0x1a4c   :  { %5570 = vmatprep.subr.bf16.mxu0 %v6106_v0 }
0x1a4d   :  { %2912 = vrot.lane.b32.xlu0 %v2910_v45, %s6110_s9 }
0x1a4f   :  { %5572 = vmatpush3.bf16.msra.mxu0 %v5571_v14 }
0x1a50   :  { %5573 = vmatprep.subr.bf16.mxu0 %v6106_v0 }
0x1abf   :  { %v2913_v47 = vpop.permute.xlu0 %2912 }
0x1ac0   :  { %v2915_v48 = vsel %vm666_vm5, %v2913_v47, 0.0  ;;  %v4253_v47 = vld [vmem:[%s7797_s18 + $0x2] ss:$0 sm:$0xff] }
0x1ac1   :  { %2916 = vadd.xlane.f32.xlu0 %v2915_v48 }
0x1ad7   :  { %2936 = vrot.lane.b32.xlu0 %v4243_v51, %s6110_s9 }
0x1b4e   :  { %v2917_v8 = vpop.xlane.xlu0 %2916 }
0x1b4f   :  { %v2918_v10 = vmul.f32 0.015625, %v2917_v8 }
0x1b51   :  { %v2919_v12 = vadd.f32 1e-05, %v2918_v10 }
0x1b52   :  { %v2937_v24 = vpop.permute.xlu0 %2936 }
0x1b53   :  { %5756 = vrsqrt.f32 %v2919_v12 }
0x1b5d   :  { %v5757_v9 = vpop.eup %5756 }
0x1b5e   :  { %v2921_v20 = vmul.f32 %v5757_v9, %v2909_v44  ;;  %v4270_v44 = vld [vmem:[%s7798_s19 + $0x178] sm:$0xff]  ;;  %v5580_v9 = vpack.c.bf16 %v4278_v15, %v4277_v6 }
0x1b5f   :  { %v5574_v45 = vpack.c.bf16 %v4270_v44, %v4269_v43 }
0x1b60   :  { %v2930_v23 = vmul.f32 %v2928_v18, %v2921_v20  ;;  %v4279_v18 = vld [vmem:[%s7792_s13 + $0xe0] sm:$0xff]  ;;  %v4280_v20 = vld [vmem:[%s7792_s13 + $0xe8] sm:$0xff] }
0x1b61   :  { %5575 = vmatpush3.bf16.msra.mxu0 %v5574_v45  ;;  %v5583_v22 = vpack.c.bf16 %v4280_v20, %v4279_v18 }
0x1b62   :  { %v2939_v27 = vadd.f32 %v2937_v24, %v2930_v23  ;;  %5600 = vmatprep.subr.bf16.mxu0 %v6106_v0  ;;  %v4281_v24 = vld [vmem:[%s7792_s13 + $0xf0] sm:$0xff]  ;;  %s6111_s13 = smov 96  }
0x1b63   :  { %v5586_v26 = vpack.c.bf16 %v4282_v25, %v4281_v24  ;;  %v4299_v25 = vld [vmem:[%s7798_s19 + $0x180] sm:$0xff] }
0x1b64   :  { %2958 = vrot.lane.b32.xlu1 %v2939_v27, %s6110_s9 }
0x1bd6   :  { %v2959_v42 = vpop.permute.xlu1 %2958 }
0x1bd7   :  { %4966 = vmatmul.mubr.msk.f32.vlgmr.msra.gmra.mrb[28].mxu1 %vm666_vm5, %v2959_v42 }
0x1bd8   :  { %5019 = vmatprep.mubr.msk.f32.mxu1 %vm6108_vm0, %v6107_v1  ;;  %5578 = vmatpush3.bf16.msra.mxu1 %v5577_v54 }
0x1bd9   :  { %5579 = vmatprep.subr.bf16.mxu1 %v6106_v0 }
0x1bdc   :  { %5581 = vmatpush3.bf16.msra.mxu1 %v5580_v9 }
0x1bdd   :  { %5582 = vmatprep.subr.bf16.mxu1 %v6106_v0 }
0x1be0   :  { %5584 = vmatpush3.bf16.msra.mxu1 %v5583_v22 }
0x1be1   :  { %5585 = vmatprep.subr.bf16.mxu1 %v6106_v0 }
0x1be4   :  { %5587 = vmatpush3.bf16.msra.mxu1 %v5586_v26  ;;  %v4300_v26 = vld [vmem:[%s7798_s19 + $0x188] sm:$0xff] }
0x1be5   :  { %5588 = vmatprep.subr.bf16.mxu1 %v6106_v0 }
0x1caa   :  { %v3028_v48 = vpop.f32.mrb[28].mxu1 }
0x1cab   :  { %v3029_v51 = vadd.f32 %v4253_v47, %v3028_v48  ;;  %v4967_v52 = vpop.f32.mrb[29].mxu1 }
0x1cad   :  { %v3032_v53 = vmax.f32 %v3029_v51, 0.0  ;;  %v4286_v51 = vld [vmem:[#allocation16 + $0x3] ss:$0 sm:$0xff] }
0x1caf   :  { %5001 = vmatmul.mubr.f32.vlgmr.msra.gmra.mrb[22].mxu0 %v3032_v53 }
0x1cb0   :  { %5073 = vmatprep.mubr.msk.f32.mxu0 %vm6108_vm0, %v6107_v1 }
0x1d82   :  { %v3124_v57 = vpop.f32.mrb[22].mxu0 }
0x1d83   :  { %v3125_v59 = vadd.f32 %v4271_v56, %v3124_v57  ;;  %v5002_v60 = vpop.f32.mrb[23].mxu0 }
0x1d85   :  { %3129 = vrot.lane.b32.xlu1 %v3125_v59, %s6110_s9 }
0x1df7   :  { %v3130_v61 = vpop.permute.xlu1 %3129 }
0x1df8   :  { %v3132_v62 = vadd.f32 %v3130_v61, %v2939_v27  ;;  %v4287_v61 = vld [vmem:[#allocation18 + $0x3] ss:$0 sm:$0xff] }
0x1dfa   :  { %3138 = vrot.lane.b32.xlu0 %v3132_v62, %s6110_s9 }
0x1e6c   :  { %v3139_v63 = vpop.permute.xlu0 %3138 }
0x1e6d   :  { %v3141_v2 = vsel %vm666_vm5, %v3139_v63, 0.0  ;;  %v4289_v63 = vld [vmem:[%s7796_s17 + $0xc8] sm:$0xff] }
0x1e6e   :  { %3142 = vadd.xlane.f32.xlu1 %v3141_v2  ;;  %v4290_v2 = vld [vmem:[%s7796_s17 + $0xd0] sm:$0xff] }
0x1e7f   :  { %3163 = vrot.lane.b32.xlu1 %v4273_v4, %s6110_s9 }
0x1efb   :  { %v3143_v5 = vpop.xlane.xlu1 %3142 }
0x1efc   :  { %v3144_v8 = vmul.f32 0.015625, %v3143_v5  ;;  %v4291_v5 = vld [vmem:[%s7796_s17 + $0xd8] sm:$0xff] }
0x1efe   :  { %v3145_v10 = vsub.f32 %v3132_v62, %v3144_v8  ;;  %v4288_v62 = vld [vmem:[%s7796_s17 + $0xc0] sm:$0xff]  ;;  %v5592_v8 = vpack.c.bf16 %v4291_v5, %v4290_v2  ;;  %v3559_v5 = vld [vmem:[%s7802_s23 + $0x38] sm:$0xff] }
0x1eff   :  { %v3164_v31 = vpop.permute.xlu1 %3163  ;;  %v5589_v4 = vpack.c.bf16 %v4289_v63, %v4288_v62  ;;  %v3556_v62 = vld [vmem:[%s7802_s23 + $0x20] sm:$0xff]  ;;  %v3557_v63 = vld [vmem:[%s7802_s23 + $0x28] sm:$0xff] }
0x1f00   :  { %v3146_v12 = vmul.f32 %v3145_v10, %v3145_v10  ;;  %v5631_v2 = vpack.c.bf16 %v3557_v63, %v3556_v62 }
0x1f02   :  { %3148 = vrot.lane.b32.xlu0 %v3146_v12, %s6110_s9  ;;  %v4293_v12 = vld [vmem:[%s7796_s17 + $0xe8] sm:$0xff] }
0x1f74   :  { %v3149_v38 = vpop.permute.xlu0 %3148 }
0x1f75   :  { %v3151_v13 = vsel %vm666_vm5, %v3149_v38, 0.0 }
0x1f76   :  { %3152 = vadd.xlane.f32.xlu0 %v3151_v13  ;;  %v4294_v13 = vld [vmem:[%s7796_s17 + $0xf0] sm:$0xff] }
0x1f8c   :  { %3172 = vrot.lane.b32.xlu0 %v4274_v37, %s6110_s9  ;;  %v4295_v37 = vld [vmem:[%s7796_s17 + $0xf8] sm:$0xff] }
0x1f8d   :  { %v5598_v41 = vpack.c.bf16 %v4295_v37, %v4294_v13  ;;  %v3640_v37 = vld [vmem:[%s7804_s25] sm:$0xff] }
0x2003   :  { %v3153_v23 = vpop.xlane.xlu0 %3152 }
0x2004   :  { %v3154_v27 = vmul.f32 0.015625, %v3153_v23  ;;  %v4301_v23 = vld [vmem:[%s7798_s19 + $0x190] sm:$0xff] }
0x2006   :  { %v3155_v28 = vadd.f32 1e-05, %v3154_v27  ;;  %v5601_v27 = vpack.c.bf16 %v4300_v26, %v4299_v25  ;;  %v3644_v25 = vld [vmem:[%s7804_s25 + $0x20] sm:$0xff]  ;;  %v3645_v26 = vld [vmem:[%s7804_s25 + $0x28] sm:$0xff] }
0x2007   :  { %v3173_v33 = vpop.permute.xlu0 %3172 }
0x2008   :  { %5758 = vrsqrt.f32 %v3155_v28  ;;  %v4302_v28 = vld [vmem:[%s7798_s19 + $0x198] sm:$0xff]  ;;  %5602 = vmatpush3.bf16.msra.mxu0 %v5601_v27  ;;  %v3646_v27 = vld [vmem:[%s7804_s25 + $0x30] sm:$0xff] }
0x2009   :  { %5603 = vmatprep.subr.bf16.mxu0 %v6106_v0 }
0x2012   :  { %v5759_v29 = vpop.eup %5758 }
0x2013   :  { %v3157_v32 = vmul.f32 %v5759_v29, %v3145_v10  ;;  %v4292_v10 = vld [vmem:[%s7796_s17 + $0xe0] sm:$0xff]  ;;  %v5604_v29 = vpack.c.bf16 %v4302_v28, %v4301_v23  ;;  %v5649_v23 = vpack.c.bf16 %v3645_v26, %v3644_v25  ;;  %v3647_v28 = vld [vmem:[%s7804_s25 + $0x38] sm:$0xff] }
0x2014   :  { %v5595_v38 = vpack.c.bf16 %v4293_v12, %v4292_v10  ;;  %v449_v10 = vmax.f32 %v6559_v46, 0.0  ;;  %v4313_v12 = vld [vmem:[%s7798_s19 + $0x1f0] sm:$0xff]  ;;  %v4297_v46 = vld [vmem:[%s7797_s18 + $0x3] ss:$0 sm:$0xff] }
0x2015   :  { %v3166_v34 = vmul.f32 %v3164_v31, %v3157_v32  ;;  %v4303_v31 = vld [vmem:[%s7798_s19 + $0x1a0] sm:$0xff]  ;;  %v4304_v32 = vld [vmem:[%s7798_s19 + $0x1a8] sm:$0xff]  ;;  %5605 = vmatpush3.bf16.msra.mxu0 %v5604_v29 }
0x2016   :  { %5606 = vmatprep.subr.bf16.mxu0 %v6106_v0  ;;  %v4101_v29 = vld [vmem:[%s7850_s3] ss:$0 sm:$0xff] }
0x2017   :  { %v3175_v35 = vadd.f32 %v3173_v33, %v3166_v34  ;;  %v5607_v33 = vpack.c.bf16 %v4304_v32, %v4303_v31  ;;  %v4305_v34 = vld [vmem:[%s7798_s19 + $0x1b0] sm:$0xff]  ;;  %v5652_v31 = vpack.c.bf16 %v3647_v28, %v3646_v27  ;;  %v540_v32 = vadd.f32 %v4101_v29, %v6619_v11 }
0x2019   :  { %3194 = vrot.lane.b32.xlu1 %v3175_v35, %s6110_s9  ;;  %5608 = vmatpush3.bf16.msra.mxu0 %v5607_v33 }
0x201a   :  { %5609 = vmatprep.subr.bf16.mxu0 %v6106_v0 }
0x208b   :  { %v3195_v36 = vpop.permute.xlu1 %3194 }
0x208c   :  { %5020 = vmatmul.mubr.msk.f32.vlgmr.msra.gmra.mrb[30].mxu1 %vm666_vm5, %v3195_v36 }
0x208d   :  { %5038 = vmatprep.mubr.msk.f32.mxu1 %vm6108_vm0, %v6107_v1  ;;  %5590 = vmatpush3.bf16.msra.mxu1 %v5589_v4  ;;  %v3558_v4 = vld [vmem:[%s7802_s23 + $0x30] sm:$0xff] }
0x208e   :  { %5591 = vmatprep.subr.bf16.mxu1 %v6106_v0 }
0x2091   :  { %5593 = vmatpush3.bf16.msra.mxu1 %v5592_v8  ;;  %v5634_v8 = vpack.c.bf16 %v3559_v5, %v3558_v4 }
0x2092   :  { %5594 = vmatprep.subr.bf16.mxu1 %v6106_v0 }
0x2095   :  { %5596 = vmatpush3.bf16.msra.mxu1 %v5595_v38  ;;  %v4314_v38 = vld [vmem:[%s7798_s19 + $0x1f8] sm:$0xff] }
0x2096   :  { %5597 = vmatprep.subr.bf16.mxu1 %v6106_v0  ;;  %v5622_v13 = vpack.c.bf16 %v4314_v38, %v4313_v12 }
0x2099   :  { %5599 = vmatpush3.bf16.msra.mxu1 %v5598_v41  ;;  %v3641_v41 = vld [vmem:[%s7804_s25 + $0x8] sm:$0xff] }
0x209a   :  { %5624 = vmatprep.subr.bf16.mxu1 %v6106_v0 }
0x215f   :  { %v3264_v14 = vpop.f32.mrb[30].mxu1 }
0x2160   :  { %v3265_v42 = vadd.f32 %v4284_v40, %v3264_v14  ;;  %v5021_v43 = vpop.f32.mrb[31].mxu1  ;;  %v4307_v40 = vld [vmem:[%s7798_s19 + $0x1c0] sm:$0xff]  ;;  %v4308_v14 = vld [vmem:[%s7798_s19 + $0x1c8] sm:$0xff] }
0x2161   :  { %v4309_v43 = vld [vmem:[%s7798_s19 + $0x1d0] sm:$0xff] }
0x2162   :  { %3269 = vrot.lane.b32.xlu1 %v3265_v42, %s6110_s9  ;;  %v5613_v42 = vpack.c.bf16 %v4308_v14, %v4307_v40 }
0x21d4   :  { %v3270_v44 = vpop.permute.xlu1 %3269 }
0x21d5   :  { %v3272_v45 = vadd.f32 %v3270_v44, %v3175_v35  ;;  %v4306_v35 = vld [vmem:[%s7798_s19 + $0x1b8] sm:$0xff] }
0x21d6   :  { %v5610_v36 = vpack.c.bf16 %v4306_v35, %v4305_v34  ;;  %v4310_v44 = vld [vmem:[%s7798_s19 + $0x1d8] sm:$0xff]  ;;  %v543_v35 = vmax.f32 %v540_v32, 0.0 }
0x21d7   :  { %3278 = vrot.lane.b32.xlu0 %v3272_v45, %s6110_s9 }
0x21d8   :  { %5611 = vmatpush3.bf16.msra.mxu0 %v5610_v36  ;;  %v4315_v36 = vld [vmem:[#allocation19 + $0x3] ss:$0 sm:$0xff] }
0x21d9   :  { %5612 = vmatprep.subr.bf16.mxu0 %v6106_v0 }
0x21dc   :  { %5614 = vmatpush3.bf16.msra.mxu0 %v5613_v42 }
0x21dd   :  { %5615 = vmatprep.subr.bf16.mxu0 %v6106_v0 }
0x2249   :  { %v3279_v47 = vpop.permute.xlu0 %3278 }
0x224a   :  { %v3281_v48 = vsel %vm666_vm5, %v3279_v47, 0.0  ;;  %v4311_v47 = vld [vmem:[%s7798_s19 + $0x1e0] sm:$0xff] }
0x224b   :  { %3282 = vadd.xlane.f32.xlu1 %v3281_v48  ;;  %v4312_v48 = vld [vmem:[%s7798_s19 + $0x1e8] sm:$0xff] }
0x225c   :  { %3303 = vrot.lane.b32.xlu1 %v4286_v51, %s6110_s9  ;;  %v5619_v51 = vpack.c.bf16 %v4312_v48, %v4311_v47  ;;  %v7589_v47 = vld [vmem:[#allocation13] ss:$0 sm:$0xff] }
0x225d   :  { %v1499_v12 = vadd.f32 %v7589_v47, %v6770_v21 }
0x22d8   :  { %v3283_v52 = vpop.xlane.xlu1 %3282 }
0x22d9   :  { %v3284_v53 = vmul.f32 0.015625, %v3283_v52  ;;  %v3552_v52 = vld [vmem:[%s7802_s23] sm:$0xff] }
0x22db   :  { %v3285_v56 = vsub.f32 %v3272_v45, %v3284_v53  ;;  %v5616_v45 = vpack.c.bf16 %v4310_v44, %v4309_v43  ;;  %v3553_v53 = vld [vmem:[%s7802_s23 + $0x8] sm:$0xff] }
0x22dc   :  { %v3304_v9 = vpop.permute.xlu1 %3303 }
0x22dd   :  { %v3286_v57 = vmul.f32 %v3285_v56, %v3285_v56  ;;  %5617 = vmatpush3.bf16.msra.mxu0 %v5616_v45 }
0x22de   :  { %5618 = vmatprep.subr.bf16.mxu0 %v6106_v0 }
0x22df   :  { %3288 = vrot.lane.b32.xlu0 %v3286_v57, %s6110_s9  ;;  %v3554_v57 = vld [vmem:[%s7802_s23 + $0x10] sm:$0xff] }
0x22e1   :  { %5620 = vmatpush3.bf16.msra.mxu0 %v5619_v51 }
0x22e2   :  { %5621 = vmatprep.subr.bf16.mxu0 %v6106_v0 }
0x22e5   :  { %5623 = vmatpush3.bf16.msra.mxu0 %v5622_v13  ;;  %v1501_v13 = vadd.f32 %v7589_v47, %v6768_v19 }
0x22e6   :  { %5642 = vmatprep.subr.bf16.mxu0 %v6106_v0 }
0x2351   :  { %v3289_v59 = vpop.permute.xlu0 %3288 }
0x2352   :  { %v3291_v60 = vsel %vm666_vm5, %v3289_v59, 0.0  ;;  %v3555_v59 = vld [vmem:[%s7802_s23 + $0x18] sm:$0xff]  ;;  %s7851_s23 = sld [smem:[#allocation42_spill]] }
0x2353   :  { %3292 = vadd.xlane.f32.xlu0 %v3291_v60 }
0x2369   :  { %3312 = vrot.lane.b32.xlu0 %v4287_v61, %s6110_s9  ;;  %v5628_v61 = vpack.c.bf16 %v3555_v59, %v3554_v57 }
0x23e0   :  { %v3293_v3 = vpop.xlane.xlu0 %3292 }
0x23e1   :  { %v3294_v6 = vmul.f32 0.015625, %v3293_v3 }
0x23e3   :  { %v3295_v54 = vadd.f32 1e-05, %v3294_v6 }
0x23e4   :  { %v3313_v20 = vpop.permute.xlu0 %3312 }
0x23e5   :  { %5760 = vrsqrt.f32 %v3295_v54 }
0x23ef   :  { %v5761_v15 = vpop.eup %5760 }
0x23f0   :  { %v3297_v18 = vmul.f32 %v5761_v15, %v3285_v56  ;;  %v5625_v56 = vpack.c.bf16 %v3553_v53, %v3552_v52  ;;  %v5643_v15 = vpack.c.bf16 %v3641_v41, %v3640_v37  ;;  %v1952_v37 = vld [vmem:[#allocation15 + $0x6] sm:$0x3] }
0x23f1   :  { %v1957_v41 = vrot.slane %v1952_v37, %v6551_v39 }
0x23f2   :  { %v3306_v22 = vmul.f32 %v3304_v9, %v3297_v18  ;;  %v3642_v18 = vld [vmem:[%s7804_s25 + $0x10] sm:$0xff] }
0x23f4   :  { %v7445_v24 = vadd.f32 %v3313_v20, %v3306_v22  ;;  %v3643_v20 = vld [vmem:[%s7804_s25 + $0x18] sm:$0xff] }
0x23f5   :  { %v5646_v22 = vpack.c.bf16 %v3643_v20, %v3642_v18 }
0x23f6   :  { %3334 = vrot.lane.b32.xlu1 %v7445_v24, %s6110_s9 }
0x2468   :  { %v3335_v60 = vpop.permute.xlu1 %3334 }
0x2469   :  { %5039 = vmatmul.mubr.msk.f32.vlgmr.msra.gmra.mrb[32].mxu1 %vm666_vm5, %v3335_v60 }
0x246a   :  { %5626 = vmatpush3.bf16.msra.mxu1 %v5625_v56  ;;  %5092 = vmatprep.mubr.msk.f32.mxu1 %vm6108_vm0, %v6107_v1 }
0x246b   :  { %5627 = vmatprep.subr.bf16.mxu1 %v6106_v0 }
0x246e   :  { %5629 = vmatpush3.bf16.msra.mxu1 %v5628_v61 }
0x246f   :  { %5630 = vmatprep.subr.bf16.mxu1 %v6106_v0 }
0x2472   :  { %5632 = vmatpush3.bf16.msra.mxu1 %v5631_v2 }
0x2473   :  { %5633 = vmatprep.subr.bf16.mxu1 %v6106_v0 }
0x2476   :  { %5635 = vmatpush3.bf16.msra.mxu1 %v5634_v8  ;;  %v1497_v8 = vadd.f32 %v7589_v47, %v6764_v16 }
0x2477   :  { %5636 = vmatprep.subr.bf16.mxu1 %v6106_v0 }
0x2478   :  { %v1498_v38 = vmax.f32 %v1497_v8, 0.0 }
0x2479   :  { %5093 = vmatmul.mubr.msk.f32.vlgmr.msra.gmra.mrb[34].mxu1 %vm666_vm5, %v449_v10 }
0x247a   :  { %5103 = vmatprep.mubr.msk.f32.mxu1 %vm6108_vm0, %v6107_v1 }
0x253c   :  { %v3404_v3 = vpop.f32.mrb[32].mxu1 }
0x253d   :  { %v3405_v6 = vadd.f32 %v4297_v46, %v3404_v3  ;;  %v5040_v54 = vpop.f32.mrb[33].mxu1  ;;  %v1500_v46 = vmax.f32 %v1499_v12, 0.0  ;;  %v1502_v3 = vmax.f32 %v1501_v13, 0.0 }
0x253f   :  { %v3408_v9 = vmax.f32 %v3405_v6, 0.0  ;;  %v1503_v6 = vadd.f32 %v7589_v47, %v6816_v58 }
0x2541   :  { %5074 = vmatmul.mubr.f32.vlgmr.msra.gmra.mrb[24].mxu0 %v3408_v9  ;;  %v1504_v54 = vmax.f32 %v1503_v6, 0.0 }
0x2542   :  { %5644 = vmatpush3.bf16.msra.mxu0 %v5643_v15  ;;  %5122 = vmatprep.mubr.msk.f32.mxu0 %vm6108_vm0, %v6107_v1  ;;  %v4317_v15 = vld [vmem:[#allocation21 + $0x3] ss:$0 sm:$0xff] }
0x2543   :  { %5645 = vmatprep.subr.bf16.mxu0 %v6106_v0 }
0x2546   :  { %5647 = vmatpush3.bf16.msra.mxu0 %v5646_v22 }
0x2547   :  { %5648 = vmatprep.subr.bf16.mxu0 %v6106_v0 }
0x254a   :  { %5650 = vmatpush3.bf16.msra.mxu0 %v5649_v23  ;;  %v1961_v23 = vrot.slane %v1952_v37, %v6726_v7 }
0x254b   :  { %5651 = vmatprep.subr.bf16.mxu0 %v6106_v0 }
0x254c   :  { %v7576_v33 = vpop.f32.mrb[34].mxu1  ;;  %v2036_v28 = vadd.f32 %v7007_v50, %v1961_v23 }
0x254d   :  { %v5094_v34 = vpop.f32.mrb[35].mxu1 }
0x254e   :  { %5653 = vmatpush3.bf16.msra.mxu0 %v5652_v31  ;;  %v4177_v32 = vmul.f32 -1.442695, %v2036_v28 }
0x254f   :  { %5666 = vmatprep.subr.bf16.mxu0 %v6106_v0 }
0x2551   :  { %5123 = vmatmul.mubr.msk.f32.vlgmr.msra.gmra.mrb[26].mxu0 %vm666_vm5, %v543_v35 }
0x2552   :  { %5160 = vmatprep.mubr.msk.f32.mxu0 %vm6108_vm0, %v6107_v1 }
0x2614   :  { %v3500_v40 = vpop.f32.mrb[24].mxu0 }
0x2615   :  { %v3501_v14 = vadd.f32 %v4315_v36, %v3500_v40  ;;  %v5075_v42 = vpop.f32.mrb[25].mxu0 }
0x2617   :  { %3505 = vrot.lane.b32.xlu1 %v3501_v14, %s6110_s9 }
0x2624   :  { %v7583_v11 = vpop.f32.mrb[26].mxu0 }
0x2625   :  { %v5124_v43 = vpop.f32.mrb[27].mxu0 }
0x2689   :  { %v3506_v44 = vpop.permute.xlu1 %3505 }
0x268a   :  { %v3508_v45 = vadd.f32 %v3506_v44, %v7445_v24 }
0x268c   :  { %3514 = vrot.lane.b32.xlu0 %v3508_v45, %s6110_s9 }
0x2690   :  { %1303 = vrot.lane.b32.xlu0 %v6770_v21, %s6111_s13  ;;  %v2034_v21 = vadd.f32 %v7005_v49, %v1957_v41 }
0x2692   :  { %5762 = vtanh.f32 %v2034_v21  ;;  %v4176_v22 = vmul.f32 -1.442695, %v2034_v21 }
0x2694   :  { %1381 = vrot.lane.b32.xlu0 %v6768_v19, %s6111_s13  ;;  %v4318_v19 = vld [vmem:[%s7801_s22 + $0x3] ss:$0 sm:$0xff]  ;;  %5764 = vpow2.f32 %v4176_v22 }
0x2695   :  { %5766 = vpow2.f32 %v4177_v32 }
0x2698   :  { %1480 = vrot.lane.b32.xlu0 %v7589_v47, %s6102_s5 }
0x269c   :  { %1459 = vrot.lane.b32.xlu0 %v6816_v58, %s6111_s13  ;;  %v5763_v9 = vpop.eup %5762 }
0x269e   :  { %v5765_v35 = vpop.eup %5764 }
0x269f   :  { %v2041_v14 = vadd.f32 1.0, %v5765_v35 }
0x26a1   :  { %5768 = vrcp.f32 %v2041_v14  ;;  %v3664_v14 = vld [vmem:[%s7804_s25 + $0xc0] sm:$0xff] }
0x26fe   :  { %v3515_v48 = vpop.permute.xlu0 %3514 }
0x26ff   :  { %v3517_v51 = vsel %vm666_vm5, %v3515_v48, 0.0  ;;  %v5767_v48 = vpop.eup %5766 }
0x2700   :  { %3518 = vadd.xlane.f32.xlu1 %v3517_v51 }
0x2702   :  { %v1304_v52 = vpop.permute.xlu0 %1303 }
0x2703   :  { %v1306_v24 = vadd.f32 %v1304_v52, %v6655_v30  ;;  %v2048_v52 = vadd.f32 1.0, %v5767_v48 }
0x2705   :  { %v1491_v7 = vadd.f32 %v7589_v47, %v1306_v24  ;;  %5770 = vrcp.f32 %v2048_v52 }
0x2706   :  { %v1382_v53 = vpop.permute.xlu0 %1381 }
0x2707   :  { %v7597_v56 = vadd.f32 %v1382_v53, %v6756_v55  ;;  %v1492_v42 = vmax.f32 %v1491_v7, 0.0 }
0x2709   :  { %v1493_v43 = vadd.f32 %v7589_v47, %v7597_v56 }
0x270a   :  { %v1481_v57 = vpop.permute.xlu0 %1480 }
0x270b   :  { %v1489_v59 = vadd.f32 %v1481_v57, %v6764_v16  ;;  %v1483_v60 = vadd.f32 %v1481_v57, %v1306_v24  ;;  %v1485_v61 = vadd.f32 %v1481_v57, %v7597_v56  ;;  %v5769_v24 = vpop.eup %5768 }
0x270d   :  { %v1490_v2 = vmax.f32 %v1489_v59, 0.0  ;;  %v1484_v29 = vmax.f32 %v1483_v60, 0.0  ;;  %v1486_v34 = vmax.f32 %v1485_v61, 0.0 }
0x270e   :  { %v1460_v62 = vpop.permute.xlu0 %1459 }
0x270f   :  { %v1462_v63 = vadd.f32 %v1460_v62, %v6766_v17  ;;  %v5771_v59 = vpop.eup %5770 }
0x2711   :  { %v1495_v4 = vadd.f32 %v7589_v47, %v1462_v63  ;;  %1524 = vrot.lane.b32.xlu1 %v1490_v2, %s6102_s5  ;;  %v1487_v5 = vadd.f32 %v1481_v57, %v1462_v63 }
0x2713   :  { %v1496_v10 = vmax.f32 %v1495_v4, 0.0  ;;  %v1488_v40 = vmax.f32 %v1487_v5, 0.0 }
0x2715   :  { %1539 = vrot.lane.b32.xlu1 %v1496_v10, %s6110_s9 }
0x2719   :  { %1544 = vrot.lane.b32.xlu1 %v1498_v38, %s6110_s9 }
0x271d   :  { %1549 = vrot.lane.b32.xlu1 %v1500_v46, %s6110_s9 }
0x2721   :  { %1554 = vrot.lane.b32.xlu1 %v1502_v3, %s6110_s9 }
0x2725   :  { %1559 = vrot.lane.b32.xlu1 %v1504_v54, %s6110_s9 }
0x2729   :  { %3539 = vrot.lane.b32.xlu1 %v4317_v15, %s6110_s9 }
0x272d   :  { %3548 = vrot.lane.b32.xlu1 %v4318_v19, %s6110_s9  ;;  %v3650_v19 = vld [vmem:[%s7804_s25 + $0x50] sm:$0xff] }
0x2731   :  { %2052 = vrot.lane.b32.xlu1 %v5763_v9, %s6110_s9  ;;  %v3651_v9 = vld [vmem:[%s7804_s25 + $0x58] sm:$0xff] }
0x278d   :  { %v3519_v58 = vpop.xlane.xlu1 %3518 }
0x278e   :  { %v3520_v18 = vmul.f32 0.015625, %v3519_v58 }
0x2790   :  { %v7625_v20 = vsub.f32 %v3508_v45, %v3520_v18  ;;  %v1494_v45 = vmax.f32 %v1493_v43, 0.0  ;;  %v5640_v18 = vpack.c.bf16 %v3651_v9, %v3650_v19  ;;  %v3666_v43 = vld [vmem:[%s7804_s25 + $0xd0] sm:$0xff] }
0x2791   :  { %v7627_v49 = vpop.permute.xlu1 %1524 }
0x2792   :  { %v3522_v25 = vmul.f32 %v7625_v20, %v7625_v20 }
0x2794   :  { %3524 = vrot.lane.b32.xlu0 %v3522_v25, %s6110_s9 }
0x2795   :  { %v7632_v26 = vpop.permute.xlu1 %1539 }
0x2798   :  { %1469 = vrot.lane.b32.xlu0 %v7589_v47, %s6110_s9 }
0x2799   :  { %v7637_v27 = vpop.permute.xlu1 %1544 }
0x279c   :  { %1509 = vrot.lane.b32.xlu0 %v1484_v29, %s6102_s5 }
0x279d   :  { %v7641_v31 = vpop.permute.xlu1 %1549 }
0x27a0   :  { %1514 = vrot.lane.b32.xlu0 %v1486_v34, %s6102_s5 }
0x27a1   :  { %v7644_v36 = vpop.permute.xlu1 %1554 }
0x27a4   :  { %1519 = vrot.lane.b32.xlu0 %v1488_v40, %s6102_s5  ;;  %v3661_v40 = vld [vmem:[%s7804_s25 + $0xa8] sm:$0xff] }
0x27a5   :  { %v1560_v50 = vpop.permute.xlu1 %1559 }
0x27a8   :  { %1529 = vrot.lane.b32.xlu0 %v1492_v42, %s6110_s9 }
0x27a9   :  { %v7651_v44 = vpop.permute.xlu1 %3539 }
0x27ac   :  { %1534 = vrot.lane.b32.xlu0 %v1494_v45, %s6110_s9  ;;  %v3667_v45 = vld [vmem:[%s7804_s25 + $0xd8] sm:$0xff] }
0x27ad   :  { %v7654_v51 = vpop.permute.xlu1 %3548  ;;  %v5676_v48 = vpack.c.bf16 %v3667_v45, %v3666_v43 }
0x27b1   :  { %v2053_v53 = vpop.permute.xlu1 %2052 }
0x27b2   :  { %v2055_v57 = vmul.f32 %v5769_v24, %v2053_v53 }
0x27b4   :  { %5772 = vtanh.f32 %v2055_v57  ;;  %v3652_v57 = vld [vmem:[%s7804_s25 + $0x60] sm:$0xff] }
0x27be   :  { %v5773_v60 = vpop.eup %5772 }
0x27bf   :  { %v7656_v47 = vmul.f32 %v5773_v60, %v5771_v59  ;;  %v3653_v59 = vld [vmem:[%s7804_s25 + $0x68] sm:$0xff] }
0x27c0   :  { %v5655_v60 = vpack.c.bf16 %v3653_v59, %v3652_v57 }
0x2806   :  { %v3525_v56 = vpop.permute.xlu0 %3524 }
0x2807   :  { %v3527_v61 = vsel %vm666_vm5, %v3525_v56, 0.0  ;;  %v3654_v56 = vld [vmem:[%s7804_s25 + $0x70] sm:$0xff] }
0x2808   :  { %3528 = vadd.xlane.f32.xlu0 %v3527_v61  ;;  %v3655_v61 = vld [vmem:[%s7804_s25 + $0x78] sm:$0xff] }
0x280a   :  { %v1470_v62 = vpop.permute.xlu0 %1469 }
0x280b   :  { %v1472_v63 = vadd.f32 %v1470_v62, %v6655_v30  ;;  %v1474_v2 = vadd.f32 %v1470_v62, %v6756_v55  ;;  %v1476_v4 = vadd.f32 %v1470_v62, %v6766_v17  ;;  %v1478_v10 = vadd.f32 %v1470_v62, %v6764_v16  ;;  %v3648_v30 = vld [vmem:[%s7804_s25 + $0x40] sm:$0xff]  ;;  %v3649_v55 = vld [vmem:[%s7804_s25 + $0x48] sm:$0xff] }
0x280c   :  { %v5637_v54 = vpack.c.bf16 %v3649_v55, %v3648_v30 }
0x280d   :  { %v1473_v5 = vmax.f32 %v1472_v63, 0.0  ;;  %v1475_v8 = vmax.f32 %v1474_v2, 0.0  ;;  %v1477_v38 = vmax.f32 %v1476_v4, 0.0  ;;  %v1479_v46 = vmax.f32 %v1478_v10, 0.0  ;;  %v3656_v2 = vld [vmem:[%s7804_s25 + $0x80] sm:$0xff]  ;;  %v3657_v4 = vld [vmem:[%s7804_s25 + $0x88] sm:$0xff] }
0x280e   :  { %v1510_v12 = vpop.permute.xlu0 %1509  ;;  %5638 = vmatpush3.bf16.msra.mxu1 %v5637_v54  ;;  %v5658_v63 = vpack.c.bf16 %v3655_v61, %v3654_v56 }
0x280f   :  { %v1505_v13 = vadd.f32 %v1475_v8, %v1473_v5  ;;  %5639 = vmatprep.subr.bf16.mxu1 %v6106_v0  ;;  %v5661_v8 = vpack.c.bf16 %v3657_v4, %v3656_v2 }
0x2811   :  { %v1506_v37 = vadd.f32 %v1505_v13, %v1477_v38  ;;  %v3659_v38 = vld [vmem:[%s7804_s25 + $0x98] sm:$0xff] }
0x2812   :  { %v1515_v41 = vpop.permute.xlu0 %1514  ;;  %5641 = vmatpush3.bf16.msra.mxu1 %v5640_v18 }
0x2813   :  { %v1507_v3 = vadd.f32 %v1506_v37, %v1479_v46  ;;  %5654 = vmatprep.subr.bf16.mxu1 %v6106_v0 }
0x2815   :  { %v1512_v6 = vadd.f32 %v1510_v12, %v1507_v3  ;;  %v3658_v12 = vld [vmem:[%s7804_s25 + $0x90] sm:$0xff] }
0x2816   :  { %v1520_v21 = vpop.permute.xlu0 %1519  ;;  %v5664_v37 = vpack.c.bf16 %v3659_v38, %v3658_v12 }
0x2817   :  { %v1517_v17 = vadd.f32 %v1515_v41, %v1512_v6  ;;  %v3669_v41 = vld [vmem:[%s7804_s25 + $0xe8] sm:$0xff] }
0x2819   :  { %v1522_v16 = vadd.f32 %v1520_v21, %v1517_v17  ;;  %v4319_v21 = vld [vmem:[%s7803_s24] ss:$0 sm:$0xff] }
0x281a   :  { %v1530_v15 = vpop.permute.xlu0 %1529  ;;  %v3637_v30 = vadd.f32 %v4319_v21, %v7576_v33 }
0x281b   :  { %v1527_v58 = vadd.f32 %v7627_v49, %v1522_v16  ;;  %v3660_v49 = vld [vmem:[%s7804_s25 + $0xa0] sm:$0xff] }
0x281d   :  { %v1532_v22 = vadd.f32 %v1530_v15, %v1527_v58 }
0x281e   :  { %v1535_v25 = vpop.permute.xlu0 %1534 }
0x281f   :  { %v1537_v23 = vadd.f32 %v1535_v25, %v1532_v22 }
0x2821   :  { %v1542_v28 = vadd.f32 %v7632_v26, %v1537_v23  ;;  %v3662_v26 = vld [vmem:[%s7804_s25 + $0xb0] sm:$0xff] }
0x2823   :  { %v1547_v29 = vadd.f32 %v7637_v27, %v1542_v28  ;;  %v5667_v27 = vpack.c.bf16 %v3661_v40, %v3660_v49 }
0x2825   :  { %v1552_v32 = vadd.f32 %v7641_v31, %v1547_v29  ;;  %v3663_v31 = vld [vmem:[%s7804_s25 + $0xb8] sm:$0xff]  ;;  %5668 = vmatpush3.bf16.msra.mxu0 %v5667_v27 }
0x2826   :  { %5669 = vmatprep.subr.bf16.mxu0 %v6106_v0 }
0x2827   :  { %v1557_v34 = vadd.f32 %v7644_v36, %v1552_v32  ;;  %v5670_v36 = vpack.c.bf16 %v3663_v31, %v3662_v26 }
0x2829   :  { %v1562_v35 = vadd.f32 %v1560_v50, %v1557_v34  ;;  %v3665_v50 = vld [vmem:[%s7804_s25 + $0xc8] sm:$0xff]  ;;  %5671 = vmatpush3.bf16.msra.mxu0 %v5670_v36  ;;  %v4326_v34 = vld [vmem:[%s7805_s26] ss:$0 sm:$0xff] }
0x282a   :  { %v5673_v42 = vpack.c.bf16 %v3665_v50, %v3664_v14  ;;  %5672 = vmatprep.subr.bf16.mxu0 %v6106_v0 }
0x282b   :  { %v1563_v7 = vmul.f32 0.06666667, %v1562_v35 }
0x282d   :  { %3673 = vrot.lane.b32.xlu0 %v1563_v7, %s6110_s9  ;;  %5674 = vmatpush3.bf16.msra.mxu0 %v5673_v42 }
0x282e   :  { %5675 = vmatprep.subr.bf16.mxu0 %v6106_v0 }
0x2831   :  { %5677 = vmatpush3.bf16.msra.mxu0 %v5676_v48 }
0x2895   :  { %v3529_v52 = vpop.xlane.xlu0 %3528 }
0x2896   :  { %v3530_v24 = vmul.f32 0.015625, %v3529_v52 }
0x2898   :  { %v3531_v53 = vadd.f32 1e-05, %v3530_v24 }
0x289a   :  { %5774 = vrsqrt.f32 %v3531_v53 }
0x289f   :  { %v3674_v62 = vpop.permute.xlu0 %3673 }
0x28a0   :  { %5104 = vmatmul.mubr.msk.f32.vlgmr.msra.gmra.mrb[36].mxu1 %vm3675_vm6, %v3674_v62 }
0x28a1   :  { %5656 = vmatpush3.bf16.msra.mxu1 %v5655_v60  ;;  %5141 = vmatprep.mubr.msk.f32.mxu1 %vm6108_vm0, %v6107_v1 }
0x28a2   :  { %5657 = vmatprep.subr.bf16.mxu1 %v6106_v0 }
0x28a4   :  { %v5775_v5 = vpop.eup %5774 }
0x28a5   :  { %5659 = vmatpush3.bf16.msra.mxu1 %v5658_v63  ;;  %v3533_v10 = vmul.f32 %v5775_v5, %v7625_v20  ;;  %v3668_v20 = vld [vmem:[%s7804_s25 + $0xe0] sm:$0xff] }
0x28a6   :  { %5660 = vmatprep.subr.bf16.mxu1 %v6106_v0  ;;  %v5679_v3 = vpack.c.bf16 %v3669_v41, %v3668_v20 }
0x28a7   :  { %v3542_v13 = vmul.f32 %v7651_v44, %v3533_v10  ;;  %v3670_v44 = vld [vmem:[%s7804_s25 + $0xf0] sm:$0xff] }
0x28a9   :  { %5662 = vmatpush3.bf16.msra.mxu1 %v5661_v8  ;;  %v3551_v46 = vadd.f32 %v7654_v51, %v3542_v13  ;;  %v3671_v51 = vld [vmem:[%s7804_s25 + $0xf8] sm:$0xff] }
0x28aa   :  { %5663 = vmatprep.subr.bf16.mxu1 %v6106_v0  ;;  %v5682_v6 = vpack.c.bf16 %v3671_v51, %v3670_v44 }
0x28ab   :  { %3896 = vrot.lane.b32.xlu1 %v3551_v46, %s6110_s9 }
0x28ad   :  { %5665 = vmatpush3.bf16.msra.mxu1 %v5664_v37 }
0x28ae   :  { %5678 = vmatprep.subr.bf16.mxu1 %v6106_v0 }
0x28b0   :  { %5142 = vmatmul.mubr.msk.f32.vlgmr.msra.gmra.mrb[38].mxu1 %vm666_vm5, %v7656_v47  ;;  %v4059_v47 = vld [vmem:[%s7806_s27] sm:$0x1] }
0x28b1   :  { %5680 = vmatpush3.bf16.msra.mxu1 %v5679_v3  ;;  %5171 = vmatprep.mubr.msk.f32.mxu1 %vm6108_vm0, %v6107_v1  ;;  %v4061_v55 = vsel %vm4060_vm7, %v4059_v47, -inf }
0x28b2   :  { %5681 = vmatprep.subr.bf16.mxu1 %v6106_v0 }
0x28b5   :  { %5683 = vmatpush3.bf16.msra.mxu1 %v5682_v6 }
0x28b8   :  { %5172 = vmatmul.mubr.msk.f32.vlgmr.msra.gmra.mrb[40].mxu1 %vm3675_vm6, %v3637_v30 }
0x28cf   :  { %4062 = vmax.xlane.f32.xlu1 %v4061_v55 }
0x291d   :  { %v3897_v17 = vpop.permute.xlu1 %3896 }
0x291e   :  { %5161 = vmatmul.mubr.msk.f32.vlgmr.msra.gmra.mrb[28].mxu0 %vm666_vm5, %v3897_v17 }
0x295c   :  { %v4063_v0 = vpop.xlane.xlu1 %4062 }
0x295d   :  { %v4064_v1 = vsub.f32 %v4059_v47, %v4063_v0 }
0x295f   :  { %v4065_v54 = vmul.f32 1.442695, %v4064_v1 }
0x2961   :  { %5776 = vpow2.f32 %v4065_v54 }
0x296b   :  { %v5777_v16 = vpop.eup %5776 }
0x296c   :  { %v4067_v15 = vsel %vm4060_vm7, %v5777_v16, 0.0 }
0x296d   :  { %4068 = vadd.xlane.f32.xlu0 %v4067_v15 }
0x2973   :  { %v3744_v33 = vpop.f32.mrb[36].mxu1 }
0x2974   :  { %v3818_v19 = vadd.f32 %v7583_v11, %v3744_v33  ;;  %v5105_v9 = vpop.f32.mrb[37].mxu1 }
0x2983   :  { %v3890_v58 = vpop.f32.mrb[38].mxu1 }
0x2984   :  { %v3894_v18 = vadd.f32 %v3890_v58, %v3818_v19  ;;  %v5143_v22 = vpop.f32.mrb[39].mxu1 }
0x298b   :  { %v4040_v25 = vpop.f32.mrb[40].mxu1 }
0x298c   :  { %v5173_v23 = vpop.f32.mrb[41].mxu1 }
0x29f1   :  { %v3966_v28 = vpop.f32.mrb[28].mxu0 }
0x29f2   :  { %v3970_v29 = vadd.f32 %v3966_v28, %v3894_v18  ;;  %v5162_v32 = vpop.f32.mrb[29].mxu0 }
0x29f4   :  { %v4044_v35 = vadd.f32 %v4040_v25, %v3970_v29 }
0x29f6   :  { %v4052_v7 = vadd.f32 %v4326_v34, %v4044_v35 }
0x29f8   :  { %v4327_v49 = vmul.f32 -1.442695, %v4052_v7 }
0x29fa   :  { %5778 = vpow2.f32 %v4327_v49  ;;  %v4069_v40 = vpop.xlane.xlu0 %4068 }
0x29fb   :  { %5780 = vrcp.f32 %v4069_v40 }
0x2a04   :  { %v5779_v11 = vpop.eup %5778 }
0x2a05   :  { %v4056_v26 = vadd.f32 1.0, %v5779_v11  ;;  %v5781_v27 = vpop.eup %5780 }
0x2a06   :  { %v4071_v31 = vmul.f32 %v5781_v27, %v5777_v16 }
0x2a07   :  { %5782 = vrcp.f32 %v4056_v26 }
0x2a08   :  { %v4076_v36 = vrot.slane %v4071_v31, %v6551_v39 }
0x2a11   :  { %v5783_v14 = vpop.eup %5782 }
0x2a12   :  { %v4078_v50 = vmul.f32 %v5783_v14, %v4076_v36 }
0x2a14   :  { %v4080_v42 = vsel %vm4079_vm8, %v4078_v50, 0.0 }
0x2a15   :  { %4081 = vadd.xlane.f32.xlu1 %v4080_v42 }
0x2aa2   :  { %v4082_v43 = vpop.xlane.xlu1 %4081 }
0x2aa3   :  { %4084 = vst.msk [vmem:[%s7851_s23] sm:$0xff] %vm4083_vm9, %v4082_v43 }
0x2aa4   :  { %4089 = vsyncpa [#allocation3], 1 }
0x2aa5   :  { %4090 = vsyncpa [#allocation5], 1 }
0x2aa6   :  { %4091 = vsyncpa [#allocation8], 1 }
0x2aa7   :  { %4092 = vsyncpa [#allocation11], 1 }
0x2aa8   :  { %4093 = vsyncpa [#allocation14], 1 }
0x2aa9   :  { %4094 = vsyncpa [#allocation17], 1 }
0x2aaa   :  { %4095 = vsyncpa [#allocation20], 1 }

</bundles_post_ra>
